<compile_context>
chip_gen: v7x
topology: tpu7x:2x2x1
jax: 0.10.0
libtpu: 0.0.40
codegen_flags: <defaults>
</compile_context>

<pallas_src>
import jax
import jax.numpy as jnp
from jax import lax
from jax.experimental import pallas as pl
from jax.experimental.pallas import tpu as pltpu


# ----------------------------------------------------------------------------
# helpers
# ----------------------------------------------------------------------------
def _round_up(v, m):
    return (v + m - 1) // m * m


def _pick_spatial_tile(L, max_tl=2048):
    """Pad L to a multiple of 128 and pick the largest lane-tile (multiple of
    128, <= max_tl) that divides the padded length."""
    Lp = _round_up(L, 128)
    tl = 128
    t = 128
    while t <= min(Lp, max_tl):
        if Lp % t == 0:
            tl = t
        t += 128
    return Lp, tl


_SQRT_2_OVER_PI = 0.7978845608028654
_GELU_C = 0.044715


def _gelu_tanh_f32(x):
    # tanh-approx GELU; tanh lowers to the EUP (separate bundle slot), keeping
    # the VALU free.  |error| vs exact erf-GELU is ~3e-4, far below the bf16
    # MXU noise floor tolerated by the test.
    x = x.astype(jnp.float32)
    inner = jnp.float32(_SQRT_2_OVER_PI) * (x + jnp.float32(_GELU_C) * x * x * x)
    return jnp.float32(0.5) * x * (1.0 + jnp.tanh(inner))


# ----------------------------------------------------------------------------
# Pallas kernel: fused fc1 -> GELU -> fc2(+folded BN) on one (C, tl) tile
# ----------------------------------------------------------------------------
def _mlp_channel_kernel(x_ref, w1_ref, b1_ref, w2_ref, b2_ref, o_ref):
    # x tile: (C, tl); cast to bf16 in VMEM (free-ish) for the MXU.
    x = x_ref[...].astype(jnp.bfloat16)
    # fc1: (mlp, C) @ (C, tl) -> (mlp, tl), f32 accumulation on the MXU.
    h = jnp.dot(w1_ref[...], x, preferred_element_type=jnp.float32)
    h = _gelu_tanh_f32(h + b1_ref[...])          # bias broadcast over lanes
    # fc2 (eval-mode BatchNorm folded into w2/b2 in the wrapper).
    y = jnp.dot(w2_ref[...], h.astype(jnp.bfloat16),
                preferred_element_type=jnp.float32)
    o_ref[...] = (y + b2_ref[...]).astype(o_ref.dtype)


def mlp_channel_forward(x, p, *, max_tl=2048, bn_eps=1e-5):
    """MlpChannel forward (eval mode).

    x: (B, C, D, H, W) float32.
    p: dict with fc1_w (mlp,C,1,1,1), fc1_b (mlp,), fc2_w (C,mlp,1,1,1),
       fc2_b (C,), bat {gamma, beta, mean, var} each (C,).
    Returns (B, C, D, H, W) float32.
    """
    B, C, D, H, W = x.shape
    mlp_dim = p['fc1_w'].shape[0]

    # 1x1x1 convs == channel matmuls, weights used as LHS (channels on sublanes).
    w1 = p['fc1_w'].reshape(mlp_dim, C)                    # (mlp, C)
    b1 = p['fc1_b'].astype(jnp.float32).reshape(mlp_dim, 1)
    w2 = p['fc2_w'].reshape(C, mlp_dim)                    # (C, mlp)
    b2 = p['fc2_b'].astype(jnp.float32)

    # Fold eval-mode BatchNorm3d into fc2 weights / bias.
    bn = p['bat']
    scale = bn['gamma'] * lax.rsqrt(bn['var'] + bn_eps)    # (C,)
    w2f = (w2 * scale[:, None]).astype(jnp.bfloat16)
    b2f = ((b2 - bn['mean']) * scale + bn['beta']).reshape(C, 1)
    w1b = w1.astype(jnp.bfloat16)

    # Native layout: (B, C, L) — reshape only, no transpose.
    L = D * H * W
    Lp, tl = _pick_spatial_tile(L, max_tl)
    x3 = x.reshape(B, C, L)
    if Lp != L:
        # Rare path: cast before padding so the XLA pad copy moves half the bytes.
        x3 = jnp.pad(x3.astype(jnp.bfloat16), ((0, 0), (0, 0), (0, Lp - L)))
    x_bytes = jnp.dtype(x3.dtype).itemsize

    grid = (B, Lp // tl)

    # VMEM budget: double-buffered streamed tiles + resident weights/biases
    # (default double-buffered) + f32 intermediate h, its bf16 cast and GELU
    # temporaries, plus slack.  Capped at 48 MiB (headroom within v7x's 64 MiB).
    vmem_bytes = int(
        2 * tl * C * x_bytes            # streamed x tile
        + 2 * tl * C * 4                # streamed out tile (f32)
        + 2 * 2 * (mlp_dim * C * 2)     # w1 + w2 (bf16)
        + 2 * (mlp_dim + C) * 4         # biases (f32)
        + 4 * mlp_dim * tl * 4          # h (f32) + GELU temporaries
        + mlp_dim * tl * 2              # bf16 cast of h for fc2
        + (4 << 20))                    # slack
    vmem_bytes = min(vmem_bytes, 48 << 20)

    out_p = pl.pallas_call(
        _mlp_channel_kernel,
        out_shape=jax.ShapeDtypeStruct((B, C, Lp), jnp.float32),
        grid=grid,
        in_specs=[
            pl.BlockSpec((None, C, tl), lambda b, l: (b, 0, l)),  # x (streamed)
            pl.BlockSpec((mlp_dim, C), lambda b, l: (0, 0)),      # w1 (resident)
            pl.BlockSpec((mlp_dim, 1), lambda b, l: (0, 0)),      # b1
            pl.BlockSpec((C, mlp_dim), lambda b, l: (0, 0)),      # w2 (BN folded)
            pl.BlockSpec((C, 1), lambda b, l: (0, 0)),            # b2 (BN folded)
        ],
        out_specs=pl.BlockSpec((None, C, tl), lambda b, l: (b, 0, l)),
        compiler_params=pltpu.CompilerParams(
            dimension_semantics=("parallel", "parallel"),
            vmem_limit_bytes=vmem_bytes),
    )(x3, w1b, b1, w2f, b2f)

    out = out_p[:, :, :L] if Lp != L else out_p
    return out.reshape(B, C, D, H, W)


# ----------------------------------------------------------------------------
# pure-JAX f32 reference (for tolerance check)
# ----------------------------------------------------------------------------
def _reference(x, p, bn_eps=1e-5):
    B, C, D, H, W = x.shape
    mlp_dim = p['fc1_w'].shape[0]
    xt = x.reshape(B, C, -1).transpose(0, 2, 1)           # (B, L, C)
    w1 = p['fc1_w'].reshape(mlp_dim, C).T
    w2 = p['fc2_w'].reshape(C, mlp_dim).T
    h = xt @ w1 + p['fc1_b']
    h = jax.nn.gelu(h, approximate=False)                 # dropout = identity (eval)
    y = h @ w2 + p['fc2_b']
    bn = p['bat']
    y = (y - bn['mean']) * lax.rsqrt(bn['var'] + bn_eps) * bn['gamma'] + bn['beta']
    return y.transpose(0, 2, 1).reshape(B, C, D, H, W)


# ----------------------------------------------------------------------------
if __name__ == "__main__":
    key = jax.random.PRNGKey(0)
    k1, k2, k3, k4, k5, k6, k7 = jax.random.split(key, 7)

    # Small demo config consistent with the module (hidden_size=C, mlp_dim=2C).
    B, C, D, H, W = 2, 32, 16, 16, 16
    mlp_dim = 2 * C

    x = jax.random.normal(k1, (B, C, D, H, W), dtype=jnp.float32)
    params = dict(
        fc1_w=0.05 * jax.random.normal(k2, (mlp_dim, C, 1, 1, 1), jnp.float32),
        fc1_b=0.02 * jax.random.normal(k3, (mlp_dim,), jnp.float32),
        fc2_w=0.05 * jax.random.normal(k4, (C, mlp_dim, 1, 1, 1), jnp.float32),
        fc2_b=0.02 * jax.random.normal(k5, (C,), jnp.float32),
        bat=dict(gamma=1.0 + 0.01 * jax.random.normal(k6, (C,), jnp.float32),
                 beta=0.01 * jax.random.normal(k7, (C,), jnp.float32),
                 mean=jnp.zeros((C,), jnp.float32),
                 var=jnp.ones((C,), jnp.float32)),
    )

    out = jax.block_until_ready(mlp_channel_forward(x, params))
    ref = jax.block_until_ready(_reference(x, params))

    assert out.shape == (B, C, D, H, W), out.shape
    assert bool(jnp.all(jnp.isfinite(out)))
    # bf16 MXU inputs with f32 accumulation (+ tanh-GELU approx): ~1e-3..1e-2 rel.
    rel_err = float(jnp.max(jnp.abs(out - ref)) / (jnp.max(jnp.abs(ref)) + 1e-6))
    assert rel_err < 2e-2, rel_err
    print("KERNEL_OK")
</pallas_src>

<mosaic_0001>
module attributes {stable_mosaic.version = 11 : i64} {
  func.func @_mlp_channel_kernel(%arg0: i32, %arg1: i32, %arg2: memref<1x32x2048xf32, #tpu.memory_space<vmem>>, %arg3: memref<64x32xbf16, #tpu.memory_space<vmem>>, %arg4: memref<64x1xf32, #tpu.memory_space<vmem>>, %arg5: memref<32x64xbf16, #tpu.memory_space<vmem>>, %arg6: memref<32x1xf32, #tpu.memory_space<vmem>>, %arg7: memref<1x32x2048xf32, #tpu.memory_space<vmem>>) attributes {dimension_semantics = [#tpu.dimension_semantics<parallel>, #tpu.dimension_semantics<parallel>], iteration_bounds = array<i64: 2, 2>, scalar_prefetch = 0 : i64, scratch_operands = 0 : i64, tpu.core_type = #tpu.core_type<tc>, window_params = [{transform_indices = @transform_0, window_bounds = array<i64: 1, 32, 2048>}, {pipeline_mode = #tpu.pipeline_mode<synchronous>, transform_indices = @transform_1, window_bounds = array<i64: 64, 32>}, {pipeline_mode = #tpu.pipeline_mode<synchronous>, transform_indices = @transform_2, window_bounds = array<i64: 64, 1>}, {pipeline_mode = #tpu.pipeline_mode<synchronous>, transform_indices = @transform_3, window_bounds = array<i64: 32, 64>}, {pipeline_mode = #tpu.pipeline_mode<synchronous>, transform_indices = @transform_4, window_bounds = array<i64: 32, 1>}, {transform_indices = @transform_5, window_bounds = array<i64: 1, 32, 2048>}]} {
    %c0 = arith.constant 0 : index
    %c0_0 = arith.constant 0 : index
    %c0_1 = arith.constant 0 : index
    %0 = vector.load %arg2[%c0, %c0_0, %c0_1] : memref<1x32x2048xf32, #tpu.memory_space<vmem>>, vector<1x32x2048xf32>
    %1 = vector.shape_cast %0 : vector<1x32x2048xf32> to vector<32x2048xf32>
    %2 = arith.truncf %1 : vector<32x2048xf32> to vector<32x2048xbf16>
    %c0_2 = arith.constant 0 : index
    %c0_3 = arith.constant 0 : index
    %3 = vector.load %arg3[%c0_2, %c0_3] : memref<64x32xbf16, #tpu.memory_space<vmem>>, vector<64x32xbf16>
    %cst = arith.constant dense<0.000000e+00> : vector<64x2048xf32>
    %4 = tpu.matmul %3, %2, %cst {dimension_numbers = #tpu.dot_dimension_numbers<[1], [0], [0], [1], [0, 0, 1, 1], [], []>} : vector<64x32xbf16>, vector<32x2048xbf16>, vector<64x2048xf32> -> vector<64x2048xf32>
    %c0_4 = arith.constant 0 : index
    %c0_5 = arith.constant 0 : index
    %5 = vector.load %arg4[%c0_4, %c0_5] : memref<64x1xf32, #tpu.memory_space<vmem>>, vector<64x1xf32>
    %6 = vector.broadcast %5 : vector<64x1xf32> to vector<64x2048xf32>
    %7 = arith.addf %4, %6 : vector<64x2048xf32>
    %cst_6 = arith.constant 4.471500e-02 : f32
    %8 = vector.broadcast %cst_6 : f32 to vector<64x2048xf32>
    %9 = arith.mulf %8, %7 : vector<64x2048xf32>
    %10 = arith.mulf %9, %7 : vector<64x2048xf32>
    %11 = arith.mulf %10, %7 : vector<64x2048xf32>
    %12 = arith.addf %7, %11 : vector<64x2048xf32>
    %cst_7 = arith.constant 0.797884583 : f32
    %13 = vector.broadcast %cst_7 : f32 to vector<64x2048xf32>
    %14 = arith.mulf %13, %12 : vector<64x2048xf32>
    %cst_8 = arith.constant 5.000000e-01 : f32
    %15 = vector.broadcast %cst_8 : f32 to vector<64x2048xf32>
    %16 = arith.mulf %15, %7 : vector<64x2048xf32>
    %17 = math.tanh %14 : vector<64x2048xf32>
    %cst_9 = arith.constant 1.000000e+00 : f32
    %18 = vector.broadcast %cst_9 : f32 to vector<64x2048xf32>
    %19 = arith.addf %18, %17 : vector<64x2048xf32>
    %20 = arith.mulf %16, %19 : vector<64x2048xf32>
    %c0_10 = arith.constant 0 : index
    %c0_11 = arith.constant 0 : index
    %21 = vector.load %arg5[%c0_10, %c0_11] : memref<32x64xbf16, #tpu.memory_space<vmem>>, vector<32x64xbf16>
    %22 = arith.truncf %20 : vector<64x2048xf32> to vector<64x2048xbf16>
    %cst_12 = arith.constant dense<0.000000e+00> : vector<32x2048xf32>
    %23 = tpu.matmul %21, %22, %cst_12 {dimension_numbers = #tpu.dot_dimension_numbers<[1], [0], [0], [1], [0, 0, 1, 1], [], []>} : vector<32x64xbf16>, vector<64x2048xbf16>, vector<32x2048xf32> -> vector<32x2048xf32>
    %c0_13 = arith.constant 0 : index
    %c0_14 = arith.constant 0 : index
    %24 = vector.load %arg6[%c0_13, %c0_14] : memref<32x1xf32, #tpu.memory_space<vmem>>, vector<32x1xf32>
    %25 = vector.broadcast %24 : vector<32x1xf32> to vector<32x2048xf32>
    %26 = arith.addf %23, %25 : vector<32x2048xf32>
    %c0_15 = arith.constant 0 : index
    %c0_16 = arith.constant 0 : index
    %c0_17 = arith.constant 0 : index
    %27 = vector.load %arg7[%c0_15, %c0_16, %c0_17] : memref<1x32x2048xf32, #tpu.memory_space<vmem>>, vector<1x32x2048xf32>
    %28 = vector.shape_cast %27 : vector<1x32x2048xf32> to vector<32x2048xf32>
    %29 = vector.shape_cast %26 : vector<32x2048xf32> to vector<1x32x2048xf32>
    tpu.vector_store %arg7[%c0_15, %c0_16, %c0_17], %29 {strides = array<i32>} : memref<1x32x2048xf32, #tpu.memory_space<vmem>>, vector<1x32x2048xf32>,
    return
  }
  func.func @transform_0(%arg0: i32, %arg1: i32) -> (i32, i32, i32) {
    %c0_i32 = arith.constant 0 : i32
    %c0_i32_0 = arith.constant 0 : i32
    return %arg0, %c0_i32, %arg1 : i32, i32, i32
  }
  func.func @transform_1(%arg0: i32, %arg1: i32) -> (i32, i32) {
    %c0_i32 = arith.constant 0 : i32
    %c0_i32_0 = arith.constant 0 : i32
    %c0_i32_1 = arith.constant 0 : i32
    return %c0_i32, %c0_i32_0 : i32, i32
  }
  func.func @transform_2(%arg0: i32, %arg1: i32) -> (i32, i32) {
    %c0_i32 = arith.constant 0 : i32
    %c0_i32_0 = arith.constant 0 : i32
    %c0_i32_1 = arith.constant 0 : i32
    return %c0_i32, %c0_i32_0 : i32, i32
  }
  func.func @transform_3(%arg0: i32, %arg1: i32) -> (i32, i32) {
    %c0_i32 = arith.constant 0 : i32
    %c0_i32_0 = arith.constant 0 : i32
    %c0_i32_1 = arith.constant 0 : i32
    return %c0_i32, %c0_i32_0 : i32, i32
  }
  func.func @transform_4(%arg0: i32, %arg1: i32) -> (i32, i32) {
    %c0_i32 = arith.constant 0 : i32
    %c0_i32_0 = arith.constant 0 : i32
    %c0_i32_1 = arith.constant 0 : i32
    return %c0_i32, %c0_i32_0 : i32, i32
  }
  func.func @transform_5(%arg0: i32, %arg1: i32) -> (i32, i32, i32) {
    %c0_i32 = arith.constant 0 : i32
    %c0_i32_0 = arith.constant 0 : i32
    return %arg0, %c0_i32, %arg1 : i32, i32, i32
  }
}

</mosaic_0001>

<bundles_post_ra>
// kernel: tpu_custom_call.1
= control target key start
LH: loop header
LB: loop body
LE: loop exit
PB: predicated region body
PF: predicated region fallthrough
CT: control target
= control target key end

     0   :  { %10 = vsyncpa [#allocation3], 0  ;;  %s6064_s0 = inlined_call_operand.hbm [shape: f32[2,32,4096], index: 0, kind: input, shape index: {}]   ;;  %s6065_s1 = inlined_call_operand.vmem [shape: bf16[64,32], index: 1, kind: input, shape index: {}]   ;;  %s6066_s2 = inlined_call_operand.vmem [shape: f32[64,1], index: 2, kind: input, shape index: {}]   ;;  %s6067_s3 = inlined_call_operand.vmem [shape: bf16[32,64], index: 3, kind: input, shape index: {}]   ;;  %s6068_s4 = inlined_call_operand.vmem [shape: f32[32,1], index: 4, kind: input, shape index: {}]   ;;  %s6069_s5 = inlined_call_operand.hbm [shape: f32[2,32,4096], index: 5, kind: output, shape index: {}]  }
   0x1   :  { %12 = vsyncpa [#allocation3 + $0x1], 0 }
   0x2   :  { %13 = vsyncpa [#allocation4], 0 }
   0x3   :  { %15 = vsyncpa [#allocation4 + $0x1], 0  ;;  %s3479_s18 = smov 0   ;;  %s3481_s19 = smov 0  }
   0x4   :  { %s3483_s20 = smov 0   ;;  %s3485_s21 = smov 0  }
   0x5   :  { %s3487_s22 = smov 0   ;;  %s3489_s23 = smov 0  }
   0x6   :  { %s3491_s24 = smov 0   ;;  %s3493_s25 = smov 0  }
   0x7 LB: > { %6200 = sst [smem:[#allocation8_spill]] %s3410_s18  ;;  %s2888_s26 = sadd.s32 4294967295, %s3438_s25   ;;  %s3438_s25 = sphi %s3493_s25, %s21_s25   ;;  %s3434_s24 = sphi %s3491_s24, %s6628_s24   ;;  %s3430_s23 = sphi %s3489_s23, %s6627_s23   ;;  %s3426_s22 = sphi %s3487_s22, %s6626_s22   ;;  %s3422_s21 = sphi %s3485_s21, %s6625_s21   ;;  %s3418_s20 = sphi %s3483_s20, %s6624_s20   ;;  %s3414_s19 = sphi %s3481_s19, %s6623_s19   ;;  %s3410_s18 = sphi %s3479_s18, %s6622_s18  }
   0x8   : > { %s2889_s27 = sadd.s32 4294967294, %s3438_s25   ;;  %s30_s28 = sadd.s32 1, %s3430_s23 }
   0x9   : > { %s33_s29 = sadd.s32 1, %s3434_s24  ;;  %p31_p0 = scmp.ge.s32.totalorder %s30_s28, 2 }
   0xa   : > { %s42_s30 = sadd.s32 1, %s3418_s20  ;;  %p49_p1 = scmp.ne.s32.totalorder %s3418_s20, %s3414_s19 }
   0xb   : > { %p50_p2 = scmp.eq.s32.totalorder %s3438_s25, 0  ;;  %s6630_s28 = smov (%p31_p0, %s30_s28), 0 }
   0xc   : > { %6201 = sst [smem:[#allocation9_spill]] %s6630_s28  ;;  %s6632_s29 = smov (!%p31_p0, %s33_s29), %s3434_s24 }
   0xd   : > { %s38_s6 = ssub.s32 %s3430_s23, %s6630_s28  ;;  %p3532_p3 = por %p50_p2, %p49_p1 }
   0xe   : > { %p35_p4 = scmp.ge.s32.totalorder %s6632_s29, 2  ;;  %p55_p5 = scmp.ne.s32.totalorder %s3414_s19, %s3410_s18 }
   0xf   : > { %p56_p6 = scmp.eq.s32.totalorder %s2888_s26, 0  ;;  %p165_p7 = scmp.eq.s32.totalorder %s2888_s26, 3 }
  0x10   : > { %s6634_s29 = smov (%p35_p4, %s6632_s29), 0  ;;  %p171_p10 = scmp.eq.s32.totalorder %s2889_s27, 3 }
  0x11   : > { %p3540_p8 = por %p56_p6, %p55_p5  ;;  %p3544_p9 = por %p165_p7, %p49_p1 }
  0x12   : > { %s37_s10 = ssub.s32 %s3434_s24, %s6634_s29  ;;  %p3550_p12 = por %p171_p10, %p55_p5 }
  0x13   : > { %s6204_s9 = scalar_select %p3544_p9, 1, 0 }
  0x14   : > { %s39_s11 = sor.u32 %s38_s6, %s37_s10  ;;  %p2971_p13 = scmp.lt.s32.totalorder %s3438_s25, 4 }
  0x15   : > { %p40_p11 = scmp.eq.s32.totalorder %s39_s11, 0  ;;  %s203_s13 = sand.u32 1, %s3418_s20  }
  0x16   : > { %s6205_s12 = scalar_select %p3550_p12, 1, 0 }
  0x17   : > { %s3557_s14 = scalar_select %p40_p11, %s3418_s20, %s42_s30  }
  0x18   : > { %s2892_s15 = sshll.u32 %s203_s13, 9  ;;  %s2893_s16 = sshll.u32 %s3430_s23, 4 }
  0x19   : > { %s2894_s17 = sshll.u32 %s3434_s24, 7  ;;  %s207_s26 = scalar_lea.vmem [#allocation2], %s2892_s15 }
  0x1a   : > { %s216_s28 = sshll.u32 %s207_s26, 4  ;;  %s213_s18 = sadd.s32 %s2894_s17, %s2893_s16  ;;  %s3561_s28 = int_to_ptr.vmem [resolvable:$true] %s216_s28 }
  0x1b   : > { %s2895_s27 = sshll.u32 %s213_s18, 7  ;;  %p3565_p0 = pnand %p2971_p13, %p3532_p3 }
  0x1c   : > { %s3572_s30 = scalar_lea.hbm %s6064_s0, %s2895_s27  ;;  %s3575_s15 = scalar_lea.sflag [#allocation3], %s203_s13 }
  0x1d   : > { %s3310_s18 = scalar_lea.hbm %s3572_s30, 8192  ;;  %p3312_p3 = pneg %p3565_p0 }
  0x1e   : > { %p3311_p2 = scmp.ne.s32.totalorder %s3572_s30, %s3310_s18  ;;  %s3315_s17 = scalar_lea.hbm %s6064_s0, 32768 }
  0x1f   : > { %p3316_p6 = scmp.lt.u32.totalorder %s3572_s30, %s6064_s0  ;;  %p3317_p7 = scmp.lt.u32.totalorder %s3315_s17, %s3310_s18 }
  0x20   : > { %p3313_p4 = pnand %p3312_p3, %p3311_p2  ;;  %p3319_p11 = scmp.lt.u32.totalorder %s3310_s18, %s3572_s30 }
  0x21   : > { %p3318_p10 = por %p3317_p7, %p3316_p6 }
  0x22   : > { %p3314_p5 = pneg %p3313_p4 }
  0x23   : > { %p3320_p13 = por %p3319_p11, %p3318_p10 }
  0x25   : > { %p3321_p1 = pnand %p3320_p13, %p3314_p5 }
  0x27   : > { %3324 = shalt.err (!%p3321_p1)
}
  0x28   : > { %s3325_s13 = scalar_lea.vmem %s3561_s28, 8192  ;;  %s3440_s10 = smov [#allocation2]  }
  0x29   : > { %p3326_p2 = scmp.ne.s32.totalorder %s3561_s28, %s3325_s13  ;;  %s3330_s11 = sshll.u32 %s3440_s10, 4  ;;  %s3331_s11 = int_to_ptr.vmem [resolvable:$false] %s3330_s11 }
  0x2a   : > { %s3332_s7 = scalar_lea.vmem %s3331_s11, 16384  ;;  %p3333_p9 = scmp.lt.s32.totalorder %s3561_s28, %s3331_s11 }
  0x2b   : > { %p3328_p4 = pnand %p3326_p2, %p3312_p3  ;;  %p3334_p6 = scmp.lt.s32.totalorder %s3332_s7, %s3325_s13 }
  0x2d   : > { %p3329_p12 = pneg %p3328_p4  ;;  %p3335_p7 = por %p3334_p6, %p3333_p9 }
  0x2f   : > { %p3336_p10 = pnand %p3335_p7, %p3329_p12 }
  0x31   : > { %3339 = shalt.err (!%p3336_p10)
}
  0x32   : > { %s3441_s18 = smov 4096   ;;  %s3442_s16 = smov 2048  }
  0x33   : > { %s3443_s17 = smov 128   ;;  %p224_p1 = scmp.lt.s32.totalorder %s3438_s25, 5 }
  0x34   : > { %2966 = dma.hbm_to_vmem [thread:$0]  (!%p3565_p0), %s3572_s30, 8192, %s3561_s28, %s3575_s15, %s3441_s18, %s3442_s16, %s3443_s17  }
  0x35   : > { %p6207_p3 = scmp.ge.s32.totalorder %s3438_s25, 1 }
  0x37   : > { %p225_p5 = pnand %p6207_p3, %p224_p1 }
  0x39   : > { %228 = sbr.rel (%p225_p5) target bundleno = 888 (0x378), region = 40 }
  0x40   : > { %s3607_s26 = sand.u32 1, %s3414_s19  }
  0x41   : > { %s2897_s27 = sshll.u32 %s3607_s26, 9  ;;  %s231_s13 = scalar_lea.sflag [#allocation3], %s3607_s26 }
  0x42   : > { %s3613_s10 = scalar_lea.vmem [#allocation2], %s2897_s27 }
  0x43   : > { %3401 = dma.done.wait (%p3540_p8), %s231_s13, 8192  }
  0x44   : > { %3403 = vsyncadd (%p3540_p8), %s231_s13, 4294959104  ;;  %v6073_v0 = vmov 0   ;;  %v265_v1 = vld [vmem:[%s3613_s10 + $0x8] sm:$0xff]  ;;  %v267_v3 = vld [vmem:[%s3613_s10 + $0x18] sm:$0xff]  ;;  %vm436_vm0 = vcmask 261120   ;;  %vm2287_vm1 = vcmask 523264  }
  0x45   : > { %481 = vmatprep.mubr.bf16.mxu0 %v6073_v0  ;;  %554 = vmatprep.mubr.bf16.mxu1 %v6073_v0  ;;  %v281_v2 = vld [vmem:[%s3613_s10 + $0x88] sm:$0xff]  ;;  %v283_v5 = vld [vmem:[%s3613_s10 + $0x98] sm:$0xff]  ;;  %v264_v6 = vld [vmem:[%s3613_s10] sm:$0xff]  ;;  %s5865_s7 = scalar_lea.vmem [#allocation5], %s2897_s27  ;;  %s2954_s27 = sshll.u32 %s3422_s21, 4 }
  0x46   : > { %3044 = vset.pattern.permute.xlu0 %v6073_v0  ;;  %3045 = vset.pattern.permute.xlu1 %v6073_v0  ;;  %v329_v4 = vpack.c.bf16 %v281_v2, %v265_v1  ;;  %v280_v7 = vld [vmem:[%s3613_s10 + $0x80] sm:$0xff]  ;;  %v331_v8 = vpack.c.bf16 %v283_v5, %v267_v3  ;;  %v266_v10 = vld [vmem:[%s3613_s10 + $0x10] sm:$0xff]  ;;  %v297_v12 = vld [vmem:[%s3613_s10 + $0x108] sm:$0xff]  ;;  %s2955_s18 = sshll.u32 %s3426_s22, 7  ;;  %s2798_s21 = sshll.u32 %s5865_s7, 4  ;;  %s5998_s21 = int_to_ptr.vmem [resolvable:$true] %s2798_s21 }
  0x47   : > { %v328_v9 = vpack.c.bf16 %v280_v7, %v264_v6  ;;  %v282_v11 = vld [vmem:[%s3613_s10 + $0x90] sm:$0xff]  ;;  %v313_v14 = vld [vmem:[%s3613_s10 + $0x188] sm:$0xff]  ;;  %v299_v15 = vld [vmem:[%s3613_s10 + $0x118] sm:$0xff]  ;;  %s2795_s16 = sadd.s32 %s2955_s18, %s2954_s27  ;;  %s2783_s28 = scalar_lea.sflag [#allocation4], %s3607_s26 }
  0x48   : > { %449 = vmatprep.subr.bf16.mxu0 %v329_v4  ;;  %v330_v13 = vpack.c.bf16 %v282_v11, %v266_v10  ;;  %v315_v16 = vld [vmem:[%s3613_s10 + $0x198] sm:$0xff]  ;;  %522 = vmatprep.subr.bf16.mxu1 %v331_v8  ;;  %v345_v17 = vpack.c.bf16 %v313_v14, %v297_v12  ;;  %v296_v19 = vld [vmem:[%s3613_s10 + $0x100] sm:$0xff]  ;;  %v298_v21 = vld [vmem:[%s3613_s10 + $0x110] sm:$0xff]  ;;  %s2956_s22 = sshll.u32 %s2795_s16, 7  ;;  %s3340_s8 = scalar_lea.vmem %s5998_s21, 8192 }
  0x49   : > { %450 = vmatpush1.bf16.msra.mxu0 %v328_v9  ;;  %v347_v18 = vpack.c.bf16 %v315_v16, %v299_v15  ;;  %v312_v20 = vld [vmem:[%s3613_s10 + $0x180] sm:$0xff]  ;;  %v314_v23 = vld [vmem:[%s3613_s10 + $0x190] sm:$0xff]  ;;  %v269_v26 = vld [vmem:[%s3613_s10 + $0x28] sm:$0xff]  ;;  %s6006_s13 = scalar_lea.hbm %s6069_s5, %s2956_s22  ;;  %p3341_p8 = scmp.ne.s32.totalorder %s5998_s21, %s3340_s8 }
  0x4a   : > { %523 = vmatpush1.bf16.msra.mxu1 %v330_v13  ;;  %v344_v22 = vpack.c.bf16 %v312_v20, %v296_v19  ;;  %451 = vmatprep.subr.bf16.mxu0 %v345_v17  ;;  %v346_v24 = vpack.c.bf16 %v314_v23, %v298_v21  ;;  %v3642_v25 = vld [vmem:[%s6065_s1] sm:$0xff]   ;;  %v285_v27 = vld [vmem:[%s3613_s10 + $0xa8] sm:$0xff]  ;;  %v271_v29 = vld [vmem:[%s3613_s10 + $0x38] sm:$0xff]  ;;  %p6618_p9 = scmp.ne.s32.totalorder %s6204_s9, 0  ;;  %s3445_s6 = smov [#allocation5]  }
  0x4b   : > { %524 = vmatprep.subr.bf16.mxu1 %v347_v18  ;;  %v333_v28 = vpack.c.bf16 %v285_v27, %v269_v26  ;;  %v287_v30 = vld [vmem:[%s3613_s10 + $0xb8] sm:$0xff]  ;;  %v268_v31 = vld [vmem:[%s3613_s10 + $0x20] sm:$0xff]  ;;  %v270_v34 = vld [vmem:[%s3613_s10 + $0x30] sm:$0xff]  ;;  %s3344_s30 = sshll.u32 %s3445_s6, 4  ;;  %s3345_s30 = int_to_ptr.vmem [resolvable:$false] %s3344_s30 }
  0x4c   : > { %v335_v32 = vpack.c.bf16 %v287_v30, %v271_v29  ;;  %v284_v33 = vld [vmem:[%s3613_s10 + $0xa0] sm:$0xff]  ;;  %v286_v35 = vld [vmem:[%s3613_s10 + $0xb0] sm:$0xff]  ;;  %v301_v38 = vld [vmem:[%s3613_s10 + $0x128] sm:$0xff]  ;;  %p3342_p12 = pnand %p3341_p8, %p6618_p9  ;;  %s3346_s15 = scalar_lea.vmem %s3345_s30, 16384 }
  0x4d   : > { %452 = vmatpush1.bf16.msra.mxu0 %v344_v22  ;;  %v332_v36 = vpack.c.bf16 %v284_v33, %v268_v31  ;;  %v334_v37 = vpack.c.bf16 %v286_v35, %v270_v34  ;;  %v317_v39 = vld [vmem:[%s3613_s10 + $0x1a8] sm:$0xff]  ;;  %v303_v40 = vld [vmem:[%s3613_s10 + $0x138] sm:$0xff]  ;;  %v300_v43 = vld [vmem:[%s3613_s10 + $0x120] sm:$0xff]  ;;  %p3347_p11 = scmp.lt.s32.totalorder %s5998_s21, %s3345_s30  ;;  %p3348_p13 = scmp.lt.s32.totalorder %s3346_s15, %s3340_s8 }
  0x4e   : > { %525 = vmatpush1.bf16.msra.mxu1 %v346_v24  ;;  %595 = vmatprep.subr.bf16.mxu0 %v333_v28  ;;  %v349_v41 = vpack.c.bf16 %v317_v39, %v301_v38  ;;  %v319_v42 = vld [vmem:[%s3613_s10 + $0x1b8] sm:$0xff]  ;;  %v316_v44 = vld [vmem:[%s3613_s10 + $0x1a0] sm:$0xff]  ;;  %v302_v47 = vld [vmem:[%s3613_s10 + $0x130] sm:$0xff]  ;;  %p3343_p0 = pneg %p3342_p12 }
  0x4f   : > { %668 = vmatprep.subr.bf16.mxu1 %v335_v32  ;;  %v351_v45 = vpack.c.bf16 %v319_v42, %v303_v40  ;;  %v348_v46 = vpack.c.bf16 %v316_v44, %v300_v43  ;;  %v318_v48 = vld [vmem:[%s3613_s10 + $0x1b0] sm:$0xff]  ;;  %v3669_v49 = vld [vmem:[%s6065_s1 + $0x8] sm:$0xff]   ;;  %v275_v53 = vld [vmem:[%s3613_s10 + $0x58] sm:$0xff]  ;;  %p3349_p2 = por %p3348_p13, %p3347_p11 }
  0x50   : > { %2903 = vmatmul.mubr.msk.bf16.vlgmr.msra.gmra.mrb[0].mxu0 %vm436_vm0, %v3642_v25  ;;  %v350_v50 = vpack.c.bf16 %v318_v48, %v302_v47  ;;  %v273_v51 = vld [vmem:[%s3613_s10 + $0x48] sm:$0xff]  ;;  %v291_v54 = vld [vmem:[%s3613_s10 + $0xd8] sm:$0xff]  ;;  %v3684_v57 = vld [vmem:[%s6065_s1 + $0x10] sm:$0xff]  }
  0x51   : > { %2907 = vmatmul.mubr.msk.bf16.vlgmr.msra.gmra.mrb[0].mxu1 %vm436_vm0, %v3642_v25  ;;  %596 = vmatpush1.bf16.msra.mxu0 %v332_v36  ;;  %v289_v52 = vld [vmem:[%s3613_s10 + $0xc8] sm:$0xff]  ;;  %v339_v56 = vpack.c.bf16 %v291_v54, %v275_v53  ;;  %v368_v58 = vld [vmem:[%s6066_s2] sm:$0xff]  ;;  %v370_v59 = vld [vmem:[%s6066_s2 + $0x10] sm:$0xff]  ;;  %p3350_p4 = pnand %p3349_p2, %p3343_p0 }
  0x52   : > { %669 = vmatpush1.bf16.msra.mxu1 %v334_v37  ;;  %491 = vmatprep.mubr.bf16.mxu0 %v6073_v0  ;;  %v337_v55 = vpack.c.bf16 %v289_v52, %v273_v51  ;;  %v369_v60 = vld [vmem:[%s6066_s2 + $0x8] sm:$0xff]  ;;  %v371_v61 = vld [vmem:[%s6066_s2 + $0x18] sm:$0xff]  ;;  %v372_v63 = vld [vmem:[%s6066_s2 + $0x20] sm:$0xff] }
  0x53   : > { %564 = vmatprep.mubr.bf16.mxu1 %v6073_v0  ;;  %597 = vmatprep.subr.bf16.mxu0 %v349_v41  ;;  %v3707_v62 = vld [vmem:[%s6065_s1 + $0x18] sm:$0xff]   ;;  %v373_v1 = vld [vmem:[%s6066_s2 + $0x28] sm:$0xff]  ;;  %v374_v2 = vld [vmem:[%s6066_s2 + $0x30] sm:$0xff] }
  0x54   : > { %670 = vmatprep.subr.bf16.mxu1 %v351_v45  ;;  %378 = vperm.xlu0 %3044, %v368_v58   ;;  %v375_v3 = vld [vmem:[%s6066_s2 + $0x38] sm:$0xff]  ;;  %v272_v4 = vld [vmem:[%s3613_s10 + $0x40] sm:$0xff]  ;;  %v274_v6 = vld [vmem:[%s3613_s10 + $0x50] sm:$0xff] }
  0x55   : > { %598 = vmatpush1.bf16.msra.mxu0 %v348_v46  ;;  %388 = vperm.xlu1 %3045, %v370_v59   ;;  %v288_v5 = vld [vmem:[%s3613_s10 + $0xc0] sm:$0xff]  ;;  %v290_v7 = vld [vmem:[%s3613_s10 + $0xd0] sm:$0xff]  ;;  %v305_v8 = vld [vmem:[%s3613_s10 + $0x148] sm:$0xff] }
  0x56   : > { %671 = vmatpush1.bf16.msra.mxu1 %v350_v50  ;;  %741 = vmatprep.subr.bf16.mxu0 %v337_v55  ;;  %v321_v9 = vld [vmem:[%s3613_s10 + $0x1c8] sm:$0xff]  ;;  %v2253_v10 = vld [vmem:[%s6068_s4] sm:$0xff]  ;;  %v336_v11 = vpack.c.bf16 %v288_v5, %v272_v4  ;;  %v307_v12 = vld [vmem:[%s3613_s10 + $0x158] sm:$0xff]  ;;  %v338_v15 = vpack.c.bf16 %v290_v7, %v274_v6 }
  0x57   : > { %814 = vmatprep.subr.bf16.mxu1 %v339_v56  ;;  %v323_v13 = vld [vmem:[%s3613_s10 + $0x1d8] sm:$0xff]  ;;  %v2254_v14 = vld [vmem:[%s6068_s4 + $0x8] sm:$0xff]  ;;  %v304_v16 = vld [vmem:[%s3613_s10 + $0x140] sm:$0xff]  ;;  %v353_v19 = vpack.c.bf16 %v321_v9, %v305_v8 }
  0x58   : > { %2904 = vmatmul.mubr.msk.bf16.gmra.mrb[4].mxu0 %vm436_vm0, %v3669_v49  ;;  %383 = vperm.xlu0 %3044, %v369_v60   ;;  %v320_v17 = vld [vmem:[%s3613_s10 + $0x1c0] sm:$0xff]  ;;  %v306_v18 = vld [vmem:[%s3613_s10 + $0x150] sm:$0xff]  ;;  %v277_v21 = vld [vmem:[%s3613_s10 + $0x68] sm:$0xff]  ;;  %v355_v23 = vpack.c.bf16 %v323_v13, %v307_v12 }
  0x59   : > { %2908 = vmatmul.mubr.msk.bf16.gmra.mrb[4].mxu1 %vm436_vm0, %v3669_v49  ;;  %501 = vmatprep.mubr.bf16.mxu0 %v6073_v0  ;;  %v322_v20 = vld [vmem:[%s3613_s10 + $0x1d0] sm:$0xff]  ;;  %v293_v22 = vld [vmem:[%s3613_s10 + $0xe8] sm:$0xff]  ;;  %v279_v24 = vld [vmem:[%s3613_s10 + $0x78] sm:$0xff]  ;;  %v352_v27 = vpack.c.bf16 %v320_v17, %v304_v16 }
  0x5a   : > { %574 = vmatprep.mubr.bf16.mxu1 %v6073_v0  ;;  %393 = vperm.xlu1 %3045, %v371_v61   ;;  %v295_v26 = vld [vmem:[%s3613_s10 + $0xf8] sm:$0xff]  ;;  %v2255_v28 = vld [vmem:[%s6068_s4 + $0x10] sm:$0xff]  ;;  %v354_v29 = vpack.c.bf16 %v322_v20, %v306_v18  ;;  %v341_v30 = vpack.c.bf16 %v293_v22, %v277_v21  ;;  %v276_v33 = vld [vmem:[%s3613_s10 + $0x60] sm:$0xff] }
  0x5b   : > { %v2256_v31 = vld [vmem:[%s6068_s4 + $0x18] sm:$0xff]  ;;  %v343_v32 = vpack.c.bf16 %v295_v26, %v279_v24  ;;  %v292_v34 = vld [vmem:[%s3613_s10 + $0xe0] sm:$0xff]  ;;  %v278_v35 = vld [vmem:[%s3613_s10 + $0x70] sm:$0xff] }
  0x5c   : > { %398 = vperm.xlu0 %3044, %v372_v63   ;;  %v294_v36 = vld [vmem:[%s3613_s10 + $0xf0] sm:$0xff]  ;;  %v309_v37 = vld [vmem:[%s3613_s10 + $0x168] sm:$0xff]  ;;  %v340_v39 = vpack.c.bf16 %v292_v34, %v276_v33  ;;  %v311_v40 = vld [vmem:[%s3613_s10 + $0x178] sm:$0xff] }
  0x5d   : > { %v325_v38 = vld [vmem:[%s3613_s10 + $0x1e8] sm:$0xff]  ;;  %v327_v41 = vld [vmem:[%s3613_s10 + $0x1f8] sm:$0xff]  ;;  %v342_v42 = vpack.c.bf16 %v294_v36, %v278_v35  ;;  %v308_v43 = vld [vmem:[%s3613_s10 + $0x160] sm:$0xff] }
  0x5e   : > { %403 = vperm.xlu1 %3045, %v373_v1   ;;  %v324_v44 = vld [vmem:[%s3613_s10 + $0x1e0] sm:$0xff]  ;;  %v357_v45 = vpack.c.bf16 %v325_v38, %v309_v37  ;;  %v310_v46 = vld [vmem:[%s3613_s10 + $0x170] sm:$0xff]  ;;  %v359_v48 = vpack.c.bf16 %v327_v41, %v311_v40 }
  0x5f   : > { %v326_v47 = vld [vmem:[%s3613_s10 + $0x1f0] sm:$0xff]  ;;  %v356_v50 = vpack.c.bf16 %v324_v44, %v308_v43 }
  0x60   : > { %2905 = vmatmul.mubr.msk.bf16.gmra.mrb[8].mxu0 %vm436_vm0, %v3684_v57  ;;  %408 = vperm.xlu0 %3044, %v374_v2   ;;  %v358_v51 = vpack.c.bf16 %v326_v47, %v310_v46 }
  0x61   : > { %2909 = vmatmul.mubr.msk.bf16.gmra.mrb[8].mxu1 %vm436_vm0, %v3684_v57  ;;  %511 = vmatprep.mubr.bf16.mxu0 %v6073_v0 }
  0x62   : > { %584 = vmatprep.mubr.bf16.mxu1 %v6073_v0  ;;  %413 = vperm.xlu1 %3045, %v375_v3  }
  0x64   : > { %2259 = vperm.xlu0 %3044, %v2253_v10  }
  0x66   : > { %2264 = vperm.xlu1 %3045, %v2254_v14  }
  0x68   : > { %2906 = vmatmul.mubr.msk.bf16.gmra.mrb[12].mxu0 %vm436_vm0, %v3707_v62  ;;  %2269 = vperm.xlu0 %3044, %v2255_v28  }
  0x69   : > { %2910 = vmatmul.mubr.msk.bf16.gmra.mrb[12].mxu1 %vm436_vm0, %v3707_v62  ;;  %627 = vmatprep.mubr.bf16.mxu0 %v6073_v0 }
  0x6a   : > { %700 = vmatprep.mubr.bf16.mxu1 %v6073_v0  ;;  %2274 = vperm.xlu1 %3045, %v2256_v31  }
  0x70   : > { %2911 = vmatmul.mubr.msk.bf16.vlgmr.msra.gmra.mrb[16].mxu0 %vm436_vm0, %v3642_v25 }
  0x71   : > { %2915 = vmatmul.mubr.msk.bf16.vlgmr.msra.gmra.mrb[16].mxu1 %vm436_vm0, %v3642_v25  ;;  %742 = vmatpush1.bf16.msra.mxu0 %v336_v11 }
  0x72   : > { %815 = vmatpush1.bf16.msra.mxu1 %v338_v15  ;;  %637 = vmatprep.mubr.bf16.mxu0 %v6073_v0 }
  0x73   : > { %710 = vmatprep.mubr.bf16.mxu1 %v6073_v0  ;;  %743 = vmatprep.subr.bf16.mxu0 %v353_v19 }
  0x74   : > { %816 = vmatprep.subr.bf16.mxu1 %v355_v23 }
  0x75   : > { %744 = vmatpush1.bf16.msra.mxu0 %v352_v27 }
  0x76   : > { %817 = vmatpush1.bf16.msra.mxu1 %v354_v29  ;;  %887 = vmatprep.subr.bf16.mxu0 %v341_v30 }
  0x77   : > { %960 = vmatprep.subr.bf16.mxu1 %v343_v32 }
  0x78   : > { %2912 = vmatmul.mubr.msk.bf16.gmra.mrb[20].mxu0 %vm436_vm0, %v3669_v49 }
  0x79   : > { %2916 = vmatmul.mubr.msk.bf16.gmra.mrb[20].mxu1 %vm436_vm0, %v3669_v49  ;;  %647 = vmatprep.mubr.bf16.mxu0 %v6073_v0 }
  0x7a   : > { %720 = vmatprep.mubr.bf16.mxu1 %v6073_v0 }
  0x80   : > { %2913 = vmatmul.mubr.msk.bf16.gmra.mrb[24].mxu0 %vm436_vm0, %v3684_v57 }
  0x81   : > { %2917 = vmatmul.mubr.msk.bf16.gmra.mrb[24].mxu1 %vm436_vm0, %v3684_v57  ;;  %657 = vmatprep.mubr.bf16.mxu0 %v6073_v0 }
  0x82   : > { %730 = vmatprep.mubr.bf16.mxu1 %v6073_v0 }
  0x88   : > { %2914 = vmatmul.mubr.msk.bf16.gmra.mrb[28].mxu0 %vm436_vm0, %v3707_v62 }
  0x89   : > { %2918 = vmatmul.mubr.msk.bf16.gmra.mrb[28].mxu1 %vm436_vm0, %v3707_v62  ;;  %773 = vmatprep.mubr.bf16.mxu0 %v6073_v0 }
  0x8a   : > { %846 = vmatprep.mubr.bf16.mxu1 %v6073_v0 }
  0x90   : > { %2919 = vmatmul.mubr.msk.bf16.vlgmr.msra.gmra.mrb[32].mxu0 %vm436_vm0, %v3642_v25 }
  0x91   : > { %2923 = vmatmul.mubr.msk.bf16.vlgmr.msra.gmra.mrb[32].mxu1 %vm436_vm0, %v3642_v25  ;;  %888 = vmatpush1.bf16.msra.mxu0 %v340_v39 }
  0x92   : > { %961 = vmatpush1.bf16.msra.mxu1 %v342_v42  ;;  %783 = vmatprep.mubr.bf16.mxu0 %v6073_v0 }
  0x93   : > { %856 = vmatprep.mubr.bf16.mxu1 %v6073_v0  ;;  %889 = vmatprep.subr.bf16.mxu0 %v357_v45 }
  0x94   : > { %962 = vmatprep.subr.bf16.mxu1 %v359_v48 }
  0x95   : > { %890 = vmatpush1.bf16.msra.mxu0 %v356_v50 }
  0x96   : > { %963 = vmatpush1.bf16.msra.mxu1 %v358_v51 }
  0x98   : > { %2920 = vmatmul.mubr.msk.bf16.gmra.mrb[36].mxu0 %vm436_vm0, %v3669_v49 }
  0x99   : > { %2924 = vmatmul.mubr.msk.bf16.gmra.mrb[36].mxu1 %vm436_vm0, %v3669_v49  ;;  %793 = vmatprep.mubr.bf16.mxu0 %v6073_v0 }
  0x9a   : > { %866 = vmatprep.mubr.bf16.mxu1 %v6073_v0 }
  0xa0   : > { %2921 = vmatmul.mubr.msk.bf16.gmra.mrb[40].mxu0 %vm436_vm0, %v3684_v57 }
  0xa1   : > { %2925 = vmatmul.mubr.msk.bf16.gmra.mrb[40].mxu1 %vm436_vm0, %v3684_v57  ;;  %803 = vmatprep.mubr.bf16.mxu0 %v6073_v0 }
  0xa2   : > { %876 = vmatprep.mubr.bf16.mxu1 %v6073_v0 }
  0xa8   : > { %2922 = vmatmul.mubr.msk.bf16.gmra.mrb[44].mxu0 %vm436_vm0, %v3707_v62 }
  0xa9   : > { %2926 = vmatmul.mubr.msk.bf16.gmra.mrb[44].mxu1 %vm436_vm0, %v3707_v62  ;;  %919 = vmatprep.mubr.bf16.mxu0 %v6073_v0 }
  0xaa   : > { %992 = vmatprep.mubr.bf16.mxu1 %v6073_v0 }
  0xb0   : > { %2927 = vmatmul.mubr.msk.bf16.vlgmr.msra.gmra.mrb[48].mxu0 %vm436_vm0, %v3642_v25 }
  0xb1   : > { %2931 = vmatmul.mubr.msk.bf16.vlgmr.msra.gmra.mrb[48].mxu1 %vm436_vm0, %v3642_v25  ;;  %929 = vmatprep.mubr.bf16.mxu0 %v6073_v0 }
  0xb2   : > { %1002 = vmatprep.mubr.bf16.mxu1 %v6073_v0 }
  0xb8   : > { %2928 = vmatmul.mubr.msk.bf16.gmra.mrb[52].mxu0 %vm436_vm0, %v3669_v49 }
  0xb9   : > { %2932 = vmatmul.mubr.msk.bf16.gmra.mrb[52].mxu1 %vm436_vm0, %v3669_v49  ;;  %939 = vmatprep.mubr.bf16.mxu0 %v6073_v0 }
  0xba   : > { %1012 = vmatprep.mubr.bf16.mxu1 %v6073_v0 }
  0xc0   : > { %2929 = vmatmul.mubr.msk.bf16.gmra.mrb[56].mxu0 %vm436_vm0, %v3684_v57 }
  0xc1   : > { %2933 = vmatmul.mubr.msk.bf16.gmra.mrb[56].mxu1 %vm436_vm0, %v3684_v57  ;;  %949 = vmatprep.mubr.bf16.mxu0 %v6073_v0 }
  0xc2   : > { %1022 = vmatprep.mubr.bf16.mxu1 %v6073_v0 }
  0xc8   : > { %2930 = vmatmul.mubr.msk.bf16.gmra.mrb[60].mxu0 %vm436_vm0, %v3707_v62 }
  0xc9   : > { %2934 = vmatmul.mubr.msk.bf16.gmra.mrb[60].mxu1 %vm436_vm0, %v3707_v62  ;;  %2326 = vmatprep.mubr.bf16.mxu0 %v6073_v0 }
  0xca   : > { %2379 = vmatprep.mubr.bf16.mxu1 %v6073_v0 }
  0xd3   : > { %v3839_v25 = vpop.permute.xlu0 %378 }
  0xd4   : > { %6208 = vst [vmem:[#allocation10_spill] sm:$0xff] %v3839_v25  ;;  %v3872_v14 = vpop.permute.xlu1 %388 }
  0xd5   : > { %6210 = vst [vmem:[#allocation12_spill] sm:$0xff] %v3872_v14 }
  0xd7   : > { %v3841_v52 = vpop.permute.xlu0 %383 }
  0xd8   : > { %6209 = vst [vmem:[#allocation11_spill] sm:$0xff] %v3841_v52 }
  0xd9   : > { %v3901_v45 = vpop.permute.xlu1 %393 }
  0xda   : > { %6213 = vst [vmem:[#allocation15_spill] sm:$0xff] %v3901_v45 }
 0x123   : > { %v483_v49 = vpop.f32.mrb[0].mxu0 }
 0x124   : > { %v484_v53 = vadd.f32 %v483_v49, %v3839_v25  ;;  %v556_v54 = vpop.f32.mrb[0].mxu1  ;;  %v485_v55 = vpop.f32.mrb[1].mxu0 }
 0x125   : > { %v3845_v56 = vadd.f32 %v556_v54, %v3839_v25  ;;  %v3848_v57 = vadd.f32 %v485_v55, %v3839_v25  ;;  %v558_v58 = vpop.f32.mrb[1].mxu1  ;;  %v487_v59 = vpop.f32.mrb[2].mxu0 }
 0x126   : > { %v1033_v60 = vmul.f32 0.044715, %v484_v53  ;;  %v3851_v61 = vadd.f32 %v558_v58, %v3839_v25  ;;  %v3854_v62 = vadd.f32 %v487_v59, %v3841_v52  ;;  %v560_v63 = vpop.f32.mrb[2].mxu1  ;;  %v489_v1 = vpop.f32.mrb[3].mxu0  ;;  %v3878_v21 = vmul.f32 0.5, %v484_v53 }
 0x127   : > { %v1035_v2 = vmul.f32 0.044715, %v3845_v56  ;;  %v1034_v3 = vmul.f32 0.044715, %v3848_v57  ;;  %v3859_v4 = vadd.f32 %v560_v63, %v3841_v52  ;;  %v3862_v5 = vadd.f32 %v489_v1, %v3841_v52  ;;  %v562_v6 = vpop.f32.mrb[3].mxu1 }
 0x128   : > { %v1161_v7 = vmul.f32 %v1033_v60, %v484_v53  ;;  %v1036_v8 = vmul.f32 0.044715, %v3851_v61  ;;  %v1049_v9 = vmul.f32 0.044715, %v3854_v62  ;;  %v3867_v10 = vadd.f32 %v562_v6, %v3841_v52 }
 0x129   : > { %v1163_v11 = vmul.f32 %v1035_v2, %v3845_v56  ;;  %v1051_v12 = vmul.f32 0.044715, %v3859_v4  ;;  %v1050_v13 = vmul.f32 0.044715, %v3862_v5  ;;  %v1162_v16 = vmul.f32 %v1034_v3, %v3848_v57  ;;  %v3925_v3 = vpop.permute.xlu0 %398 }
 0x12a   : > { %v1289_v15 = vmul.f32 %v1161_v7, %v484_v53  ;;  %v1177_v17 = vmul.f32 %v1049_v9, %v3854_v62  ;;  %v1164_v23 = vmul.f32 %v1036_v8, %v3851_v61  ;;  %v1052_v26 = vmul.f32 0.044715, %v3867_v10  ;;  %6216 = vst [vmem:[#allocation18_spill] sm:$0xff] %v3925_v3 }
 0x12b   : > { %v1291_v18 = vmul.f32 %v1163_v11, %v3845_v56  ;;  %v1179_v19 = vmul.f32 %v1051_v12, %v3859_v4  ;;  %v493_v20 = vpop.f32.mrb[4].mxu0  ;;  %v1178_v31 = vmul.f32 %v1050_v13, %v3862_v5  ;;  %v3890_v36 = vmul.f32 %v1162_v16, %v3848_v57 }
 0x12c   : > { %v1417_v22 = vadd.f32 %v1289_v15, %v484_v53  ;;  %v1305_v24 = vmul.f32 %v1177_v17, %v3854_v62  ;;  %v566_v27 = vpop.f32.mrb[4].mxu1  ;;  %v495_v28 = vpop.f32.mrb[5].mxu0  ;;  %v3887_v32 = vadd.f32 %v493_v20, %v3872_v14  ;;  %v3904_v47 = vmul.f32 %v1164_v23, %v3851_v61 }
 0x12d   : > { %v1419_v29 = vadd.f32 %v1291_v18, %v3845_v56  ;;  %v1307_v30 = vmul.f32 %v1179_v19, %v3859_v4  ;;  %v568_v33 = vpop.f32.mrb[5].mxu1  ;;  %v497_v34 = vpop.f32.mrb[6].mxu0  ;;  %v3894_v38 = vadd.f32 %v566_v27, %v3872_v14  ;;  %v3899_v44 = vadd.f32 %v495_v28, %v3872_v14 }
 0x12e   : > { %6211 = vst [vmem:[#allocation13_spill] sm:$0xff] %v3887_v32  ;;  %v1545_v35 = vmul.f32 0.7978846, %v1417_v22  ;;  %v1433_v37 = vadd.f32 %v1305_v24, %v3854_v62  ;;  %v570_v39 = vpop.f32.mrb[6].mxu1  ;;  %v499_v40 = vpop.f32.mrb[7].mxu0  ;;  %v1180_v48 = vmul.f32 %v1052_v26, %v3867_v10  ;;  %v3909_v51 = vadd.f32 %v568_v33, %v3872_v14 }
 0x12f   : > { %6212 = vst [vmem:[#allocation14_spill] sm:$0xff] %v3894_v38  ;;  %v1547_v41 = vmul.f32 0.7978846, %v1419_v29  ;;  %v1435_v42 = vadd.f32 %v1307_v30, %v3859_v4  ;;  %v1065_v43 = vmul.f32 0.044715, %v3887_v32  ;;  %v572_v46 = vpop.f32.mrb[7].mxu1  ;;  %v3912_v49 = vmul.f32 %v1178_v31, %v3862_v5 }
 0x130   : > { %v1067_v50 = vmul.f32 0.044715, %v3894_v38  ;;  %3052 = vtanh.f32 %v1545_v35  ;;  %v1066_v54 = vmul.f32 0.044715, %v3899_v44  ;;  %v1561_v55 = vmul.f32 0.7978846, %v1433_v37 }
 0x131   : > { %v1193_v53 = vmul.f32 %v1065_v43, %v3887_v32  ;;  %v1068_v59 = vmul.f32 0.044715, %v3909_v51  ;;  %v3919_v60 = vadd.f32 %v497_v34, %v3901_v45  ;;  %3054 = vtanh.f32 %v1547_v41  ;;  %v3962_v43 = vpop.permute.xlu1 %403 }
 0x132   : > { %v1195_v58 = vmul.f32 %v1067_v50, %v3894_v38  ;;  %v1563_v63 = vmul.f32 0.7978846, %v1435_v42  ;;  %v3923_v2 = vadd.f32 %v570_v39, %v3901_v45  ;;  %v1194_v8 = vmul.f32 %v1066_v54, %v3899_v44  ;;  %6219 = vst [vmem:[#allocation21_spill] sm:$0xff] %v3962_v43 }
 0x133   : > { %6214 = vst [vmem:[#allocation16_spill] sm:$0xff] %v3919_v60  ;;  %v1321_v1 = vmul.f32 %v1193_v53, %v3887_v32  ;;  %v503_v6 = vpop.f32.mrb[8].mxu0  ;;  %v1081_v9 = vmul.f32 0.044715, %v3919_v60  ;;  %v3931_v11 = vadd.f32 %v499_v40, %v3901_v45  ;;  %v1196_v16 = vmul.f32 %v1068_v59, %v3909_v51 }
 0x134   : > { %6215 = vst [vmem:[#allocation17_spill] sm:$0xff] %v3923_v2  ;;  %v1323_v7 = vmul.f32 %v1195_v58, %v3894_v38  ;;  %v576_v12 = vpop.f32.mrb[8].mxu1  ;;  %v505_v13 = vpop.f32.mrb[9].mxu0  ;;  %v1083_v17 = vmul.f32 0.044715, %v3923_v2  ;;  %v3937_v18 = vadd.f32 %v572_v46, %v3901_v45  ;;  %3056 = vtanh.f32 %v1561_v55 }
 0x135   : > { %v1449_v15 = vadd.f32 %v1321_v1, %v3887_v32  ;;  %v578_v19 = vpop.f32.mrb[9].mxu1  ;;  %v507_v20 = vpop.f32.mrb[10].mxu0  ;;  %v1209_v23 = vmul.f32 %v1081_v9, %v3919_v60  ;;  %v1082_v24 = vmul.f32 0.044715, %v3931_v11  ;;  %v3945_v31 = vadd.f32 %v503_v6, %v3925_v3 }
 0x136   : > { %v1451_v22 = vadd.f32 %v1323_v7, %v3894_v38  ;;  %v580_v26 = vpop.f32.mrb[10].mxu1  ;;  %v509_v27 = vpop.f32.mrb[11].mxu0  ;;  %v1211_v29 = vmul.f32 %v1083_v17, %v3923_v2  ;;  %v1084_v30 = vmul.f32 0.044715, %v3937_v18  ;;  %3058 = vtanh.f32 %v1563_v63 }
 0x137   : > { %v1577_v28 = vmul.f32 0.7978846, %v1449_v15  ;;  %6217 = vst [vmem:[#allocation19_spill] sm:$0xff] %v3945_v31  ;;  %v582_v33 = vpop.f32.mrb[11].mxu1  ;;  %v3948_v34 = vmul.f32 %v1180_v48, %v3867_v10  ;;  %v1337_v35 = vmul.f32 %v1209_v23, %v3919_v60  ;;  %v3952_v37 = vadd.f32 %v576_v12, %v3925_v3 }
 0x138   : > { %v3955_v39 = vmul.f32 %v1194_v8, %v3899_v44  ;;  %v3958_v40 = vmul.f32 %v1196_v16, %v3909_v51  ;;  %v1339_v41 = vmul.f32 %v1211_v29, %v3923_v2  ;;  %v1097_v42 = vmul.f32 0.044715, %v3945_v31 }
 0x139   : > { %6218 = vst [vmem:[#allocation20_spill] sm:$0xff] %v3952_v37  ;;  %v1579_v46 = vmul.f32 0.7978846, %v1451_v22  ;;  %v1465_v48 = vadd.f32 %v1337_v35, %v3919_v60  ;;  %v1210_v50 = vmul.f32 %v1082_v24, %v3931_v11  ;;  %v1099_v53 = vmul.f32 0.044715, %v3952_v37 }
 0x13a   : > { %v3967_v54 = vpop.eup %3052  ;;  %3060 = vtanh.f32 %v1577_v28  ;;  %v1212_v55 = vmul.f32 %v1084_v30, %v3937_v18  ;;  %v1225_v58 = vmul.f32 %v1097_v42, %v3945_v31  ;;  %v3972_v59 = vadd.f32 %v505_v13, %v3925_v3 }
 0x13b   : > { %v513_v63 = vpop.f32.mrb[12].mxu0  ;;  %v1467_v1 = vadd.f32 %v1339_v41, %v3923_v2  ;;  %v1227_v6 = vmul.f32 %v1099_v53, %v3952_v37  ;;  %v3977_v7 = vadd.f32 %v578_v19, %v3925_v3  ;;  %v3980_v8 = vadd.f32 %v507_v20, %v3962_v43  ;;  %v3982_v15 = vpop.eup %3054 }
 0x13c   : > { %6220 = vst [vmem:[#allocation22_spill] sm:$0xff] %v3972_v59  ;;  %v586_v9 = vpop.f32.mrb[12].mxu1  ;;  %v515_v12 = vpop.f32.mrb[13].mxu0  ;;  %v1593_v16 = vmul.f32 0.7978846, %v1465_v48  ;;  %v1353_v17 = vmul.f32 %v1225_v58, %v3945_v31  ;;  %v3987_v22 = vadd.f32 %v580_v26, %v3962_v43  ;;  %3062 = vtanh.f32 %v1579_v46 }
 0x13d   : > { %6221 = vst [vmem:[#allocation23_spill] sm:$0xff] %v3977_v7  ;;  %6222 = vst [vmem:[#allocation24_spill] sm:$0xff] %v3980_v8  ;;  %v1098_v13 = vmul.f32 0.044715, %v3972_v59  ;;  %v588_v23 = vpop.f32.mrb[13].mxu1  ;;  %v517_v24 = vpop.f32.mrb[14].mxu0  ;;  %v1355_v19 = vmul.f32 %v1227_v6, %v3952_v37  ;;  %v3995_v35 = vmul.f32 %v1210_v50, %v3931_v11  ;;  %v3998_v41 = vmul.f32 %v1212_v55, %v3937_v18 }
 0x13e   : > { %6223 = vst [vmem:[#allocation25_spill] sm:$0xff] %v3987_v22  ;;  %v1100_v20 = vmul.f32 0.044715, %v3977_v7  ;;  %v1113_v28 = vmul.f32 0.044715, %v3980_v8  ;;  %v590_v29 = vpop.f32.mrb[14].mxu1  ;;  %v1481_v26 = vadd.f32 %v1353_v17, %v3945_v31  ;;  %v4004_v48 = vpop.eup %3056  ;;  %v4009_v0 = vadd.f32 %v509_v27, %v3962_v43 }
 0x13f   : > { %v3992_v30 = vpop.f32.mrb[15].mxu0  ;;  %v1115_v42 = vmul.f32 0.044715, %v3987_v22  ;;  %v4002_v46 = vpop.f32.mrb[15].mxu1  ;;  %v1595_v53 = vmul.f32 0.7978846, %v1467_v1  ;;  %v1483_v58 = vadd.f32 %v1355_v19, %v3952_v37  ;;  %3064 = vtanh.f32 %v1593_v16 }
 0x140   : > { %v1241_v6 = vmul.f32 %v1113_v28, %v3980_v8  ;;  %6224 = vst [vmem:[#allocation26_spill] sm:$0xff] %v4009_v0  ;;  %v4011_v50 = vpop.permute.xlu0 %408  ;;  %v1226_v55 = vmul.f32 %v1098_v13, %v3972_v59  ;;  %v4016_v31 = vadd.f32 %v582_v33, %v3962_v43  ;;  %v4018_v3 = vpop.eup %3058  ;;  %v1609_v1 = vmul.f32 0.7978846, %v1481_v26 }
 0x141   : > { %6225 = vst [vmem:[#allocation27_spill] sm:$0xff] %v4011_v50  ;;  %v1243_v17 = vmul.f32 %v1115_v42, %v3987_v22  ;;  %v1228_v19 = vmul.f32 %v1100_v20, %v3977_v7  ;;  %v1114_v27 = vmul.f32 0.044715, %v4009_v0  ;;  %v1611_v37 = vmul.f32 0.7978846, %v1483_v58  ;;  %v4028_v42 = vpop.permute.xlu1 %413 }
 0x142   : > { %6226 = vst [vmem:[#allocation28_spill] sm:$0xff] %v4016_v31  ;;  %v1369_v28 = vmul.f32 %v1241_v6, %v3980_v8  ;;  %v1116_v16 = vmul.f32 0.044715, %v4016_v31  ;;  %v4026_v13 = vadd.f32 %v513_v63, %v4011_v50  ;;  %6228 = vst [vmem:[#allocation30_spill] sm:$0xff] %v4028_v42  ;;  %3066 = vtanh.f32 %v1595_v53 }
 0x143   : > { %v1371_v2 = vmul.f32 %v1243_v17, %v3987_v22  ;;  %v629_v33 = vpop.f32.mrb[16].mxu0  ;;  %v1242_v20 = vmul.f32 %v1114_v27, %v4009_v0  ;;  %v4033_v6 = vadd.f32 %v586_v9, %v4011_v50  ;;  %v4043_v53 = vadd.f32 %v515_v12, %v4011_v50 }
 0x144   : > { %6227 = vst [vmem:[#allocation29_spill] sm:$0xff] %v4026_v13  ;;  %v1497_v26 = vadd.f32 %v1369_v28, %v3980_v8  ;;  %v702_v43 = vpop.f32.mrb[16].mxu1  ;;  %v4035_v58 = vpop.f32.mrb[17].mxu0  ;;  %v1244_v63 = vmul.f32 %v1116_v16, %v4016_v31  ;;  %v1129_v60 = vmul.f32 0.044715, %v4026_v13  ;;  %3068 = vtanh.f32 %v1609_v1 }
 0x145   : > { %6229 = vst [vmem:[#allocation31_spill] sm:$0xff] %v4033_v6  ;;  %v4037_v17 = vpop.eup %3060  ;;  %v1499_v38 = vadd.f32 %v1371_v2, %v3987_v22  ;;  %6231 = vst [vmem:[#allocation33_spill] sm:$0xff] %v4043_v53  ;;  %v4045_v28 = vpop.f32.mrb[17].mxu1  ;;  %v4050_v9 = vmul.f32 %v1226_v55, %v3972_v59  ;;  %v1131_v8 = vmul.f32 0.044715, %v4033_v6  ;;  %3070 = vtanh.f32 %v1611_v37 }
 0x146   : > { %6230 = vst [vmem:[#allocation32_spill] sm:$0xff] %v4037_v17  ;;  %v4047_v27 = vpop.f32.mrb[18].mxu0  ;;  %v4054_v17 = vadd.f32 %v588_v23, %v4011_v50  ;;  %v4056_v2 = vpop.f32.mrb[18].mxu1  ;;  %v4061_v12 = vmul.f32 %v1228_v19, %v3977_v7  ;;  %v1257_v22 = vmul.f32 %v1129_v60, %v4026_v13  ;;  %v1130_v1 = vmul.f32 0.044715, %v4043_v53 }
 0x147   : > { %6232 = vst [vmem:[#allocation34_spill] sm:$0xff] %v4050_v9  ;;  %v4058_v16 = vpop.f32.mrb[19].mxu0  ;;  %v4065_v32 = vpop.f32.mrb[19].mxu1  ;;  %v1625_v9 = vmul.f32 0.7978846, %v1497_v26  ;;  %v4070_v23 = vmul.f32 %v1242_v20, %v4009_v0  ;;  %v1259_v50 = vmul.f32 %v1131_v8, %v4033_v6  ;;  %v4074_v59 = vadd.f32 %v517_v24, %v4028_v42 }
 0x148   : > { %6233 = vst [vmem:[#allocation35_spill] sm:$0xff] %v4061_v12  ;;  %v4067_v55 = vpop.eup %3062  ;;  %v1627_v37 = vmul.f32 0.7978846, %v1499_v38  ;;  %v4077_v19 = vmul.f32 %v1244_v63, %v4016_v31  ;;  %v1385_v60 = vmul.f32 %v1257_v22, %v4026_v13  ;;  %v4081_v12 = vadd.f32 %v590_v29, %v4028_v42 }
 0x149   : > { %6234 = vst [vmem:[#allocation36_spill] sm:$0xff] %v4067_v55  ;;  %6235 = vst [vmem:[#allocation37_spill] sm:$0xff] %v4070_v23  ;;  %v1387_v7 = vmul.f32 %v1259_v50, %v4033_v6  ;;  %v1132_v26 = vmul.f32 0.044715, %v4054_v17  ;;  %v1145_v20 = vmul.f32 0.044715, %v4074_v59  ;;  %v4088_v8 = vadd.f32 %v3992_v30, %v4028_v42  ;;  %v4090_v24 = vpop.eup %3064 }
 0x14a   : > { %6236 = vst [vmem:[#allocation38_spill] sm:$0xff] %v4074_v59  ;;  %6237 = vst [vmem:[#allocation39_spill] sm:$0xff] %v4077_v19  ;;  %v1513_v38 = vadd.f32 %v1385_v60, %v4026_v13  ;;  %v1258_v63 = vmul.f32 %v1130_v1, %v4043_v53  ;;  %v1147_v22 = vmul.f32 0.044715, %v4081_v12  ;;  %v4097_v29 = vadd.f32 %v4002_v46, %v4028_v42 }
 0x14b   : > { %6238 = vst [vmem:[#allocation40_spill] sm:$0xff] %v4081_v12  ;;  %6239 = vst [vmem:[#allocation41_spill] sm:$0xff] %v4090_v24  ;;  %v4099_v50 = vpop.f32.mrb[20].mxu0  ;;  %3072 = vtanh.f32 %v1625_v9  ;;  %v1515_v19 = vadd.f32 %v1387_v7, %v4033_v6  ;;  %v1273_v30 = vmul.f32 %v1145_v20, %v4074_v59  ;;  %v1146_v31 = vmul.f32 0.044715, %v4088_v8 }
 0x14c   : > { %6240 = vst [vmem:[#allocation42_spill] sm:$0xff] %v4097_v29  ;;  %v4104_v23 = vpop.f32.mrb[20].mxu1  ;;  %v4106_v60 = vpop.f32.mrb[21].mxu0  ;;  %v1641_v1 = vmul.f32 0.7978846, %v1513_v38  ;;  %v1275_v13 = vmul.f32 %v1147_v22, %v4081_v12  ;;  %v4111_v46 = vadd.f32 %v629_v33, %v3839_v25  ;;  %3074 = vtanh.f32 %v1627_v37 }
 0x14d   : > { %v1148_v0 = vmul.f32 0.044715, %v4097_v29  ;;  %v4113_v42 = vpop.f32.mrb[21].mxu1  ;;  %v4115_v9 = vpop.f32.mrb[22].mxu0  ;;  %v1260_v20 = vmul.f32 %v1132_v26, %v4054_v17  ;;  %v1401_v6 = vmul.f32 %v1273_v30, %v4074_v59  ;;  %v4122_v38 = vadd.f32 %v702_v43, %v3839_v25 }
 0x14e   : > { %6241 = vst [vmem:[#allocation43_spill] sm:$0xff] %v4111_v46  ;;  %6242 = vst [vmem:[#allocation44_spill] sm:$0xff] %v4115_v9  ;;  %v4117_v7 = vpop.eup %3066  ;;  %v4124_v22 = vpop.f32.mrb[22].mxu1  ;;  %v1643_v33 = vmul.f32 0.7978846, %v1515_v19  ;;  %v4129_v24 = vmul.f32 %v1258_v63, %v4043_v53  ;;  %v1403_v9 = vmul.f32 %v1275_v13, %v4081_v12  ;;  %3076 = vtanh.f32 %v1641_v1 }
 0x14f   : > { %6243 = vst [vmem:[#allocation45_spill] sm:$0xff] %v4117_v7  ;;  %6244 = vst [vmem:[#allocation46_spill] sm:$0xff] %v4122_v38  ;;  %v4126_v55 = vpop.f32.mrb[23].mxu0  ;;  %v1037_v7 = vmul.f32 0.044715, %v4111_v46  ;;  %v4133_v37 = vpop.f32.mrb[23].mxu1  ;;  %v1529_v43 = vadd.f32 %v1401_v6, %v4074_v59  ;;  %v1274_v30 = vmul.f32 %v1146_v31, %v4088_v8  ;;  %v1276_v63 = vmul.f32 %v1148_v0, %v4097_v29 }
 0x150   : > { %6245 = vst [vmem:[#allocation47_spill] sm:$0xff] %v4124_v22  ;;  %6246 = vst [vmem:[#allocation48_spill] sm:$0xff] %v4126_v55  ;;  %v4135_v26 = vpop.eup %3068  ;;  %v1039_v22 = vmul.f32 0.044715, %v4122_v38  ;;  %v1531_v19 = vadd.f32 %v1403_v9, %v4081_v12  ;;  %v4152_v31 = vadd.f32 %v4045_v28, %v3839_v25  ;;  %v1418_v6 = vadd.f32 %v3890_v36, %v3848_v57 }
 0x151   : > { %6247 = vst [vmem:[#allocation49_spill] sm:$0xff] %v4129_v24  ;;  %6248 = vst [vmem:[#allocation50_spill] sm:$0xff] %v4135_v26  ;;  %v4140_v55 = vpop.eup %3070  ;;  %v1165_v13 = vmul.f32 %v1037_v7, %v4111_v46  ;;  %v4147_v24 = vadd.f32 %v4035_v58, %v3839_v25  ;;  %v1657_v53 = vmul.f32 0.7978846, %v1529_v43  ;;  %v1434_v7 = vadd.f32 %v3912_v49, %v3862_v5 }
 0x152   : > { %6249 = vst [vmem:[#allocation51_spill] sm:$0xff] %v4140_v55  ;;  %v1167_v1 = vmul.f32 %v1039_v22, %v4122_v38  ;;  %6251 = vst [vmem:[#allocation53_spill] sm:$0xff] %v4152_v31  ;;  %v1659_v59 = vmul.f32 0.7978846, %v1531_v19  ;;  %3078 = vtanh.f32 %v1643_v33  ;;  %v1040_v43 = vmul.f32 0.044715, %v4152_v31 }
 0x153   : > { %6250 = vst [vmem:[#allocation52_spill] sm:$0xff] %v4147_v24  ;;  %v1293_v9 = vmul.f32 %v1165_v13, %v4111_v46  ;;  %v1038_v0 = vmul.f32 0.044715, %v4147_v24  ;;  %v4160_v58 = vpop.f32.mrb[24].mxu0  ;;  %v1546_v28 = vmul.f32 0.7978846, %v1418_v6  ;;  %3080 = vtanh.f32 %v1657_v53 }
 0x154   : > { %v1295_v22 = vmul.f32 %v1167_v1, %v4122_v38  ;;  %v4164_v25 = vpop.f32.mrb[24].mxu1  ;;  %v4166_v12 = vpop.f32.mrb[25].mxu0  ;;  %v1562_v13 = vmul.f32 0.7978846, %v1434_v7  ;;  %v4177_v1 = vmul.f32 %v1260_v20, %v4054_v17  ;;  %3082 = vtanh.f32 %v1659_v59 }
 0x155   : > { %v1421_v36 = vadd.f32 %v1293_v9, %v4111_v46  ;;  %v1166_v19 = vmul.f32 %v1038_v0, %v4147_v24  ;;  %v4170_v55 = vpop.f32.mrb[25].mxu1  ;;  %v4172_v49 = vpop.f32.mrb[26].mxu0  ;;  %v1168_v26 = vmul.f32 %v1040_v43, %v4152_v31  ;;  %v4186_v0 = vmul.f32 %v1274_v30, %v4088_v8 }
 0x156   : > { %v4174_v33 = vpop.eup %3072  ;;  %v1423_v6 = vadd.f32 %v1295_v22, %v4122_v38  ;;  %v4181_v53 = vpop.f32.mrb[26].mxu1  ;;  %v4189_v7 = vmul.f32 %v1276_v63, %v4097_v29  ;;  %3084 = vtanh.f32 %v1546_v28  ;;  %v1420_v20 = vadd.f32 %v3904_v47, %v3851_v61 }
 0x157   : > { %v4183_v9 = vpop.f32.mrb[27].mxu0  ;;  %v4193_v46 = vpop.f32.mrb[27].mxu1  ;;  %v4198_v22 = vmul.f32 0.5, %v3848_v57  ;;  %v4201_v43 = vmul.f32 0.5, %v3862_v5  ;;  %3086 = vtanh.f32 %v1562_v13  ;;  %v1436_v30 = vadd.f32 %v3948_v34, %v3867_v10 }
 0x158   : > { %6252 = vst [vmem:[#allocation54_spill] sm:$0xff] %v4189_v7  ;;  %v4195_v59 = vpop.eup %3074  ;;  %v1549_v63 = vmul.f32 0.7978846, %v1421_v36  ;;  %v1551_v38 = vmul.f32 0.7978846, %v1423_v6  ;;  %v4206_v28 = vmul.f32 %v1166_v19, %v4147_v24  ;;  %v4211_v29 = vmul.f32 %v1168_v26, %v4152_v31 }
 0x159   : > { %v1548_v47 = vmul.f32 0.7978846, %v1420_v20  ;;  %v4208_v7 = vpop.eup %3076  ;;  %v1564_v57 = vmul.f32 0.7978846, %v1436_v30  ;;  %v4215_v5 = vadd.f32 %v4047_v27, %v3841_v52  ;;  %v4219_v13 = vadd.f32 %v4056_v2, %v3841_v52 }
 0x15a   : > { %6253 = vst [vmem:[#allocation55_spill] sm:$0xff] %v4206_v28  ;;  %6254 = vst [vmem:[#allocation56_spill] sm:$0xff] %v4208_v7  ;;  %v1689_v34 = vmul.f32 0.5, %v3854_v62  ;;  %v1929_v36 = vadd.f32 1.0, %v3967_v54  ;;  %v1945_v19 = vadd.f32 1.0, %v4004_v48  ;;  %v1675_v27 = vmul.f32 0.5, %v3845_v56 }
 0x15b   : > { %6255 = vst [vmem:[#allocation57_spill] sm:$0xff] %v4211_v29  ;;  %6256 = vst [vmem:[#allocation58_spill] sm:$0xff] %v4215_v5  ;;  %3088 = vtanh.f32 %v1548_v47  ;;  %v4224_v6 = vpop.f32.mrb[28].mxu0  ;;  %v1053_v26 = vmul.f32 0.044715, %v4215_v5  ;;  %v1691_v62 = vmul.f32 0.5, %v3859_v4 }
 0x15c   : > { %6257 = vst [vmem:[#allocation59_spill] sm:$0xff] %v4219_v13  ;;  %3090 = vtanh.f32 %v1564_v57  ;;  %v1055_v20 = vmul.f32 0.044715, %v4219_v13  ;;  %v4229_v30 = vpop.f32.mrb[28].mxu1  ;;  %v4232_v2 = vmul.f32 %v1929_v36, %v3878_v21  ;;  %v4234_v47 = vmul.f32 %v1945_v19, %v1689_v34  ;;  %v4238_v48 = vpop.f32.mrb[29].mxu0 }
 0x15d   : > { %v1931_v54 = vadd.f32 1.0, %v3982_v15  ;;  %v4240_v57 = vpop.f32.mrb[29].mxu1  ;;  %v4242_v29 = vpop.eup %3078  ;;  %v1181_v31 = vmul.f32 %v1053_v26, %v4215_v5  ;;  %v1947_v28 = vadd.f32 1.0, %v4018_v3  ;;  %v4249_v21 = vadd.f32 %v4058_v16, %v3841_v52 }
 0x15e   : > { %6258 = vst [vmem:[#allocation60_spill] sm:$0xff] %v4242_v29  ;;  %v1183_v56 = vmul.f32 %v1055_v20, %v4219_v13  ;;  %v4251_v34 = vpop.f32.mrb[30].mxu0  ;;  %v4253_v4 = vpop.f32.mrb[30].mxu1  ;;  %v2189_v36 = vpack.c.bf16 %v4234_v47, %v4232_v2  ;;  %v4263_v26 = vadd.f32 %v4065_v32, %v3841_v52  ;;  %v4267_v3 = vadd.f32 %v4099_v50, %v3872_v14 }
 0x15f   : > { %6259 = vst [vmem:[#allocation61_spill] sm:$0xff] %v4253_v4  ;;  %v4255_v15 = vpop.eup %3080  ;;  %v4259_v19 = vmul.f32 %v1931_v54, %v1675_v27  ;;  %v4269_v16 = vpop.f32.mrb[31].mxu0  ;;  %v1309_v29 = vmul.f32 %v1181_v31, %v4215_v5  ;;  %v4277_v27 = vmul.f32 %v1947_v28, %v1691_v62  ;;  %v1054_v47 = vmul.f32 0.044715, %v4249_v21 }
 0x160   : > { %6260 = vst [vmem:[#allocation62_spill] sm:$0xff] %v4255_v15  ;;  %6261 = vst [vmem:[#allocation63_spill] sm:$0xff] %v4267_v3  ;;  %v4271_v20 = vpop.f32.mrb[31].mxu1  ;;  %v4273_v24 = vpop.eup %3082  ;;  %v1311_v2 = vmul.f32 %v1183_v56, %v4219_v13  ;;  %3092 = vtanh.f32 %v1549_v63  ;;  %v1056_v54 = vmul.f32 0.044715, %v4263_v26  ;;  %v4284_v52 = vadd.f32 %v4104_v23, %v3872_v14 }
 0x161   : > { %6262 = vst [vmem:[#allocation64_spill] sm:$0xff] %v4269_v16  ;;  %6263 = vst [vmem:[#allocation65_spill] sm:$0xff] %v4271_v20  ;;  %v3085_v32 = vpop.eup %3084  ;;  %v1069_v50 = vmul.f32 0.044715, %v4267_v3  ;;  %v1437_v31 = vadd.f32 %v1309_v29, %v4215_v5  ;;  %v4291_v62 = vadd.f32 %v4106_v60, %v3872_v14  ;;  %v1676_v56 = vmul.f32 0.5, %v3851_v61 }
 0x162   : > { %6264 = vst [vmem:[#allocation66_spill] sm:$0xff] %v4273_v24  ;;  %6265 = vst [vmem:[#allocation67_spill] sm:$0xff] %v4284_v52  ;;  %v3087_v20 = vpop.eup %3086  ;;  %v1930_v16 = vadd.f32 1.0, %v3085_v32  ;;  %v1439_v24 = vadd.f32 %v1311_v2, %v4219_v13  ;;  %3094 = vtanh.f32 %v1551_v38  ;;  %v1692_v32 = vmul.f32 0.5, %v3867_v10 }
 0x163   : > { %6266 = vst [vmem:[#allocation68_spill] sm:$0xff] %v4291_v62  ;;  %v1946_v63 = vadd.f32 1.0, %v3087_v20  ;;  %v1197_v15 = vmul.f32 %v1069_v50, %v4267_v3  ;;  %v4296_v23 = vpop.f32.mrb[32].mxu0  ;;  %v1182_v29 = vmul.f32 %v1054_v47, %v4249_v21  ;;  %v1071_v28 = vmul.f32 0.044715, %v4284_v52 }
 0x164   : > { %6267 = vst [vmem:[#allocation69_spill] sm:$0xff] %v4296_v23  ;;  %v2058_v60 = vmul.f32 %v1930_v16, %v4198_v22  ;;  %v1565_v7 = vmul.f32 0.7978846, %v1437_v31  ;;  %v4304_v2 = vpop.f32.mrb[32].mxu1  ;;  %v4306_v50 = vpop.f32.mrb[33].mxu0  ;;  %v1184_v10 = vmul.f32 %v1056_v54, %v4263_v26 }
 0x165   : > { %v3089_v5 = vpop.eup %3088  ;;  %v2074_v20 = vmul.f32 %v1946_v63, %v4201_v43  ;;  %v1325_v61 = vmul.f32 %v1197_v15, %v4267_v3  ;;  %6268 = vst [vmem:[#allocation70_spill] sm:$0xff] %v4304_v2  ;;  %6269 = vst [vmem:[#allocation71_spill] sm:$0xff] %v4306_v50  ;;  %v1199_v47 = vmul.f32 %v1071_v28, %v4284_v52  ;;  %v1070_v23 = vmul.f32 0.044715, %v4291_v62  ;;  %v4311_v4 = vpop.f32.mrb[33].mxu1 }
 0x166   : > { %v3091_v13 = vpop.eup %3090  ;;  %v1932_v38 = vadd.f32 1.0, %v3089_v5  ;;  %6270 = vst [vmem:[#allocation72_spill] sm:$0xff] %v4311_v4  ;;  %v4313_v22 = vpop.f32.mrb[34].mxu0  ;;  %v1567_v31 = vmul.f32 0.7978846, %v1439_v24  ;;  %v4324_v2 = vadd.f32 %v4113_v42, %v3872_v14  ;;  %3096 = vtanh.f32 %v1565_v7 }
 0x167   : > { %v2190_v43 = vpack.c.bf16 %v2074_v20, %v2058_v60  ;;  %v1948_v16 = vadd.f32 1.0, %v3091_v13  ;;  %v1453_v15 = vadd.f32 %v1325_v61, %v4267_v3  ;;  %v4316_v63 = vpop.f32.mrb[34].mxu1  ;;  %v4318_v50 = vpop.f32.mrb[35].mxu0  ;;  %v1327_v54 = vmul.f32 %v1199_v47, %v4284_v52  ;;  %v6289_v3 = vld [vmem:[#allocation14_spill] sm:$0xff] }
 0x168   : > { %v2060_v5 = vmul.f32 %v1932_v38, %v1676_v56  ;;  %v1198_v28 = vmul.f32 %v1070_v23, %v4291_v62  ;;  %6271 = vst [vmem:[#allocation73_spill] sm:$0xff] %v4324_v2  ;;  %v4326_v4 = vpop.f32.mrb[35].mxu1  ;;  %v1450_v60 = vadd.f32 %v3955_v39, %v3899_v44  ;;  %v1466_v20 = vadd.f32 %v3995_v35, %v3931_v11 }
 0x169   : > { %2294 = vmatprep.subr.bf16.mxu0 %v2190_v43  ;;  %v2076_v13 = vmul.f32 %v1948_v16, %v1692_v32  ;;  %v1581_v24 = vmul.f32 0.7978846, %v1453_v15  ;;  %v4333_v56 = vmul.f32 %v1182_v29, %v4249_v21  ;;  %v1455_v23 = vadd.f32 %v1327_v54, %v4284_v52 }
 0x16a   : > { %2295 = vmatpush1.bf16.msra.mxu0 %v2189_v36  ;;  %v1072_v42 = vmul.f32 0.044715, %v4324_v2  ;;  %v4337_v61 = vpop.eup %3092  ;;  %3098 = vtanh.f32 %v1567_v31  ;;  %v1578_v32 = vmul.f32 0.7978846, %v1450_v60  ;;  %v1594_v47 = vmul.f32 0.7978846, %v1466_v20 }
 0x16b   : > { %v2192_v38 = vpack.c.bf16 %v2076_v13, %v2060_v5  ;;  %v4339_v43 = vpop.f32.mrb[36].mxu0  ;;  %v4342_v39 = vmul.f32 %v1184_v10, %v4263_v26  ;;  %3100 = vtanh.f32 %v1581_v24  ;;  %v4345_v35 = vmul.f32 %v1198_v28, %v4291_v62  ;;  %v6278_v24 = vld [vmem:[#allocation44_spill] sm:$0xff] }
 0x16c   : > { %v1452_v7 = vadd.f32 %v3958_v40, %v3909_v51  ;;  %v4349_v36 = vpop.f32.mrb[36].mxu1  ;;  %v4351_v29 = vpop.f32.mrb[37].mxu0  ;;  %v4353_v16 = vmul.f32 0.7978846, %v1455_v23  ;;  %v4356_v31 = vmul.f32 0.5, %v3899_v44  ;;  %3102 = vtanh.f32 %v1578_v32 }
 0x16d   : > { %6272 = vst [vmem:[#allocation74_spill] sm:$0xff] %v4345_v35  ;;  %6273 = vst [vmem:[#allocation75_spill] sm:$0xff] %v4349_v36  ;;  %2347 = vmatprep.subr.bf16.mxu1 %v2192_v38  ;;  %v1468_v10 = vadd.f32 %v3998_v41, %v3937_v18  ;;  %v4360_v15 = vpop.f32.mrb[37].mxu1  ;;  %v4362_v5 = vpop.f32.mrb[38].mxu0  ;;  %v6277_v40 = vpack.c.bf16 %v4277_v27, %v4259_v19  ;;  %v1200_v28 = vmul.f32 %v1072_v42, %v4324_v2  ;;  %v6282_v38 = vld [vmem:[#allocation47_spill] sm:$0xff]  ;;  %v6284_v27 = vld [vmem:[#allocation13_spill] sm:$0xff] }
 0x16e   : > { %6274 = vst [vmem:[#allocation76_spill] sm:$0xff] %v4351_v29  ;;  %6275 = vst [vmem:[#allocation77_spill] sm:$0xff] %v4360_v15  ;;  %v4364_v54 = vpop.eup %3094  ;;  %v4371_v13 = vmul.f32 0.5, %v3931_v11  ;;  %v1580_v44 = vmul.f32 0.7978846, %v1452_v7  ;;  %v4375_v60 = vadd.f32 %v6278_v24, %v3901_v45  ;;  %v4377_v41 = vpop.f32.mrb[38].mxu1  ;;  %3104 = vtanh.f32 %v1594_v47 }
 0x16f   : > { %6276 = vst [vmem:[#allocation78_spill] sm:$0xff] %v4362_v5  ;;  %2348 = vmatpush1.bf16.msra.mxu1 %v6277_v40  ;;  %6280 = vst [vmem:[#allocation79_spill] sm:$0xff] %v4377_v41  ;;  %v4379_v20 = vpop.f32.mrb[39].mxu0  ;;  %v1596_v23 = vmul.f32 0.7978846, %v1468_v10  ;;  %v4383_v19 = vadd.f32 %v6282_v38, %v3901_v45  ;;  %v1705_v42 = vmul.f32 0.5, %v6284_v27 }
 0x170   : > { %6279 = vst [vmem:[#allocation44_spill] sm:$0xff] %v4375_v60  ;;  %6281 = vst [vmem:[#allocation80_spill] sm:$0xff] %v4379_v20  ;;  %v4386_v32 = vpop.f32.mrb[39].mxu1  ;;  %3106 = vtanh.f32 %v1580_v44  ;;  %v1085_v11 = vmul.f32 0.044715, %v4375_v60  ;;  %v6286_v7 = vld [vmem:[#allocation16_spill] sm:$0xff] }
 0x171   : > { %6283 = vst [vmem:[#allocation47_spill] sm:$0xff] %v4383_v19  ;;  %6285 = vst [vmem:[#allocation13_spill] sm:$0xff] %v4386_v32  ;;  %v1721_v40 = vmul.f32 0.5, %v6286_v7  ;;  %v6287_v24 = vld [vmem:[#allocation32_spill] sm:$0xff]  ;;  %3108 = vtanh.f32 %v1596_v23  ;;  %v1087_v20 = vmul.f32 0.044715, %v4383_v19 }
 0x172   : > { %v1961_v52 = vadd.f32 1.0, %v6287_v24  ;;  %v6288_v47 = vld [vmem:[#allocation41_spill] sm:$0xff]  ;;  %v1707_v41 = vmul.f32 0.5, %v6289_v3  ;;  %v1213_v38 = vmul.f32 %v1085_v11, %v4375_v60  ;;  %v6291_v44 = vld [vmem:[#allocation36_spill] sm:$0xff]  ;;  %v4409_v3 = vpop.eup %3096  ;;  %v4416_v11 = vadd.f32 %v4133_v37, %v3901_v45 }
 0x173   : > { %v1977_v10 = vadd.f32 1.0, %v6288_v47  ;;  %v6290_v27 = vld [vmem:[#allocation17_spill] sm:$0xff]  ;;  %v1963_v35 = vadd.f32 1.0, %v6291_v44  ;;  %v1215_v62 = vmul.f32 %v1087_v20, %v4383_v19  ;;  %v6293_v15 = vld [vmem:[#allocation48_spill] sm:$0xff]  ;;  %v4407_v47 = vpop.f32.mrb[40].mxu0  ;;  %v6295_v20 = vld [vmem:[#allocation18_spill] sm:$0xff]  ;;  %3110 = vtanh.f32 %v4353_v16 }
 0x174   : > { %v4395_v5 = vmul.f32 %v1961_v52, %v1705_v42  ;;  %v1723_v32 = vmul.f32 0.5, %v6290_v27  ;;  %v6292_v24 = vld [vmem:[#allocation45_spill] sm:$0xff]  ;;  %v4405_v29 = vadd.f32 %v6293_v15, %v3901_v45  ;;  %6294 = vst [vmem:[#allocation16_spill] sm:$0xff] %v4407_v47  ;;  %v1341_v52 = vmul.f32 %v1213_v38, %v4375_v60  ;;  %v4424_v15 = vpop.f32.mrb[41].mxu0  ;;  %v4426_v27 = vpop.eup %3098 }
 0x175   : > { %v4400_v7 = vmul.f32 %v1977_v10, %v1721_v40  ;;  %v1979_v23 = vadd.f32 1.0, %v6292_v24  ;;  %v4412_v42 = vmul.f32 %v1963_v35, %v1707_v41  ;;  %v4420_v40 = vadd.f32 %v4160_v58, %v6295_v20  ;;  %v4422_v10 = vpop.f32.mrb[40].mxu1  ;;  %6298 = vst [vmem:[#allocation14_spill] sm:$0xff] %v4424_v15  ;;  %v4436_v24 = vpop.f32.mrb[42].mxu0 }
 0x176   : > { %6297 = vst [vmem:[#allocation41_spill] sm:$0xff] %v4422_v10  ;;  %v1343_v44 = vmul.f32 %v1215_v62, %v4383_v19  ;;  %v1086_v37 = vmul.f32 0.044715, %v4405_v29  ;;  %v4434_v38 = vpop.f32.mrb[41].mxu1  ;;  %6300 = vst [vmem:[#allocation36_spill] sm:$0xff] %v4436_v24  ;;  %v4438_v58 = vpop.eup %3100  ;;  %v1469_v10 = vadd.f32 %v1341_v52, %v4375_v60  ;;  %v4445_v62 = vadd.f32 %v4164_v25, %v6295_v20 }
 0x177   : > { %6296 = vst [vmem:[#allocation32_spill] sm:$0xff] %v4420_v40  ;;  %v2205_v35 = vpack.c.bf16 %v4400_v7, %v4395_v5  ;;  %v4431_v41 = vmul.f32 %v1979_v23, %v1723_v32  ;;  %6299 = vst [vmem:[#allocation17_spill] sm:$0xff] %v4434_v38  ;;  %v1088_v15 = vmul.f32 0.044715, %v4416_v11  ;;  %v1101_v47 = vmul.f32 0.044715, %v4420_v40  ;;  %v3103_v7 = vpop.eup %3102 }
 0x178   : > { %6301 = vst [vmem:[#allocation45_spill] sm:$0xff] %v4438_v58  ;;  %6302 = vst [vmem:[#allocation48_spill] sm:$0xff] %v4445_v62  ;;  %v4447_v5 = vpop.f32.mrb[42].mxu1  ;;  %v4449_v32 = vpop.f32.mrb[43].mxu0  ;;  %v1708_v23 = vmul.f32 0.5, %v3909_v51  ;;  %v1471_v24 = vadd.f32 %v1343_v44, %v4383_v19  ;;  %v4457_v38 = vadd.f32 %v4166_v12, %v6295_v20  ;;  %v1962_v25 = vadd.f32 1.0, %v3103_v7 }
 0x179   : > { %6303 = vst [vmem:[#allocation81_spill] sm:$0xff] %v4447_v5  ;;  %6304 = vst [vmem:[#allocation82_spill] sm:$0xff] %v4449_v32  ;;  %v2207_v52 = vpack.c.bf16 %v4431_v41, %v4412_v42  ;;  %v4459_v58 = vpop.f32.mrb[43].mxu1  ;;  %v1724_v60 = vmul.f32 0.5, %v3937_v18  ;;  %v1597_v5 = vmul.f32 0.7978846, %v1469_v10  ;;  %v1229_v32 = vmul.f32 %v1101_v47, %v4420_v40  ;;  %v3105_v45 = vpop.eup %3104 }
 0x17a   : > { %6305 = vst [vmem:[#allocation83_spill] sm:$0xff] %v4459_v58  ;;  %v4465_v51 = vmul.f32 %v1200_v28, %v4324_v2  ;;  %v1103_v42 = vmul.f32 0.044715, %v4445_v62  ;;  %v1102_v44 = vmul.f32 0.044715, %v4457_v38  ;;  %v3107_v12 = vpop.eup %3106  ;;  %v1978_v41 = vadd.f32 1.0, %v3105_v45 }
 0x17b   : > { %v1599_v19 = vmul.f32 0.7978846, %v1471_v24  ;;  %v1214_v7 = vmul.f32 %v1086_v37, %v4405_v29  ;;  %v1216_v18 = vmul.f32 %v1088_v15, %v4416_v11  ;;  %v3109_v10 = vpop.eup %3108  ;;  %v2090_v47 = vmul.f32 %v1962_v25, %v4356_v31  ;;  %v6310_v25 = vld [vmem:[#allocation22_spill] sm:$0xff] }
 0x17c   : > { %6306 = vst [vmem:[#allocation84_spill] sm:$0xff] %v4465_v51  ;;  %v1964_v58 = vadd.f32 1.0, %v3107_v12  ;;  %v1357_v16 = vmul.f32 %v1229_v32, %v4420_v40  ;;  %v1231_v28 = vmul.f32 %v1103_v42, %v4445_v62  ;;  %v4474_v51 = vpop.f32.mrb[44].mxu0  ;;  %v2106_v2 = vmul.f32 %v1978_v41, %v4371_v13  ;;  %v4481_v37 = vpop.f32.mrb[44].mxu1  ;;  %v6311_v42 = vld [vmem:[#allocation34_spill] sm:$0xff] }
 0x17d   : > { %6307 = vst [vmem:[#allocation85_spill] sm:$0xff] %v4474_v51  ;;  %v1980_v36 = vadd.f32 1.0, %v3109_v10  ;;  %3112 = vtanh.f32 %v1597_v5  ;;  %v4479_v45 = vadd.f32 %v4170_v55, %v6295_v20  ;;  %6308 = vst [vmem:[#allocation86_spill] sm:$0xff] %v4481_v37  ;;  %v4483_v15 = vpop.f32.mrb[45].mxu0  ;;  %v1230_v32 = vmul.f32 %v1102_v44, %v4457_v38  ;;  %v4490_v13 = vpop.f32.mrb[45].mxu1  ;;  %v6314_v20 = vld [vmem:[#allocation37_spill] sm:$0xff] }
 0x17e   : > { %6309 = vst [vmem:[#allocation87_spill] sm:$0xff] %v4483_v15  ;;  %v1485_v31 = vadd.f32 %v1357_v16, %v4420_v40  ;;  %v1359_v24 = vmul.f32 %v1231_v28, %v4445_v62  ;;  %v1482_v12 = vadd.f32 %v6311_v42, %v6310_v25  ;;  %6312 = vst [vmem:[#allocation22_spill] sm:$0xff] %v4490_v13  ;;  %v6313_v15 = vld [vmem:[#allocation26_spill] sm:$0xff]  ;;  %3114 = vtanh.f32 %v1599_v19 }
 0x17f   : > { %v2206_v5 = vpack.c.bf16 %v2106_v2, %v2090_v47  ;;  %v2092_v41 = vmul.f32 %v1964_v58, %v1708_v23  ;;  %v2108_v10 = vmul.f32 %v1980_v36, %v1724_v60  ;;  %v1104_v55 = vmul.f32 0.044715, %v4479_v45  ;;  %v6315_v58 = vld [vmem:[#allocation23_spill] sm:$0xff]  ;;  %v4508_v47 = vpop.f32.mrb[46].mxu0 }
 0x180   : > { %v1613_v51 = vmul.f32 0.7978846, %v1485_v31  ;;  %v1487_v37 = vadd.f32 %v1359_v24, %v4445_v62  ;;  %v1498_v16 = vadd.f32 %v6314_v20, %v6313_v15  ;;  %v1610_v40 = vmul.f32 0.7978846, %v1482_v12  ;;  %v6316_v23 = vld [vmem:[#allocation35_spill] sm:$0xff]  ;;  %6317 = vst [vmem:[#allocation34_spill] sm:$0xff] %v4508_v47 }
 0x181   : > { %2296 = vmatprep.subr.bf16.mxu0 %v2206_v5  ;;  %v2208_v28 = vpack.c.bf16 %v2108_v10, %v2092_v41  ;;  %v4497_v44 = vmul.f32 %v1214_v7, %v4405_v29  ;;  %v4500_v42 = vmul.f32 %v1216_v18, %v4416_v11  ;;  %v4503_v2 = vmul.f32 %v1230_v32, %v4457_v38  ;;  %v4510_v31 = vpop.f32.mrb[46].mxu1  ;;  %v6320_v18 = vld [vmem:[#allocation39_spill] sm:$0xff]  ;;  %v4520_v32 = vpop.f32.mrb[47].mxu0 }
 0x182   : > { %2297 = vmatpush1.bf16.msra.mxu0 %v2205_v35  ;;  %v1232_v36 = vmul.f32 %v1104_v55, %v4479_v45  ;;  %v1626_v60 = vmul.f32 0.7978846, %v1498_v16  ;;  %v1484_v20 = vadd.f32 %v6316_v23, %v6315_v58  ;;  %6318 = vst [vmem:[#allocation26_spill] sm:$0xff] %v4510_v31  ;;  %v4513_v19 = vmul.f32 0.5, %v6310_v25  ;;  %v6319_v35 = vld [vmem:[#allocation28_spill] sm:$0xff]  ;;  %6321 = vst [vmem:[#allocation37_spill] sm:$0xff] %v4520_v32  ;;  %v4524_v5 = vpop.eup %3110 }
 0x183   : > { %2349 = vmatprep.subr.bf16.mxu1 %v2208_v28  ;;  %v4516_v7 = vmul.f32 0.5, %v6313_v15  ;;  %3116 = vtanh.f32 %v1610_v40  ;;  %v1500_v24 = vadd.f32 %v6320_v18, %v6319_v35  ;;  %v4522_v12 = vpop.f32.mrb[47].mxu1  ;;  %v1615_v41 = vmul.f32 0.7978846, %v1487_v37  ;;  %v6323_v55 = vld [vmem:[#allocation21_spill] sm:$0xff]  ;;  %v6326_v16 = vld [vmem:[#allocation19_spill] sm:$0xff] }
 0x184   : > { %6322 = vst [vmem:[#allocation23_spill] sm:$0xff] %v4522_v12  ;;  %2350 = vmatpush1.bf16.msra.mxu1 %v2207_v52  ;;  %3118 = vtanh.f32 %v1613_v51  ;;  %v1612_v10 = vmul.f32 0.7978846, %v1484_v20  ;;  %v4528_v25 = vadd.f32 %v4172_v49, %v6323_v55  ;;  %v4532_v40 = vadd.f32 %v4181_v53, %v6323_v55  ;;  %v6327_v18 = vld [vmem:[#allocation24_spill] sm:$0xff]  ;;  %v6328_v51 = vld [vmem:[#allocation50_spill] sm:$0xff]  ;;  %v4538_v20 = vpop.f32.mrb[48].mxu0 }
 0x185   : > { %3120 = vtanh.f32 %v1626_v60  ;;  %v1628_v15 = vmul.f32 0.7978846, %v1500_v24  ;;  %v1737_v28 = vmul.f32 0.5, %v6326_v16  ;;  %v1753_v52 = vmul.f32 0.5, %v6327_v18  ;;  %6329 = vst [vmem:[#allocation39_spill] sm:$0xff] %v4538_v20  ;;  %v4540_v12 = vpop.f32.mrb[48].mxu1 }
 0x186   : > { %6324 = vst [vmem:[#allocation35_spill] sm:$0xff] %v4528_v25  ;;  %6325 = vst [vmem:[#allocation28_spill] sm:$0xff] %v4532_v40  ;;  %3122 = vtanh.f32 %v1612_v10  ;;  %v1117_v23 = vmul.f32 0.044715, %v4528_v25  ;;  %v1993_v37 = vadd.f32 1.0, %v6328_v51  ;;  %v2009_v53 = vadd.f32 1.0, %v4174_v33 }
 0x187   : > { %6330 = vst [vmem:[#allocation19_spill] sm:$0xff] %v4540_v12  ;;  %v4542_v49 = vpop.eup %3112  ;;  %3124 = vtanh.f32 %v1628_v15  ;;  %v1119_v60 = vmul.f32 0.044715, %v4532_v40  ;;  %v6331_v24 = vld [vmem:[#allocation20_spill] sm:$0xff]  ;;  %v4547_v10 = vpop.f32.mrb[49].mxu0  ;;  %v6334_v20 = vld [vmem:[#allocation25_spill] sm:$0xff]  ;;  %v4560_v33 = vadd.f32 %v4183_v9, %v6323_v55 }
 0x188   : > { %v1739_v16 = vmul.f32 0.5, %v6331_v24  ;;  %6332 = vst [vmem:[#allocation24_spill] sm:$0xff] %v4547_v10  ;;  %v4549_v32 = vpop.f32.mrb[49].mxu1  ;;  %v1245_v18 = vmul.f32 %v1117_v23, %v4528_v25  ;;  %v4552_v51 = vmul.f32 %v1993_v37, %v1737_v28  ;;  %v1755_v31 = vmul.f32 0.5, %v6334_v20  ;;  %v6335_v12 = vld [vmem:[#allocation51_spill] sm:$0xff]  ;;  %v4573_v37 = vpop.eup %3114 }
 0x189   : > { %6333 = vst [vmem:[#allocation50_spill] sm:$0xff] %v4549_v32  ;;  %v1995_v47 = vadd.f32 1.0, %v6335_v12  ;;  %v1247_v15 = vmul.f32 %v1119_v60, %v4532_v40  ;;  %v2137_v13 = vmul.f32 %v2009_v53, %v1753_v52  ;;  %v2011_v62 = vadd.f32 1.0, %v4195_v59  ;;  %v6336_v23 = vld [vmem:[#allocation27_spill] sm:$0xff] }
 0x18a   : > { %v1373_v24 = vmul.f32 %v1245_v18, %v4528_v25  ;;  %v4567_v28 = vadd.f32 %v4193_v46, %v6323_v55  ;;  %v4571_v12 = vadd.f32 %v4224_v6, %v6336_v23  ;;  %v1118_v20 = vmul.f32 0.044715, %v4560_v33 }
 0x18b   : > { %v4563_v32 = vmul.f32 %v1995_v47, %v1739_v16  ;;  %v1375_v59 = vmul.f32 %v1247_v15, %v4532_v40  ;;  %v2221_v52 = vpack.c.bf16 %v2137_v13, %v4552_v51  ;;  %v4577_v9 = vmul.f32 %v2011_v62, %v1755_v31 }
 0x18c   : > { %6337 = vst [vmem:[#allocation20_spill] sm:$0xff] %v4571_v12  ;;  %v1501_v47 = vadd.f32 %v1373_v24, %v4528_v25  ;;  %v1120_v60 = vmul.f32 0.044715, %v4567_v28  ;;  %v1133_v46 = vmul.f32 0.044715, %v4571_v12  ;;  %v4585_v6 = vadd.f32 %v4229_v30, %v6336_v23 }
 0x18d   : > { %v3117_v53 = vpop.eup %3116  ;;  %v4588_v16 = vmul.f32 %v1232_v36, %v4479_v45  ;;  %v1503_v13 = vadd.f32 %v1375_v59, %v4532_v40  ;;  %v2223_v62 = vpack.c.bf16 %v4577_v9, %v4563_v32  ;;  %v4595_v31 = vadd.f32 %v4238_v48, %v6336_v23 }
 0x18e   : > { %6338 = vst [vmem:[#allocation25_spill] sm:$0xff] %v4585_v6  ;;  %v4597_v18 = vpop.eup %3118  ;;  %v1994_v51 = vadd.f32 1.0, %v3117_v53  ;;  %v1740_v15 = vmul.f32 0.5, %v6315_v58  ;;  %v1629_v30 = vmul.f32 0.7978846, %v1501_v47  ;;  %v1261_v24 = vmul.f32 %v1133_v46, %v4571_v12 }
 0x18f   : > { %6339 = vst [vmem:[#allocation51_spill] sm:$0xff] %v4588_v16  ;;  %6340 = vst [vmem:[#allocation88_spill] sm:$0xff] %v4595_v31  ;;  %v3121_v10 = vpop.eup %3120  ;;  %3126 = vtanh.f32 %v1615_v41  ;;  %v1756_v36 = vmul.f32 0.5, %v6319_v35  ;;  %v1135_v59 = vmul.f32 0.044715, %v4585_v6  ;;  %v1246_v25 = vmul.f32 %v1118_v20, %v4560_v33 }
 0x190   : > { %6341 = vst [vmem:[#allocation89_spill] sm:$0xff] %v4597_v18  ;;  %v1134_v32 = vmul.f32 0.044715, %v4595_v31  ;;  %v3123_v9 = vpop.eup %3122  ;;  %v2010_v40 = vadd.f32 1.0, %v3121_v10  ;;  %v1631_v48 = vmul.f32 0.7978846, %v1503_v13  ;;  %v1248_v53 = vmul.f32 %v1120_v60, %v4567_v28 }
 0x191   : > { %v3125_v18 = vpop.eup %3124  ;;  %v2122_v58 = vmul.f32 %v1994_v51, %v4513_v19  ;;  %v1996_v47 = vadd.f32 1.0, %v3123_v9  ;;  %v1389_v46 = vmul.f32 %v1261_v24, %v4571_v12  ;;  %v1263_v41 = vmul.f32 %v1135_v59, %v4585_v6  ;;  %v6343_v19 = vld [vmem:[#allocation33_spill] sm:$0xff] }
 0x192   : > { %v2138_v35 = vmul.f32 %v2010_v40, %v4516_v7  ;;  %v2012_v55 = vadd.f32 1.0, %v3125_v18  ;;  %3128 = vtanh.f32 %v1629_v30  ;;  %v4612_v10 = vadd.f32 %v4240_v57, %v6336_v23  ;;  %v6344_v51 = vld [vmem:[#allocation49_spill] sm:$0xff] }
 0x193   : > { %v1517_v20 = vadd.f32 %v1389_v46, %v4571_v12  ;;  %v1391_v60 = vmul.f32 %v1263_v41, %v4585_v6  ;;  %v1262_v13 = vmul.f32 %v1134_v32, %v4595_v31  ;;  %v1514_v9 = vadd.f32 %v6344_v51, %v6343_v19  ;;  %v6353_v51 = vld [vmem:[#allocation30_spill] sm:$0xff] }
 0x194   : > { %6342 = vst [vmem:[#allocation90_spill] sm:$0xff] %v4612_v10  ;;  %v2222_v24 = vpack.c.bf16 %v2138_v35, %v2122_v58  ;;  %v2124_v16 = vmul.f32 %v1996_v47, %v1740_v15  ;;  %v2140_v59 = vmul.f32 %v2012_v55, %v1756_v36  ;;  %v1136_v7 = vmul.f32 0.044715, %v4612_v10  ;;  %v4635_v58 = vpop.f32.mrb[50].mxu0 }
 0x195   : > { %v1645_v40 = vmul.f32 0.7978846, %v1517_v20  ;;  %v1519_v18 = vadd.f32 %v1391_v60, %v4585_v6  ;;  %v1530_v57 = vadd.f32 %v4186_v0, %v4088_v8  ;;  %v1642_v30 = vmul.f32 0.7978846, %v1514_v9  ;;  %6346 = vst [vmem:[#allocation49_spill] sm:$0xff] %v4635_v58  ;;  %v4647_v35 = vpop.f32.mrb[51].mxu0 }
 0x196   : > { %2298 = vmatprep.subr.bf16.mxu0 %v2222_v24  ;;  %v2224_v46 = vpack.c.bf16 %v2140_v59, %v2124_v16  ;;  %3130 = vtanh.f32 %v1631_v48  ;;  %v4624_v32 = vmul.f32 %v1246_v25, %v4560_v33  ;;  %v4627_v41 = vmul.f32 %v1248_v53, %v4567_v28  ;;  %v4637_v16 = vpop.f32.mrb[50].mxu1  ;;  %v6349_v53 = vld [vmem:[#allocation54_spill] sm:$0xff]  ;;  %v6357_v59 = vld [vmem:[#allocation61_spill] sm:$0xff]  ;;  %v6369_v6 = vld [vmem:[#allocation64_spill] sm:$0xff] }
 0x197   : > { %2299 = vmatpush1.bf16.msra.mxu0 %v2221_v52  ;;  %v4630_v55 = vmul.f32 %v1262_v13, %v4595_v31  ;;  %v1264_v15 = vmul.f32 %v1136_v7, %v4612_v10  ;;  %v1658_v36 = vmul.f32 0.7978846, %v1530_v57  ;;  %v1516_v0 = vadd.f32 %v4177_v1, %v4054_v17  ;;  %6347 = vst [vmem:[#allocation91_spill] sm:$0xff] %v4637_v16  ;;  %v6348_v52 = vld [vmem:[#allocation42_spill] sm:$0xff]  ;;  %v4649_v20 = vpop.f32.mrb[51].mxu1  ;;  %v6359_v57 = vld [vmem:[#allocation29_spill] sm:$0xff] }
 0x198   : > { %2351 = vmatprep.subr.bf16.mxu1 %v2224_v46  ;;  %v4640_v25 = vmul.f32 0.5, %v6343_v19  ;;  %v4643_v48 = vmul.f32 0.5, %v4088_v8  ;;  %3132 = vtanh.f32 %v1642_v30  ;;  %v1532_v47 = vadd.f32 %v6349_v53, %v6348_v52  ;;  %6350 = vst [vmem:[#allocation42_spill] sm:$0xff] %v4647_v35  ;;  %6351 = vst [vmem:[#allocation54_spill] sm:$0xff] %v4649_v20  ;;  %v4657_v8 = vpop.f32.mrb[52].mxu0  ;;  %v4659_v9 = vpop.f32.mrb[52].mxu1 }
 0x199   : > { %6345 = vst [vmem:[#allocation33_spill] sm:$0xff] %v4630_v55  ;;  %v4651_v1 = vpop.eup %3126  ;;  %2352 = vmatpush1.bf16.msra.mxu1 %v2223_v62  ;;  %3134 = vtanh.f32 %v1645_v40  ;;  %v1647_v60 = vmul.f32 0.7978846, %v1519_v18  ;;  %v1644_v13 = vmul.f32 0.7978846, %v1516_v0  ;;  %v4655_v19 = vadd.f32 %v4251_v34, %v6353_v51  ;;  %6355 = vst [vmem:[#allocation94_spill] sm:$0xff] %v4657_v8 }
 0x19a   : > { %6352 = vst [vmem:[#allocation92_spill] sm:$0xff] %v4651_v1  ;;  %6356 = vst [vmem:[#allocation95_spill] sm:$0xff] %v4659_v9  ;;  %3136 = vtanh.f32 %v1658_v36  ;;  %v1660_v24 = vmul.f32 0.7978846, %v1532_v47  ;;  %v4663_v7 = vadd.f32 %v6357_v59, %v6353_v51  ;;  %v1769_v30 = vmul.f32 0.5, %v6359_v57  ;;  %v4666_v62 = vpop.f32.mrb[53].mxu0 }
 0x19b   : > { %6354 = vst [vmem:[#allocation93_spill] sm:$0xff] %v4655_v19  ;;  %6360 = vst [vmem:[#allocation29_spill] sm:$0xff] %v4666_v62  ;;  %v4668_v40 = vpop.f32.mrb[53].mxu1  ;;  %3138 = vtanh.f32 %v1644_v13  ;;  %v1149_v34 = vmul.f32 0.044715, %v4655_v19  ;;  %v6362_v18 = vld [vmem:[#allocation38_spill] sm:$0xff]  ;;  %v4689_v12 = vadd.f32 %v6369_v6, %v6353_v51 }
 0x19c   : > { %6358 = vst [vmem:[#allocation61_spill] sm:$0xff] %v4663_v7  ;;  %6361 = vst [vmem:[#allocation96_spill] sm:$0xff] %v4668_v40  ;;  %v1785_v46 = vmul.f32 0.5, %v6362_v18  ;;  %v6363_v0 = vld [vmem:[#allocation56_spill] sm:$0xff]  ;;  %v4673_v9 = vpop.eup %3128  ;;  %3140 = vtanh.f32 %v1660_v24  ;;  %v1151_v36 = vmul.f32 0.044715, %v4663_v7 }
 0x19d   : > { %v2025_v53 = vadd.f32 1.0, %v6363_v0  ;;  %v6364_v47 = vld [vmem:[#allocation62_spill] sm:$0xff]  ;;  %v6365_v8 = vld [vmem:[#allocation31_spill] sm:$0xff]  ;;  %v1277_v62 = vmul.f32 %v1149_v34, %v4655_v19  ;;  %v6366_v13 = vld [vmem:[#allocation40_spill] sm:$0xff]  ;;  %3142 = vtanh.f32 %v1647_v60 }
 0x19e   : > { %v2041_v59 = vadd.f32 1.0, %v6364_v47  ;;  %v1771_v57 = vmul.f32 0.5, %v6365_v8  ;;  %v1787_v40 = vmul.f32 0.5, %v6366_v13  ;;  %v6367_v35 = vld [vmem:[#allocation60_spill] sm:$0xff]  ;;  %v1279_v18 = vmul.f32 %v1151_v36, %v4663_v7  ;;  %v6368_v58 = vld [vmem:[#allocation66_spill] sm:$0xff] }
 0x19f   : > { %v4679_v20 = vmul.f32 %v2025_v53, %v1769_v30  ;;  %v2027_v16 = vadd.f32 1.0, %v6367_v35  ;;  %v2043_v24 = vadd.f32 1.0, %v6368_v58  ;;  %v4692_v8 = vmul.f32 %v1264_v15, %v4612_v10  ;;  %v6371_v53 = vld [vmem:[#allocation65_spill] sm:$0xff]  ;;  %v6376_v13 = vld [vmem:[#allocation70_spill] sm:$0xff] }
 0x1a0   : > { %v4684_v0 = vmul.f32 %v2041_v59, %v1785_v46  ;;  %v1405_v30 = vmul.f32 %v1277_v62, %v4655_v19  ;;  %v4699_v35 = vadd.f32 %v6371_v53, %v6353_v51  ;;  %v4701_v36 = vpop.eup %3130  ;;  %v1407_v46 = vmul.f32 %v1279_v18, %v4663_v7  ;;  %v6373_v62 = vld [vmem:[#allocation10_spill] sm:$0xff]  ;;  %v6374_v59 = vld [vmem:[#allocation69_spill] sm:$0xff] }
 0x1a1   : > { %6370 = vst [vmem:[#allocation38_spill] sm:$0xff] %v4692_v8  ;;  %v4695_v34 = vmul.f32 %v2027_v16, %v1771_v57  ;;  %6372 = vst [vmem:[#allocation56_spill] sm:$0xff] %v4701_v36  ;;  %v4706_v6 = vmul.f32 %v2043_v24, %v1787_v40  ;;  %v1150_v15 = vmul.f32 0.044715, %v4689_v12  ;;  %v4713_v57 = vadd.f32 %v6374_v59, %v6373_v62  ;;  %v6380_v36 = vld [vmem:[#allocation72_spill] sm:$0xff] }
 0x1a2   : > { %v2237_v58 = vpack.c.bf16 %v4684_v0, %v4679_v20  ;;  %v1533_v47 = vadd.f32 %v1405_v30, %v4655_v19  ;;  %v1152_v16 = vmul.f32 0.044715, %v4699_v35  ;;  %v4717_v53 = vadd.f32 %v6376_v13, %v6373_v62  ;;  %v3133_v18 = vpop.eup %3132  ;;  %v6378_v0 = vld [vmem:[#allocation71_spill] sm:$0xff] }
 0x1a3   : > { %6375 = vst [vmem:[#allocation62_spill] sm:$0xff] %v4713_v57  ;;  %v1772_v51 = vmul.f32 0.5, %v4054_v17  ;;  %v1535_v20 = vadd.f32 %v1407_v46, %v4663_v7  ;;  %v2239_v40 = vpack.c.bf16 %v4706_v6, %v4695_v34  ;;  %v4725_v24 = vadd.f32 %v6378_v0, %v6373_v62  ;;  %v4727_v30 = vpop.eup %3134 }
 0x1a4   : > { %6377 = vst [vmem:[#allocation31_spill] sm:$0xff] %v4717_v53  ;;  %6379 = vst [vmem:[#allocation40_spill] sm:$0xff] %v4727_v30  ;;  %v2026_v59 = vadd.f32 1.0, %v3133_v18  ;;  %v1661_v19 = vmul.f32 0.7978846, %v1533_v47  ;;  %v3137_v8 = vpop.eup %3136  ;;  %v1788_v10 = vmul.f32 0.5, %v6348_v52  ;;  %v1278_v0 = vmul.f32 %v1150_v15, %v4689_v12 }
 0x1a5   : > { %v1041_v13 = vmul.f32 0.044715, %v4713_v57  ;;  %v1043_v17 = vmul.f32 0.044715, %v4717_v53  ;;  %v1042_v46 = vmul.f32 0.044715, %v4725_v24  ;;  %v3139_v34 = vpop.eup %3138  ;;  %v1280_v30 = vmul.f32 %v1152_v16, %v4699_v35 }
 0x1a6   : > { %v2042_v6 = vadd.f32 1.0, %v3137_v8  ;;  %v1663_v7 = vmul.f32 0.7978846, %v1535_v20  ;;  %v3141_v60 = vpop.eup %3140  ;;  %v2154_v47 = vmul.f32 %v2026_v59, %v4640_v25  ;;  %v2028_v18 = vadd.f32 1.0, %v3139_v34  ;;  %v6382_v25 = vld [vmem:[#allocation52_spill] sm:$0xff]  ;;  %v6383_v59 = vld [vmem:[#allocation55_spill] sm:$0xff] }
 0x1a7   : > { %v1169_v55 = vmul.f32 %v1041_v13, %v4713_v57  ;;  %v1171_v52 = vmul.f32 %v1043_v17, %v4717_v53  ;;  %v2044_v23 = vadd.f32 1.0, %v3141_v60  ;;  %3144 = vtanh.f32 %v1661_v19 }
 0x1a8   : > { %v2170_v31 = vmul.f32 %v2042_v6, %v4643_v48  ;;  %v4741_v8 = vadd.f32 %v6380_v36, %v6373_v62  ;;  %v1170_v20 = vmul.f32 %v1042_v46, %v4725_v24  ;;  %v1422_v34 = vadd.f32 %v6383_v59, %v6382_v25  ;;  %v6389_v59 = vld [vmem:[#allocation11_spill] sm:$0xff] }
 0x1a9   : > { %v1297_v15 = vmul.f32 %v1169_v55, %v4713_v57  ;;  %v1299_v16 = vmul.f32 %v1171_v52, %v4717_v53  ;;  %v2156_v1 = vmul.f32 %v2028_v18, %v1772_v51  ;;  %v2172_v17 = vmul.f32 %v2044_v23, %v1788_v10  ;;  %v4762_v23 = vld [vmem:[%s6067_s3] sm:$0xff]   ;;  %v4779_v52 = vpop.f32.mrb[54].mxu0 }
 0x1aa   : > { %6381 = vst [vmem:[#allocation60_spill] sm:$0xff] %v4741_v8  ;;  %v2238_v13 = vpack.c.bf16 %v2170_v31, %v2154_v47  ;;  %v1044_v48 = vmul.f32 0.044715, %v4741_v8  ;;  %v1438_v36 = vadd.f32 %v4333_v56, %v4249_v21  ;;  %v1550_v55 = vmul.f32 0.7978846, %v1422_v34  ;;  %6384 = vst [vmem:[#allocation66_spill] sm:$0xff] %v4762_v23 }
 0x1ab   : > { %v1425_v19 = vadd.f32 %v1297_v15, %v4713_v57  ;;  %v1427_v6 = vadd.f32 %v1299_v16, %v4717_v53  ;;  %v2240_v60 = vpack.c.bf16 %v2172_v17, %v2156_v1  ;;  %3146 = vtanh.f32 %v1663_v7  ;;  %v4767_v1 = vpop.eup %3142  ;;  %v6386_v47 = vld [vmem:[#allocation57_spill] sm:$0xff]  ;;  %6387 = vst [vmem:[#allocation64_spill] sm:$0xff] %v4779_v52  ;;  %v4781_v15 = vpop.f32.mrb[54].mxu1  ;;  %v6411_v57 = vld [vmem:[#allocation68_spill] sm:$0xff] }
 0x1ac   : > { %2300 = vmatprep.subr.bf16.mxu0 %v2238_v13  ;;  %v4754_v46 = vmul.f32 %v1278_v0, %v4689_v12  ;;  %v4757_v31 = vmul.f32 %v1280_v30, %v4699_v35  ;;  %v4765_v51 = vmul.f32 %v1170_v20, %v4725_v24  ;;  %v1566_v56 = vmul.f32 0.7978846, %v1438_v36  ;;  %v6385_v0 = vld [vmem:[#allocation53_spill] sm:$0xff]  ;;  %6388 = vst [vmem:[#allocation65_spill] sm:$0xff] %v4781_v15  ;;  %v4794_v13 = vpop.f32.mrb[55].mxu0 }
 0x1ad   : > { %2301 = vmatpush1.bf16.msra.mxu0 %v2237_v58  ;;  %v1553_v10 = vmul.f32 0.7978846, %v1425_v19  ;;  %3148 = vtanh.f32 %v1550_v55  ;;  %2353 = vmatprep.subr.bf16.mxu1 %v2240_v60  ;;  %v4770_v7 = vmul.f32 %v1044_v48, %v4741_v8  ;;  %v4773_v30 = vmul.f32 0.5, %v6382_v25  ;;  %6392 = vst [vmem:[#allocation70_spill] sm:$0xff] %v4794_v13  ;;  %v4801_v19 = vpop.f32.mrb[56].mxu0 }
 0x1ae   : > { %v1424_v18 = vadd.f32 %v6386_v47, %v6385_v0  ;;  %v1440_v58 = vadd.f32 %v4342_v39, %v4263_v26  ;;  %2354 = vmatpush1.bf16.msra.mxu1 %v2239_v40  ;;  %v1555_v16 = vmul.f32 0.7978846, %v1427_v6  ;;  %v4784_v20 = vmul.f32 0.5, %v4249_v21  ;;  %v4796_v39 = vpop.f32.mrb[55].mxu1  ;;  %v6394_v21 = vld [vmem:[#allocation43_spill] sm:$0xff]  ;;  %6395 = vst [vmem:[#allocation72_spill] sm:$0xff] %v4801_v19 }
 0x1af   : > { %v4788_v34 = vadd.f32 %v4313_v22, %v6389_v59  ;;  %v4792_v25 = vadd.f32 %v4316_v63, %v6389_v59  ;;  %6393 = vst [vmem:[#allocation71_spill] sm:$0xff] %v4796_v39  ;;  %3150 = vtanh.f32 %v1553_v10  ;;  %v1677_v48 = vmul.f32 0.5, %v6394_v21  ;;  %v6396_v6 = vld [vmem:[#allocation58_spill] sm:$0xff]  ;;  %v4807_v60 = vpop.f32.mrb[56].mxu1  ;;  %v4816_v21 = vpop.f32.mrb[57].mxu0  ;;  %v6402_v39 = vld [vmem:[#allocation59_spill] sm:$0xff] }
 0x1b0   : > { %2937 = vmatmul.mubr.msk.bf16.vlgmr.msra.gmra.mrb[64].mxu0 %vm2287_vm1, %v4762_v23  ;;  %v1552_v40 = vmul.f32 0.7978846, %v1424_v18  ;;  %v1568_v17 = vmul.f32 0.7978846, %v1440_v58  ;;  %3152 = vtanh.f32 %v1566_v56  ;;  %v1693_v36 = vmul.f32 0.5, %v6396_v6  ;;  %6398 = vst [vmem:[#allocation52_spill] sm:$0xff] %v4807_v60 }
 0x1b1   : > { %6390 = vst [vmem:[#allocation10_spill] sm:$0xff] %v4788_v34  ;;  %6391 = vst [vmem:[#allocation69_spill] sm:$0xff] %v4792_v25  ;;  %v1057_v22 = vmul.f32 0.044715, %v4788_v34  ;;  %v1059_v63 = vmul.f32 0.044715, %v4792_v25  ;;  %v4809_v47 = vpop.eup %3144  ;;  %2939 = vmatmul.mubr.msk.bf16.vlgmr.msra.gmra.mrb[64].mxu1 %vm2287_vm1, %v4762_v23 }
 0x1b2   : > { %v6397_v55 = vmov 0   ;;  %3154 = vtanh.f32 %v1552_v40  ;;  %v1933_v10 = vadd.f32 1.0, %v4337_v61  ;;  %v1949_v56 = vadd.f32 1.0, %v4409_v3  ;;  %v6399_v18 = vld [vmem:[#allocation46_spill] sm:$0xff]  ;;  %6400 = vst [vmem:[#allocation55_spill] sm:$0xff] %v4816_v21  ;;  %v4818_v19 = vpop.f32.mrb[57].mxu1 }
 0x1b3   : > { %2336 = vmatprep.mubr.bf16.mxu0 %v6397_v55  ;;  %v1679_v58 = vmul.f32 0.5, %v6399_v18  ;;  %6401 = vst [vmem:[#allocation53_spill] sm:$0xff] %v4818_v19  ;;  %3156 = vtanh.f32 %v1568_v17  ;;  %v1185_v6 = vmul.f32 %v1057_v22, %v4788_v34  ;;  %v1187_v60 = vmul.f32 %v1059_v63, %v4792_v25  ;;  %2389 = vmatprep.mubr.bf16.mxu1 %v6397_v55  ;;  %v4833_v17 = vld [vmem:[%s6067_s3 + $0x8] sm:$0xff]   ;;  %v6412_v23 = vld [vmem:[#allocation74_spill] sm:$0xff] }
 0x1b4   : > { %v1695_v13 = vmul.f32 0.5, %v6402_v39  ;;  %v4824_v40 = vmul.f32 %v1933_v10, %v1677_v48  ;;  %v4826_v61 = vmul.f32 %v1949_v56, %v1693_v36  ;;  %v1935_v3 = vadd.f32 1.0, %v4364_v54  ;;  %6403 = vst [vmem:[#allocation57_spill] sm:$0xff] %v4833_v17 }
 0x1b5   : > { %v1951_v18 = vadd.f32 1.0, %v4426_v27  ;;  %v1313_v22 = vmul.f32 %v1185_v6, %v4788_v34  ;;  %v1315_v63 = vmul.f32 %v1187_v60, %v4792_v25  ;;  %v4839_v39 = vadd.f32 %v4318_v50, %v6389_v59  ;;  %v4845_v54 = vpop.eup %3146  ;;  %v6409_v27 = vld [vmem:[#allocation76_spill] sm:$0xff] }
 0x1b6   : > { %v4843_v48 = vadd.f32 %v4326_v4, %v6389_v59  ;;  %v4849_v36 = vmul.f32 %v1935_v3, %v1679_v58  ;;  %v4855_v60 = vadd.f32 %v4339_v43, %v3872_v14  ;;  %v6405_v43 = vld [vmem:[#allocation75_spill] sm:$0xff]  ;;  %3158 = vtanh.f32 %v1555_v16 }
 0x1b7   : > { %v4851_v10 = vmul.f32 %v1951_v18, %v1695_v13  ;;  %v3149_v56 = vpop.eup %3148  ;;  %v1441_v50 = vadd.f32 %v1313_v22, %v4788_v34  ;;  %v1443_v6 = vadd.f32 %v1315_v63, %v4792_v25  ;;  %v1058_v4 = vmul.f32 0.044715, %v4839_v39  ;;  %v6410_v25 = vld [vmem:[#allocation77_spill] sm:$0xff] }
 0x1b8   : > { %6404 = vst [vmem:[#allocation43_spill] sm:$0xff] %v4855_v60  ;;  %v1060_v19 = vmul.f32 0.044715, %v4843_v48  ;;  %v1934_v21 = vadd.f32 1.0, %v3149_v56  ;;  %2938 = vmatmul.mubr.msk.bf16.gmra.mrb[68].mxu0 %vm2287_vm1, %v4833_v17  ;;  %v1073_v13 = vmul.f32 0.044715, %v4855_v60  ;;  %v4868_v3 = vadd.f32 %v6405_v43, %v3872_v14 }
 0x1b9   : > { %v4872_v18 = vmul.f32 %v4770_v7, %v4741_v8  ;;  %v1680_v22 = vmul.f32 0.5, %v6385_v0  ;;  %v1696_v63 = vmul.f32 0.5, %v4263_v26  ;;  %2432 = vmatprep.mubr.bf16.mxu0 %v6397_v55  ;;  %v4877_v56 = vpop.eup %3150  ;;  %v1569_v58 = vmul.f32 0.7978846, %v1441_v50  ;;  %2940 = vmatmul.mubr.msk.bf16.gmra.mrb[68].mxu1 %vm2287_vm1, %v4833_v17 }
 0x1ba   : > { %6406 = vst [vmem:[#allocation58_spill] sm:$0xff] %v4868_v3  ;;  %6408 = vst [vmem:[#allocation59_spill] sm:$0xff] %v4877_v56  ;;  %v1201_v43 = vmul.f32 %v1073_v13, %v4855_v60  ;;  %v1075_v16 = vmul.f32 0.044715, %v4868_v3  ;;  %v4885_v7 = vadd.f32 %v6409_v27, %v3872_v14  ;;  %v3153_v15 = vpop.eup %3152  ;;  %v1571_v0 = vmul.f32 0.7978846, %v1443_v6  ;;  %2485 = vmatprep.mubr.bf16.mxu1 %v6397_v55 }
 0x1bb   : > { %6407 = vst [vmem:[#allocation46_spill] sm:$0xff] %v4872_v18  ;;  %v1186_v26 = vmul.f32 %v1058_v4, %v4839_v39  ;;  %v1188_v52 = vmul.f32 %v1060_v19, %v4843_v48  ;;  %v4891_v50 = vadd.f32 %v6410_v25, %v3872_v14  ;;  %v1950_v13 = vadd.f32 1.0, %v3153_v15 }
 0x1bc   : > { %v3155_v17 = vpop.eup %3154  ;;  %v2062_v53 = vmul.f32 %v1934_v21, %v4773_v30  ;;  %v1329_v56 = vmul.f32 %v1201_v43, %v4855_v60  ;;  %v1203_v27 = vmul.f32 %v1075_v16, %v4868_v3  ;;  %v1074_v4 = vmul.f32 0.044715, %v4885_v7 }
 0x1bd   : > { %v3157_v34 = vpop.eup %3156  ;;  %v1936_v6 = vadd.f32 1.0, %v3155_v17  ;;  %v1076_v19 = vmul.f32 0.044715, %v4891_v50  ;;  %v1454_v25 = vadd.f32 %v6412_v23, %v6411_v57  ;;  %v2078_v14 = vmul.f32 %v1950_v13, %v4784_v20 }
 0x1be   : > { %v1952_v55 = vadd.f32 1.0, %v3157_v34  ;;  %v1457_v15 = vadd.f32 %v1329_v56, %v4855_v60  ;;  %v1331_v30 = vmul.f32 %v1203_v27, %v4868_v3  ;;  %v1202_v43 = vmul.f32 %v1074_v4, %v4885_v7  ;;  %v6422_v4 = vld [vmem:[#allocation78_spill] sm:$0xff] }
 0x1bf   : > { %v2064_v21 = vmul.f32 %v1936_v6, %v1680_v22  ;;  %v1204_v16 = vmul.f32 %v1076_v19, %v4891_v50  ;;  %v1470_v17 = vadd.f32 %v4497_v44, %v4405_v29  ;;  %v2194_v59 = vpack.c.bf16 %v2078_v14, %v2062_v53  ;;  %v4918_v14 = vpop.f32.mrb[58].mxu0  ;;  %v4920_v44 = vpop.f32.mrb[58].mxu1 }
 0x1c0   : > { %v2080_v18 = vmul.f32 %v1952_v55, %v1696_v63  ;;  %v1585_v8 = vmul.f32 0.7978846, %v1457_v15  ;;  %v1459_v23 = vadd.f32 %v1331_v30, %v4868_v3  ;;  %3160 = vtanh.f32 %v1569_v58  ;;  %6413 = vst [vmem:[#allocation75_spill] sm:$0xff] %v4918_v14  ;;  %6414 = vst [vmem:[#allocation76_spill] sm:$0xff] %v4920_v44  ;;  %v4922_v53 = vpop.eup %3158  ;;  %v6417_v58 = vld [vmem:[#allocation73_spill] sm:$0xff] }
 0x1c1   : > { %v4910_v20 = vmul.f32 %v1186_v26, %v4839_v39  ;;  %v1582_v34 = vmul.f32 0.7978846, %v1454_v25  ;;  %v1598_v56 = vmul.f32 0.7978846, %v1470_v17  ;;  %2400 = vmatprep.subr.bf16.mxu0 %v2194_v59  ;;  %3162 = vtanh.f32 %v1571_v0  ;;  %v4934_v0 = vpop.f32.mrb[59].mxu0  ;;  %v4936_v26 = vpop.f32.mrb[59].mxu1 }
 0x1c2   : > { %v2196_v22 = vpack.c.bf16 %v2080_v18, %v2064_v21  ;;  %v4913_v13 = vmul.f32 %v1188_v52, %v4843_v48  ;;  %v4916_v27 = vmul.f32 %v1202_v43, %v4885_v7  ;;  %v6415_v55 = vpack.c.bf16 %v4826_v61, %v4824_v40  ;;  %v6418_v52 = vld [vmem:[#allocation84_spill] sm:$0xff]  ;;  %6419 = vst [vmem:[#allocation68_spill] sm:$0xff] %v4934_v0  ;;  %v6421_v61 = vld [vmem:[#allocation15_spill] sm:$0xff]  ;;  %v4943_v25 = vpop.f32.mrb[60].mxu0  ;;  %v4945_v15 = vpop.f32.mrb[60].mxu1 }
 0x1c3   : > { %v4928_v59 = vmul.f32 %v1204_v16, %v4891_v50  ;;  %3164 = vtanh.f32 %v1582_v34  ;;  %v1456_v18 = vadd.f32 %v6418_v52, %v6417_v58  ;;  %v1472_v63 = vadd.f32 %v4500_v42, %v4416_v11  ;;  %6420 = vst [vmem:[#allocation74_spill] sm:$0xff] %v4936_v26  ;;  %6424 = vst [vmem:[#allocation84_spill] sm:$0xff] %v4943_v25  ;;  %v4956_v16 = vpop.f32.mrb[61].mxu1  ;;  %v6433_v52 = vld [vmem:[#allocation45_spill] sm:$0xff] }
 0x1c4   : > { %2401 = vmatpush1.bf16.msra.mxu0 %v6415_v55  ;;  %2453 = vmatprep.subr.bf16.mxu1 %v2196_v22  ;;  %3166 = vtanh.f32 %v1585_v8  ;;  %v1587_v6 = vmul.f32 0.7978846, %v1459_v23  ;;  %v1710_v40 = vmul.f32 0.5, %v6411_v57  ;;  %v4941_v19 = vadd.f32 %v6422_v4, %v6421_v61  ;;  %6425 = vst [vmem:[#allocation78_spill] sm:$0xff] %v4945_v15  ;;  %v6427_v8 = vld [vmem:[#allocation79_spill] sm:$0xff]  ;;  %v4954_v57 = vpop.f32.mrb[61].mxu0 }
 0x1c5   : > { %6416 = vst [vmem:[#allocation77_spill] sm:$0xff] %v4928_v59  ;;  %v6426_v42 = vpack.c.bf16 %v4851_v10, %v4849_v36  ;;  %3168 = vtanh.f32 %v1598_v56  ;;  %v1584_v30 = vmul.f32 0.7978846, %v1456_v18  ;;  %v1600_v21 = vmul.f32 0.7978846, %v1472_v63  ;;  %6429 = vst [vmem:[#allocation97_spill] sm:$0xff] %v4954_v57 }
 0x1c6   : > { %6423 = vst [vmem:[#allocation73_spill] sm:$0xff] %v4941_v19  ;;  %v4952_v43 = vadd.f32 %v6427_v8, %v6421_v61  ;;  %6430 = vst [vmem:[#allocation98_spill] sm:$0xff] %v4956_v16  ;;  %v1089_v17 = vmul.f32 0.044715, %v4941_v19  ;;  %v6431_v23 = vld [vmem:[#allocation63_spill] sm:$0xff]  ;;  %v6432_v22 = vld [vmem:[#allocation44_spill] sm:$0xff] }
 0x1c7   : > { %2454 = vmatpush1.bf16.msra.mxu1 %v6426_v42  ;;  %v1709_v34 = vmul.f32 0.5, %v6431_v23  ;;  %v1725_v55 = vmul.f32 0.5, %v6432_v22  ;;  %v1965_v36 = vadd.f32 1.0, %v6433_v52  ;;  %3170 = vtanh.f32 %v1584_v30  ;;  %v6434_v18 = vld [vmem:[#allocation67_spill] sm:$0xff]  ;;  %v6446_v59 = vld [vmem:[#allocation17_spill] sm:$0xff] }
 0x1c8   : > { %6428 = vst [vmem:[#allocation79_spill] sm:$0xff] %v4952_v43  ;;  %v1091_v10 = vmul.f32 0.044715, %v4952_v43  ;;  %v1981_v56 = vadd.f32 1.0, %v4542_v49  ;;  %v1711_v63 = vmul.f32 0.5, %v6434_v18  ;;  %3172 = vtanh.f32 %v1600_v21  ;;  %v6435_v8 = vld [vmem:[#allocation47_spill] sm:$0xff] }
 0x1c9   : > { %v1217_v4 = vmul.f32 %v1089_v17, %v4941_v19  ;;  %v4966_v42 = vmul.f32 %v1965_v36, %v1709_v34  ;;  %v1727_v16 = vmul.f32 0.5, %v6435_v8  ;;  %v1967_v22 = vadd.f32 1.0, %v4524_v5  ;;  %v6436_v49 = vld [vmem:[#allocation80_spill] sm:$0xff]  ;;  %v6437_v21 = vld [vmem:[#allocation13_spill] sm:$0xff]  ;;  %v6438_v34 = vld [vmem:[#allocation18_spill] sm:$0xff] }
 0x1ca   : > { %v1219_v23 = vmul.f32 %v1091_v10, %v4952_v43  ;;  %v4970_v57 = vmul.f32 %v1981_v56, %v1725_v55  ;;  %v1983_v30 = vadd.f32 1.0, %v4573_v37  ;;  %v4977_v18 = vadd.f32 %v6436_v49, %v6421_v61  ;;  %v6439_v36 = vld [vmem:[#allocation16_spill] sm:$0xff]  ;;  %v4987_v55 = vpop.eup %3160 }
 0x1cb   : > { %v1345_v52 = vmul.f32 %v1217_v4, %v4941_v19  ;;  %v4981_v17 = vadd.f32 %v6437_v21, %v6421_v61  ;;  %v4985_v8 = vadd.f32 %v6439_v36, %v6438_v34  ;;  %v4992_v10 = vmul.f32 %v1967_v22, %v1711_v63  ;;  %v4996_v4 = vpop.eup %3162  ;;  %v6441_v63 = vld [vmem:[#allocation41_spill] sm:$0xff] }
 0x1cc   : > { %v1347_v5 = vmul.f32 %v1219_v23, %v4952_v43  ;;  %v2209_v37 = vpack.c.bf16 %v4970_v57, %v4966_v42  ;;  %v4994_v56 = vmul.f32 %v1983_v30, %v1727_v16  ;;  %v1090_v21 = vmul.f32 0.044715, %v4977_v18  ;;  %v6443_v42 = vld [vmem:[#allocation14_spill] sm:$0xff] }
 0x1cd   : > { %6440 = vst [vmem:[#allocation63_spill] sm:$0xff] %v4985_v8  ;;  %v1473_v49 = vadd.f32 %v1345_v52, %v4941_v19  ;;  %v1092_v36 = vmul.f32 0.044715, %v4981_v17  ;;  %v1105_v15 = vmul.f32 0.044715, %v4985_v8  ;;  %v3165_v25 = vpop.eup %3164  ;;  %v5007_v16 = vadd.f32 %v6441_v63, %v6438_v34 }
 0x1ce   : > { %v1475_v23 = vadd.f32 %v1347_v5, %v4952_v43  ;;  %v5011_v22 = vadd.f32 %v6443_v42, %v6438_v34  ;;  %v5013_v30 = vpop.eup %3166  ;;  %3174 = vtanh.f32 %v1587_v6  ;;  %v1726_v52 = vmul.f32 0.5, %v4405_v29 }
 0x1cf   : > { %6442 = vst [vmem:[#allocation44_spill] sm:$0xff] %v5007_v16  ;;  %6445 = vst [vmem:[#allocation67_spill] sm:$0xff] %v5013_v30  ;;  %v1966_v26 = vadd.f32 1.0, %v3165_v25  ;;  %v1712_v0 = vmul.f32 0.5, %v6417_v58  ;;  %v3169_v5 = vpop.eup %3168  ;;  %v1728_v44 = vmul.f32 0.5, %v4416_v11  ;;  %v1233_v57 = vmul.f32 %v1105_v15, %v4985_v8 }
 0x1d0   : > { %6444 = vst [vmem:[#allocation45_spill] sm:$0xff] %v5011_v22  ;;  %v1107_v63 = vmul.f32 0.044715, %v5007_v16  ;;  %v1106_v14 = vmul.f32 0.044715, %v5011_v22  ;;  %v1982_v43 = vadd.f32 1.0, %v3169_v5  ;;  %v1218_v3 = vmul.f32 %v1090_v21, %v4977_v18 }
 0x1d1   : > { %v1601_v42 = vmul.f32 0.7978846, %v1473_v49  ;;  %v1220_v6 = vmul.f32 %v1092_v36, %v4981_v17  ;;  %v3171_v30 = vpop.eup %3170  ;;  %v2094_v29 = vmul.f32 %v1966_v26, %v1710_v40  ;;  %v1603_v25 = vmul.f32 0.7978846, %v1475_v23 }
 0x1d2   : > { %v1361_v58 = vmul.f32 %v1233_v57, %v4985_v8  ;;  %v1235_v19 = vmul.f32 %v1107_v63, %v5007_v16  ;;  %v3173_v11 = vpop.eup %3172  ;;  %v2110_v60 = vmul.f32 %v1982_v43, %v1726_v52  ;;  %v1968_v15 = vadd.f32 1.0, %v3171_v30 }
 0x1d3   : > { %v1234_v61 = vmul.f32 %v1106_v14, %v5011_v22  ;;  %v5028_v5 = vadd.f32 %v6446_v59, %v6438_v34  ;;  %v1984_v49 = vadd.f32 1.0, %v3173_v11  ;;  %v1486_v26 = vadd.f32 %v4503_v2, %v4457_v38 }
 0x1d4   : > { %v1489_v21 = vadd.f32 %v1361_v58, %v4985_v8  ;;  %v1363_v36 = vmul.f32 %v1235_v19, %v5007_v16  ;;  %v2210_v40 = vpack.c.bf16 %v2110_v60, %v2094_v29  ;;  %v2096_v23 = vmul.f32 %v1968_v15, %v1712_v0 }
 0x1d5   : > { %6447 = vst [vmem:[#allocation47_spill] sm:$0xff] %v5028_v5  ;;  %3176 = vtanh.f32 %v1601_v42  ;;  %v1108_v43 = vmul.f32 0.044715, %v5028_v5  ;;  %v2112_v57 = vmul.f32 %v1984_v49, %v1728_v44  ;;  %v1502_v59 = vadd.f32 %v4624_v32, %v4560_v33  ;;  %v5048_v42 = vpop.f32.mrb[62].mxu0  ;;  %v5050_v32 = vpop.f32.mrb[62].mxu1  ;;  %v6454_v49 = vld [vmem:[#allocation21_spill] sm:$0xff] }
 0x1d6   : > { %v1617_v30 = vmul.f32 0.7978846, %v1489_v21  ;;  %v1491_v14 = vadd.f32 %v1363_v36, %v5007_v16  ;;  %2402 = vmatprep.subr.bf16.mxu0 %v2210_v40  ;;  %3178 = vtanh.f32 %v1603_v25  ;;  %v5039_v52 = vmul.f32 %v1218_v3, %v4977_v18  ;;  %6449 = vst [vmem:[#allocation13_spill] sm:$0xff] %v5048_v42  ;;  %6450 = vst [vmem:[#allocation18_spill] sm:$0xff] %v5050_v32  ;;  %v5063_v58 = vpop.f32.mrb[63].mxu1  ;;  %v6455_v21 = vld [vmem:[#allocation36_spill] sm:$0xff] }
 0x1d7   : > { %v5042_v19 = vmul.f32 %v1220_v6, %v4981_v17  ;;  %v1614_v2 = vmul.f32 0.7978846, %v1486_v26  ;;  %v2212_v60 = vpack.c.bf16 %v2112_v57, %v2096_v23  ;;  %2403 = vmatpush1.bf16.msra.mxu0 %v2209_v37  ;;  %v5045_v0 = vmul.f32 %v1234_v61, %v5011_v22  ;;  %v6451_v6 = vld [vmem:[#allocation51_spill] sm:$0xff]  ;;  %v5061_v37 = vpop.f32.mrb[63].mxu0  ;;  %6453 = vst [vmem:[#allocation41_spill] sm:$0xff] %v5063_v58  ;;  %v6458_v40 = vld [vmem:[#allocation81_spill] sm:$0xff] }
 0x1d8   : > { %v1236_v44 = vmul.f32 %v1108_v43, %v5028_v5  ;;  %v1630_v63 = vmul.f32 0.7978846, %v1502_v59  ;;  %v5052_v29 = vpop.eup %3174  ;;  %v5055_v3 = vmul.f32 0.5, %v4457_v38  ;;  %v1488_v25 = vadd.f32 %v6451_v6, %v4479_v45  ;;  %6452 = vst [vmem:[#allocation16_spill] sm:$0xff] %v5061_v37  ;;  %v6460_v57 = vld [vmem:[#allocation32_spill] sm:$0xff]  ;;  %v6462_v59 = vld [vmem:[#allocation89_spill] sm:$0xff] }
 0x1d9   : > { %6448 = vst [vmem:[#allocation80_spill] sm:$0xff] %v5045_v0  ;;  %3180 = vtanh.f32 %v1614_v2  ;;  %v1504_v61 = vadd.f32 %v4627_v41, %v4567_v28  ;;  %2455 = vmatprep.subr.bf16.mxu1 %v2212_v60  ;;  %v1619_v11 = vmul.f32 0.7978846, %v1491_v14  ;;  %v1758_v15 = vmul.f32 0.5, %v4560_v33  ;;  %v6461_v33 = vld [vmem:[#allocation35_spill] sm:$0xff] }
 0x1da   : > { %3182 = vtanh.f32 %v1617_v30  ;;  %v5068_v38 = vadd.f32 %v6455_v21, %v6454_v49  ;;  %v6457_v36 = vpack.c.bf16 %v4994_v56, %v4992_v10  ;;  %v1616_v26 = vmul.f32 0.7978846, %v1488_v25  ;;  %v6463_v56 = vld [vmem:[#allocation48_spill] sm:$0xff] }
 0x1db   : > { %3184 = vtanh.f32 %v1630_v63  ;;  %v1632_v41 = vmul.f32 0.7978846, %v1504_v61  ;;  %v5075_v23 = vadd.f32 %v6458_v40, %v6454_v49  ;;  %v1741_v30 = vmul.f32 0.5, %v6460_v57  ;;  %v6464_v61 = vld [vmem:[#allocation28_spill] sm:$0xff] }
 0x1dc   : > { %6456 = vst [vmem:[#allocation14_spill] sm:$0xff] %v5068_v38  ;;  %2456 = vmatpush1.bf16.msra.mxu1 %v6457_v36  ;;  %v1121_v43 = vmul.f32 0.044715, %v5068_v38  ;;  %v1757_v14 = vmul.f32 0.5, %v6461_v33  ;;  %v1997_v2 = vadd.f32 1.0, %v6462_v59  ;;  %3186 = vtanh.f32 %v1616_v26  ;;  %v6465_v26 = vld [vmem:[#allocation92_spill] sm:$0xff] }
 0x1dd   : > { %6459 = vst [vmem:[#allocation17_spill] sm:$0xff] %v5075_v23  ;;  %v1123_v60 = vmul.f32 0.044715, %v5075_v23  ;;  %v2013_v10 = vadd.f32 1.0, %v4673_v9  ;;  %v1743_v63 = vmul.f32 0.5, %v6463_v56  ;;  %3188 = vtanh.f32 %v1632_v41  ;;  %v6466_v59 = vld [vmem:[#allocation56_spill] sm:$0xff] }
 0x1de   : > { %v1249_v6 = vmul.f32 %v1121_v43, %v5068_v38  ;;  %v5085_v25 = vmul.f32 %v1997_v2, %v1741_v30  ;;  %v1759_v21 = vmul.f32 0.5, %v6464_v61  ;;  %v1999_v33 = vadd.f32 1.0, %v6465_v26  ;;  %v6467_v41 = vld [vmem:[#allocation82_spill] sm:$0xff]  ;;  %v6468_v43 = vld [vmem:[#allocation83_spill] sm:$0xff]  ;;  %v6470_v61 = vld [vmem:[#allocation85_spill] sm:$0xff] }
 0x1df   : > { %v5088_v36 = vpop.eup %3176  ;;  %v1251_v40 = vmul.f32 %v1123_v60, %v5075_v23  ;;  %v5091_v57 = vmul.f32 %v2013_v10, %v1757_v14  ;;  %v2015_v58 = vadd.f32 1.0, %v6466_v59  ;;  %v5098_v56 = vadd.f32 %v6467_v41, %v6454_v49  ;;  %v6469_v2 = vld [vmem:[#allocation27_spill] sm:$0xff] }
 0x1e0   : > { %v1377_v9 = vmul.f32 %v1249_v6, %v5068_v38  ;;  %v5102_v30 = vadd.f32 %v6468_v43, %v6454_v49  ;;  %v5106_v37 = vadd.f32 %v6470_v61, %v6469_v2  ;;  %v5108_v14 = vpop.eup %3178  ;;  %v5113_v6 = vmul.f32 %v1999_v33, %v1743_v63 }
 0x1e1   : > { %v1379_v60 = vmul.f32 %v1251_v40, %v5075_v23  ;;  %v2225_v10 = vpack.c.bf16 %v5091_v57, %v5085_v25  ;;  %v5115_v26 = vmul.f32 %v2015_v58, %v1759_v21  ;;  %v1122_v41 = vmul.f32 0.044715, %v5098_v56  ;;  %v6472_v25 = vld [vmem:[#allocation86_spill] sm:$0xff]  ;;  %v6474_v58 = vld [vmem:[#allocation87_spill] sm:$0xff] }
 0x1e2   : > { %6471 = vst [vmem:[#allocation51_spill] sm:$0xff] %v5106_v37  ;;  %v1505_v59 = vadd.f32 %v1377_v9, %v5068_v38  ;;  %v1124_v43 = vmul.f32 0.044715, %v5102_v30  ;;  %v1137_v61 = vmul.f32 0.044715, %v5106_v37  ;;  %v5126_v63 = vadd.f32 %v6472_v25, %v6469_v2 }
 0x1e3   : > { %v3181_v32 = vpop.eup %3180  ;;  %v1507_v42 = vadd.f32 %v1379_v60, %v5075_v23  ;;  %v2227_v40 = vpack.c.bf16 %v5115_v26, %v5113_v6  ;;  %v5130_v21 = vadd.f32 %v6474_v58, %v6469_v2  ;;  %3190 = vtanh.f32 %v1619_v11 }
 0x1e4   : > { %6473 = vst [vmem:[#allocation36_spill] sm:$0xff] %v5126_v63  ;;  %v5132_v57 = vpop.eup %3182  ;;  %v5135_v33 = vmul.f32 %v1236_v44, %v5028_v5  ;;  %v1998_v9 = vadd.f32 1.0, %v3181_v32  ;;  %v1744_v60 = vmul.f32 0.5, %v4479_v45  ;;  %v1760_v6 = vmul.f32 0.5, %v4567_v28 }
 0x1e5   : > { %6475 = vst [vmem:[#allocation81_spill] sm:$0xff] %v5132_v57  ;;  %v3185_v23 = vpop.eup %3184  ;;  %v1265_v26 = vmul.f32 %v1137_v61, %v5106_v37  ;;  %v1139_v25 = vmul.f32 0.044715, %v5126_v63  ;;  %v1138_v16 = vmul.f32 0.044715, %v5130_v21  ;;  %v1250_v57 = vmul.f32 %v1122_v41, %v5098_v56 }
 0x1e6   : > { %6476 = vst [vmem:[#allocation32_spill] sm:$0xff] %v5135_v33  ;;  %v2014_v58 = vadd.f32 1.0, %v3185_v23  ;;  %v1633_v38 = vmul.f32 0.7978846, %v1505_v59  ;;  %v1252_v11 = vmul.f32 %v1124_v43, %v5102_v30  ;;  %v3187_v44 = vpop.eup %3186  ;;  %v2126_v32 = vmul.f32 %v1998_v9, %v5055_v3  ;;  %v6477_v23 = vld [vmem:[#allocation22_spill] sm:$0xff]  ;;  %v6479_v3 = vld [vmem:[#allocation88_spill] sm:$0xff] }
 0x1e7   : > { %v1635_v8 = vmul.f32 0.7978846, %v1507_v42  ;;  %v1393_v45 = vmul.f32 %v1265_v26, %v5106_v37  ;;  %v1267_v28 = vmul.f32 %v1139_v25, %v5126_v63  ;;  %v3189_v49 = vpop.eup %3188  ;;  %v2000_v33 = vadd.f32 1.0, %v3187_v44  ;;  %v6480_v42 = vld [vmem:[#allocation33_spill] sm:$0xff] }
 0x1e8   : > { %v2142_v61 = vmul.f32 %v2014_v58, %v1758_v15  ;;  %v1266_v5 = vmul.f32 %v1138_v16, %v5130_v21  ;;  %v5150_v59 = vadd.f32 %v6477_v23, %v6469_v2  ;;  %v2016_v41 = vadd.f32 1.0, %v3189_v49 }
 0x1e9   : > { %v1521_v43 = vadd.f32 %v1393_v45, %v5106_v37  ;;  %v1395_v0 = vmul.f32 %v1267_v28, %v5126_v63  ;;  %v1518_v9 = vadd.f32 %v6480_v42, %v6479_v3  ;;  %v2128_v22 = vmul.f32 %v2000_v33, %v1744_v60 }
 0x1ea   : > { %6478 = vst [vmem:[#allocation35_spill] sm:$0xff] %v5150_v59  ;;  %v2226_v26 = vpack.c.bf16 %v2142_v61, %v2126_v32  ;;  %3192 = vtanh.f32 %v1633_v38  ;;  %v1140_v15 = vmul.f32 0.044715, %v5150_v59  ;;  %v2144_v25 = vmul.f32 %v2016_v41, %v1760_v6  ;;  %v6485_v61 = vld [vmem:[#allocation34_spill] sm:$0xff] }
 0x1eb   : > { %v1649_v58 = vmul.f32 0.7978846, %v1521_v43  ;;  %v1523_v16 = vadd.f32 %v1395_v0, %v5126_v63  ;;  %v1534_v44 = vadd.f32 %v4754_v46, %v4689_v12  ;;  %3194 = vtanh.f32 %v1635_v8  ;;  %v6482_v8 = vld [vmem:[#allocation90_spill] sm:$0xff] }
 0x1ec   : > { %2404 = vmatprep.subr.bf16.mxu0 %v2226_v26  ;;  %v5161_v49 = vmul.f32 %v1250_v57, %v5098_v56  ;;  %v5164_v45 = vmul.f32 %v1252_v11, %v5102_v30  ;;  %v1646_v32 = vmul.f32 0.7978846, %v1518_v9  ;;  %v2228_v33 = vpack.c.bf16 %v2144_v25, %v2128_v22  ;;  %v6483_v57 = vld [vmem:[#allocation38_spill] sm:$0xff] }
 0x1ed   : > { %2405 = vmatpush1.bf16.msra.mxu0 %v2225_v10  ;;  %v5167_v38 = vmul.f32 %v1266_v5, %v5130_v21  ;;  %v1268_v60 = vmul.f32 %v1140_v15, %v5150_v59  ;;  %v1662_v0 = vmul.f32 0.7978846, %v1534_v44  ;;  %v5170_v6 = vpop.eup %3190  ;;  %v5173_v46 = vmul.f32 0.5, %v6479_v3  ;;  %v6484_v10 = vld [vmem:[#allocation30_spill] sm:$0xff]  ;;  %v6490_v15 = vld [vmem:[#allocation93_spill] sm:$0xff] }
 0x1ee   : > { %3196 = vtanh.f32 %v1646_v32  ;;  %v1520_v28 = vadd.f32 %v6483_v57, %v6482_v8  ;;  %v1536_v11 = vadd.f32 %v4757_v31, %v4699_v35  ;;  %2457 = vmatprep.subr.bf16.mxu1 %v2228_v33  ;;  %v1651_v22 = vmul.f32 0.7978846, %v1523_v16  ;;  %v6487_v3 = vld [vmem:[#allocation26_spill] sm:$0xff]  ;;  %v6489_v31 = vld [vmem:[#allocation20_spill] sm:$0xff]  ;;  %v6492_v44 = vld [vmem:[#allocation25_spill] sm:$0xff] }
 0x1ef   : > { %6481 = vst [vmem:[#allocation89_spill] sm:$0xff] %v5167_v38  ;;  %3198 = vtanh.f32 %v1649_v58  ;;  %v1790_v5 = vmul.f32 0.5, %v4689_v12  ;;  %v5182_v23 = vadd.f32 %v6485_v61, %v6484_v10  ;;  %2458 = vmatpush1.bf16.msra.mxu1 %v2227_v40  ;;  %v5186_v42 = vadd.f32 %v6487_v3, %v6484_v10  ;;  %v6491_v58 = vld [vmem:[#allocation40_spill] sm:$0xff]  ;;  %v6493_v57 = vld [vmem:[#allocation61_spill] sm:$0xff] }
 0x1f0   : > { %3200 = vtanh.f32 %v1662_v0  ;;  %v1648_v41 = vmul.f32 0.7978846, %v1520_v28  ;;  %v1664_v43 = vmul.f32 0.7978846, %v1536_v11  ;;  %v1773_v26 = vmul.f32 0.5, %v6489_v31 }
 0x1f1   : > { %6486 = vst [vmem:[#allocation48_spill] sm:$0xff] %v5182_v23  ;;  %6488 = vst [vmem:[#allocation28_spill] sm:$0xff] %v5186_v42  ;;  %v1153_v9 = vmul.f32 0.044715, %v5182_v23  ;;  %v1789_v25 = vmul.f32 0.5, %v6490_v15  ;;  %v2029_v12 = vadd.f32 1.0, %v6491_v58 }
 0x1f2   : > { %3202 = vtanh.f32 %v1648_v41  ;;  %v1155_v16 = vmul.f32 0.044715, %v5186_v42  ;;  %v2045_v40 = vadd.f32 1.0, %v4809_v47  ;;  %v1775_v32 = vmul.f32 0.5, %v6492_v44  ;;  %v6496_v58 = vld [vmem:[#allocation39_spill] sm:$0xff] }
 0x1f3   : > { %3204 = vtanh.f32 %v1664_v43  ;;  %v1281_v33 = vmul.f32 %v1153_v9, %v5182_v23  ;;  %v5196_v0 = vmul.f32 %v2029_v12, %v1773_v26  ;;  %v1791_v28 = vmul.f32 0.5, %v6493_v57  ;;  %v6494_v43 = vld [vmem:[#allocation37_spill] sm:$0xff]  ;;  %v6495_v9 = vld [vmem:[#allocation23_spill] sm:$0xff] }
 0x1f4   : > { %v5199_v11 = vpop.eup %3192  ;;  %v1283_v61 = vmul.f32 %v1155_v16, %v5186_v42  ;;  %v5202_v3 = vmul.f32 %v2045_v40, %v1789_v25  ;;  %v2031_v41 = vadd.f32 1.0, %v4767_v1  ;;  %v2047_v31 = vadd.f32 1.0, %v4845_v54 }
 0x1f5   : > { %v1409_v47 = vmul.f32 %v1281_v33, %v5182_v23  ;;  %v5209_v15 = vadd.f32 %v6494_v43, %v6484_v10  ;;  %v5213_v26 = vadd.f32 %v6495_v9, %v6484_v10  ;;  %v5217_v12 = vadd.f32 %v6496_v58, %v6373_v62  ;;  %v5219_v25 = vpop.eup %3194 }
 0x1f6   : > { %v1411_v1 = vmul.f32 %v1283_v61, %v5186_v42  ;;  %v2241_v54 = vpack.c.bf16 %v5202_v3, %v5196_v0  ;;  %v5224_v16 = vmul.f32 %v2031_v41, %v1775_v32  ;;  %v5226_v40 = vmul.f32 %v2047_v31, %v1791_v28  ;;  %v6498_v0 = vld [vmem:[#allocation19_spill] sm:$0xff]  ;;  %v6500_v28 = vld [vmem:[#allocation24_spill] sm:$0xff] }
 0x1f7   : > { %6497 = vst [vmem:[#allocation92_spill] sm:$0xff] %v5217_v12  ;;  %v1537_v44 = vadd.f32 %v1409_v47, %v5182_v23  ;;  %v1154_v33 = vmul.f32 0.044715, %v5209_v15  ;;  %v1156_v57 = vmul.f32 0.044715, %v5213_v26  ;;  %v5237_v32 = vadd.f32 %v6498_v0, %v6373_v62 }
 0x1f8   : > { %v1045_v43 = vmul.f32 0.044715, %v5217_v12  ;;  %v3197_v9 = vpop.eup %3196  ;;  %v1539_v58 = vadd.f32 %v1411_v1, %v5186_v42  ;;  %v2243_v61 = vpack.c.bf16 %v5226_v40, %v5224_v16  ;;  %v5241_v3 = vadd.f32 %v6500_v28, %v6373_v62 }
 0x1f9   : > { %6499 = vst [vmem:[#allocation56_spill] sm:$0xff] %v5237_v32  ;;  %v5243_v41 = vpop.eup %3198  ;;  %3206 = vtanh.f32 %v1651_v22  ;;  %v5246_v31 = vmul.f32 %v1268_v60, %v5150_v59  ;;  %v2030_v47 = vadd.f32 1.0, %v3197_v9  ;;  %v1776_v1 = vmul.f32 0.5, %v6482_v8 }
 0x1fa   : > { %6501 = vst [vmem:[#allocation82_spill] sm:$0xff] %v5243_v41  ;;  %v3201_v42 = vpop.eup %3200  ;;  %v1792_v16 = vmul.f32 0.5, %v4699_v35  ;;  %v1173_v40 = vmul.f32 %v1045_v43, %v5217_v12  ;;  %v1047_v0 = vmul.f32 0.044715, %v5237_v32  ;;  %v1046_v63 = vmul.f32 0.044715, %v5241_v3 }
 0x1fb   : > { %6502 = vst [vmem:[#allocation83_spill] sm:$0xff] %v5246_v31  ;;  %v2046_v28 = vadd.f32 1.0, %v3201_v42  ;;  %v1665_v23 = vmul.f32 0.7978846, %v1537_v44  ;;  %v1282_v41 = vmul.f32 %v1154_v33, %v5209_v15  ;;  %v1284_v22 = vmul.f32 %v1156_v57, %v5213_v26  ;;  %v6503_v42 = vld [vmem:[#allocation50_spill] sm:$0xff] }
 0x1fc   : > { %v3203_v60 = vpop.eup %3202  ;;  %v2158_v9 = vmul.f32 %v2030_v47, %v5173_v46  ;;  %v1667_v37 = vmul.f32 0.7978846, %v1539_v58  ;;  %v1301_v8 = vmul.f32 %v1173_v40, %v5217_v12  ;;  %v1175_v35 = vmul.f32 %v1047_v0, %v5237_v32 }
 0x1fd   : > { %v3205_v10 = vpop.eup %3204  ;;  %v2174_v43 = vmul.f32 %v2046_v28, %v1790_v5  ;;  %v2032_v31 = vadd.f32 1.0, %v3203_v60  ;;  %v1174_v59 = vmul.f32 %v1046_v63, %v5241_v3  ;;  %v5261_v44 = vadd.f32 %v6503_v42, %v6373_v62 }
 0x1fe   : > { %v2048_v33 = vadd.f32 1.0, %v3205_v10  ;;  %v1429_v57 = vadd.f32 %v1301_v8, %v5217_v12  ;;  %v1303_v38 = vmul.f32 %v1175_v35, %v5237_v32  ;;  %v1426_v46 = vadd.f32 %v4765_v51, %v4725_v24  ;;  %v6508_v8 = vld [vmem:[#allocation49_spill] sm:$0xff] }
 0x1ff   : > { %6504 = vst [vmem:[#allocation27_spill] sm:$0xff] %v5261_v44  ;;  %v2242_v58 = vpack.c.bf16 %v2174_v43, %v2158_v9  ;;  %v2160_v47 = vmul.f32 %v2032_v31, %v1776_v1  ;;  %3208 = vtanh.f32 %v1665_v23  ;;  %v1048_v5 = vmul.f32 0.044715, %v5261_v44  ;;  %v6507_v9 = vld [vmem:[#allocation11_spill] sm:$0xff] }
 0x200   : > { %v2176_v40 = vmul.f32 %v2048_v33, %v1792_v16  ;;  %v1557_v0 = vmul.f32 0.7978846, %v1429_v57  ;;  %v1431_v63 = vadd.f32 %v1303_v38, %v5237_v32  ;;  %v1442_v62 = vadd.f32 %v4910_v20, %v4839_v39  ;;  %v6511_v33 = vld [vmem:[#allocation91_spill] sm:$0xff] }
 0x201   : > { %2406 = vmatprep.subr.bf16.mxu0 %v2242_v58  ;;  %3210 = vtanh.f32 %v1667_v37  ;;  %v5272_v10 = vmul.f32 %v1282_v41, %v5209_v15  ;;  %v5275_v28 = vmul.f32 %v1284_v22, %v5213_v26  ;;  %v1554_v51 = vmul.f32 0.7978846, %v1426_v46  ;;  %v6505_v37 = vld [vmem:[#allocation60_spill] sm:$0xff]  ;;  %v6506_v41 = vld [vmem:[#allocation46_spill] sm:$0xff] }
 0x202   : > { %v2244_v31 = vpack.c.bf16 %v2176_v40, %v2160_v47  ;;  %2407 = vmatpush1.bf16.msra.mxu0 %v2241_v54  ;;  %v5278_v23 = vmul.f32 %v1174_v59, %v5241_v3  ;;  %v1176_v1 = vmul.f32 %v1048_v5, %v5261_v44  ;;  %v1570_v38 = vmul.f32 0.7978846, %v1442_v62  ;;  %v6513_v46 = vld [vmem:[#allocation62_spill] sm:$0xff]  ;;  %v6515_v5 = vld [vmem:[#allocation59_spill] sm:$0xff] }
 0x203   : > { %v5281_v16 = vpop.eup %3206  ;;  %v5284_v20 = vmul.f32 0.5, %v4725_v24  ;;  %3212 = vtanh.f32 %v1554_v51  ;;  %v1428_v60 = vadd.f32 %v6506_v41, %v6505_v37  ;;  %v1444_v22 = vadd.f32 %v4913_v13, %v4843_v48  ;;  %v6510_v24 = vld [vmem:[#allocation66_spill] sm:$0xff]  ;;  %v6517_v62 = vld [vmem:[#allocation31_spill] sm:$0xff]  ;;  %v6518_v41 = vld [vmem:[#allocation69_spill] sm:$0xff] }
 0x204   : > { %2459 = vmatprep.subr.bf16.mxu1 %v2244_v31  ;;  %3214 = vtanh.f32 %v1557_v0  ;;  %v1559_v54 = vmul.f32 0.7978846, %v1431_v63  ;;  %v5291_v59 = vmul.f32 0.5, %v4839_v39  ;;  %v5295_v35 = vadd.f32 %v6508_v8, %v6507_v9  ;;  %v6514_v58 = vld [vmem:[#allocation10_spill] sm:$0xff] }
 0x205   : > { %2460 = vmatpush1.bf16.msra.mxu1 %v2243_v61  ;;  %2941 = vmatmul.mubr.msk.bf16.vlgmr.msra.gmra.mrb[72].mxu0 %vm2287_vm1, %v6510_v24  ;;  %3216 = vtanh.f32 %v1570_v38  ;;  %v1556_v43 = vmul.f32 0.7978846, %v1428_v60  ;;  %v1572_v42 = vmul.f32 0.7978846, %v1444_v22  ;;  %v5301_v13 = vadd.f32 %v6511_v33, %v6507_v9 }
 0x206   : > { %6509 = vst [vmem:[#allocation85_spill] sm:$0xff] %v5295_v35  ;;  %v1061_v57 = vmul.f32 0.044715, %v5295_v35  ;;  %v1681_v39 = vmul.f32 0.5, %v6513_v46  ;;  %v1697_v47 = vmul.f32 0.5, %v6514_v58  ;;  %v1937_v40 = vadd.f32 1.0, %v6515_v5 }
 0x207   : > { %6512 = vst [vmem:[#allocation86_spill] sm:$0xff] %v5301_v13  ;;  %v6516_v0 = vmov 0   ;;  %3218 = vtanh.f32 %v1556_v43  ;;  %v1063_v61 = vmul.f32 0.044715, %v5301_v13  ;;  %v1953_v63 = vadd.f32 1.0, %v4987_v55  ;;  %v6520_v46 = vld [vmem:[#allocation54_spill] sm:$0xff] }
 0x208   : > { %2442 = vmatprep.mubr.bf16.mxu0 %v6516_v0  ;;  %v1683_v51 = vmul.f32 0.5, %v6517_v62  ;;  %2943 = vmatmul.mubr.msk.bf16.vlgmr.msra.gmra.mrb[72].mxu1 %vm2287_vm1, %v6510_v24  ;;  %3220 = vtanh.f32 %v1572_v42  ;;  %v1189_v31 = vmul.f32 %v1061_v57, %v5295_v35  ;;  %v5314_v38 = vmul.f32 %v1937_v40, %v1681_v39  ;;  %v6519_v42 = vld [vmem:[#allocation42_spill] sm:$0xff]  ;;  %v6521_v58 = vld [vmem:[#allocation12_spill] sm:$0xff] }
 0x209   : > { %v1699_v60 = vmul.f32 0.5, %v6518_v41  ;;  %v5317_v22 = vpop.eup %3208  ;;  %v1191_v8 = vmul.f32 %v1063_v61, %v5301_v13  ;;  %v5320_v43 = vmul.f32 %v1953_v63, %v1697_v47  ;;  %v1939_v55 = vadd.f32 1.0, %v4922_v53  ;;  %2495 = vmatprep.mubr.bf16.mxu1 %v6516_v0  ;;  %v6522_v5 = vld [vmem:[#allocation94_spill] sm:$0xff] }
 0x20a   : > { %v1955_v33 = vadd.f32 1.0, %v4996_v4  ;;  %v1317_v24 = vmul.f32 %v1189_v31, %v5295_v35  ;;  %v5328_v57 = vadd.f32 %v6519_v42, %v6507_v9  ;;  %v5332_v39 = vadd.f32 %v6520_v46, %v6507_v9 }
 0x20b   : > { %v5336_v47 = vadd.f32 %v6522_v5, %v6521_v58  ;;  %v5338_v40 = vpop.eup %3210  ;;  %v1319_v53 = vmul.f32 %v1191_v8, %v5301_v13  ;;  %v2197_v4 = vpack.c.bf16 %v5320_v43, %v5314_v38  ;;  %v5343_v61 = vmul.f32 %v1939_v55, %v1683_v51  ;;  %v6524_v5 = vld [vmem:[#allocation57_spill] sm:$0xff]  ;;  %v6525_v51 = vld [vmem:[#allocation95_spill] sm:$0xff] }
 0x20c   : > { %v5345_v63 = vmul.f32 %v1955_v33, %v1699_v60  ;;  %v1445_v62 = vadd.f32 %v1317_v24, %v5295_v35  ;;  %v1062_v9 = vmul.f32 0.044715, %v5328_v57  ;;  %v1064_v31 = vmul.f32 0.044715, %v5332_v39  ;;  %v6527_v60 = vld [vmem:[#allocation29_spill] sm:$0xff] }
 0x20d   : > { %6523 = vst [vmem:[#allocation87_spill] sm:$0xff] %v5336_v47  ;;  %v1077_v41 = vmul.f32 0.044715, %v5336_v47  ;;  %v3213_v42 = vpop.eup %3212  ;;  %v1447_v46 = vadd.f32 %v1319_v53, %v5301_v13  ;;  %2942 = vmatmul.mubr.msk.bf16.gmra.mrb[76].mxu0 %vm2287_vm1, %v6524_v5  ;;  %v5358_v38 = vadd.f32 %v6525_v51, %v6521_v58  ;;  %v5362_v43 = vadd.f32 %v6527_v60, %v6521_v58 }
 0x20e   : > { %v5364_v55 = vpop.eup %3214  ;;  %3222 = vtanh.f32 %v1559_v54  ;;  %v5367_v33 = vmul.f32 %v1176_v1, %v5261_v44  ;;  %v1938_v24 = vadd.f32 1.0, %v3213_v42  ;;  %v1684_v53 = vmul.f32 0.5, %v6505_v37  ;;  %2538 = vmatprep.mubr.bf16.mxu0 %v6516_v0 }
 0x20f   : > { %6526 = vst [vmem:[#allocation22_spill] sm:$0xff] %v5358_v38  ;;  %6528 = vst [vmem:[#allocation88_spill] sm:$0xff] %v5364_v55  ;;  %v3217_v8 = vpop.eup %3216  ;;  %v1700_v13 = vmul.f32 0.5, %v4843_v48  ;;  %v1205_v51 = vmul.f32 %v1077_v41, %v5336_v47  ;;  %v1079_v32 = vmul.f32 0.044715, %v5358_v38  ;;  %v1190_v54 = vmul.f32 %v1062_v9, %v5328_v57 }
 0x210   : > { %6529 = vst [vmem:[#allocation33_spill] sm:$0xff] %v5367_v33  ;;  %v1078_v60 = vmul.f32 0.044715, %v5362_v43  ;;  %v1954_v35 = vadd.f32 1.0, %v3217_v8  ;;  %v1573_v55 = vmul.f32 0.7978846, %v1445_v62  ;;  %v1192_v1 = vmul.f32 %v1064_v31, %v5332_v39  ;;  %2944 = vmatmul.mubr.msk.bf16.gmra.mrb[76].mxu1 %vm2287_vm1, %v6524_v5 }
 0x211   : > { %v3219_v37 = vpop.eup %3218  ;;  %v2066_v42 = vmul.f32 %v1938_v24, %v5284_v20  ;;  %v1575_v12 = vmul.f32 0.7978846, %v1447_v46  ;;  %v1333_v48 = vmul.f32 %v1205_v51, %v5336_v47  ;;  %v1207_v41 = vmul.f32 %v1079_v32, %v5358_v38  ;;  %2591 = vmatprep.mubr.bf16.mxu1 %v6516_v0  ;;  %v6530_v31 = vld [vmem:[#allocation96_spill] sm:$0xff] }
 0x212   : > { %v3221_v33 = vpop.eup %3220  ;;  %v2082_v62 = vmul.f32 %v1954_v35, %v5291_v59  ;;  %v1940_v8 = vadd.f32 1.0, %v3219_v37  ;;  %v1206_v9 = vmul.f32 %v1078_v60, %v5362_v43  ;;  %v5387_v44 = vadd.f32 %v6530_v31, %v6521_v58 }
 0x213   : > { %v1956_v5 = vadd.f32 1.0, %v3221_v33  ;;  %v1461_v20 = vadd.f32 %v1333_v48, %v5336_v47  ;;  %v1335_v46 = vmul.f32 %v1207_v41, %v5358_v38  ;;  %v1458_v32 = vadd.f32 %v4916_v27, %v4885_v7 }
 0x214   : > { %v2198_v24 = vpack.c.bf16 %v2082_v62, %v2066_v42  ;;  %v2068_v51 = vmul.f32 %v1940_v8, %v1684_v53  ;;  %3224 = vtanh.f32 %v1573_v55  ;;  %v1080_v59 = vmul.f32 0.044715, %v5387_v44  ;;  %v6532_v8 = vld [vmem:[#allocation15_spill] sm:$0xff] }
 0x215   : > { %v2084_v35 = vmul.f32 %v1956_v5, %v1700_v13  ;;  %v1589_v37 = vmul.f32 0.7978846, %v1461_v20  ;;  %v1463_v60 = vadd.f32 %v1335_v46, %v5358_v38  ;;  %v1474_v58 = vadd.f32 %v5039_v52, %v4977_v18  ;;  %v6536_v46 = vld [vmem:[#allocation65_spill] sm:$0xff] }
 0x216   : > { %2506 = vmatprep.subr.bf16.mxu0 %v2198_v24  ;;  %3226 = vtanh.f32 %v1575_v12  ;;  %v5398_v33 = vmul.f32 %v1190_v54, %v5328_v57  ;;  %v5401_v48 = vmul.f32 %v1192_v1, %v5332_v39  ;;  %v1586_v27 = vmul.f32 0.7978846, %v1458_v32  ;;  %v6531_v12 = vld [vmem:[#allocation77_spill] sm:$0xff]  ;;  %v6538_v24 = vld [vmem:[#allocation43_spill] sm:$0xff] }
 0x217   : > { %v2200_v53 = vpack.c.bf16 %v2084_v35, %v2068_v51  ;;  %2507 = vmatpush1.bf16.msra.mxu0 %v2197_v4  ;;  %v5404_v55 = vmul.f32 %v1206_v9, %v5362_v43  ;;  %v1208_v13 = vmul.f32 %v1080_v59, %v5387_v44  ;;  %v1602_v42 = vmul.f32 0.7978846, %v1474_v58  ;;  %v6533_v9 = vld [vmem:[#allocation64_spill] sm:$0xff]  ;;  %v6540_v35 = vld [vmem:[#allocation67_spill] sm:$0xff] }
 0x218   : > { %v5407_v41 = vpop.eup %3222  ;;  %v5410_v52 = vmul.f32 0.5, %v4885_v7  ;;  %3228 = vtanh.f32 %v1586_v27  ;;  %v1460_v54 = vadd.f32 %v6531_v12, %v4891_v50  ;;  %v1476_v1 = vadd.f32 %v5042_v19, %v4981_v17 }
 0x219   : > { %2559 = vmatprep.subr.bf16.mxu1 %v2200_v53  ;;  %3230 = vtanh.f32 %v1589_v37  ;;  %v1591_v4 = vmul.f32 0.7978846, %v1463_v60  ;;  %v1730_v62 = vmul.f32 0.5, %v4977_v18  ;;  %v5419_v31 = vadd.f32 %v6533_v9, %v6532_v8  ;;  %v6539_v18 = vld [vmem:[#allocation73_spill] sm:$0xff] }
 0x21a   : > { %v6535_v7 = vpack.c.bf16 %v5345_v63, %v5343_v61  ;;  %3232 = vtanh.f32 %v1602_v42  ;;  %v1588_v5 = vmul.f32 0.7978846, %v1460_v54  ;;  %v1604_v20 = vmul.f32 0.7978846, %v1476_v1  ;;  %v6541_v63 = vld [vmem:[#allocation58_spill] sm:$0xff]  ;;  %v6542_v42 = vld [vmem:[#allocation79_spill] sm:$0xff] }
 0x21b   : > { %6534 = vst [vmem:[#allocation90_spill] sm:$0xff] %v5419_v31  ;;  %v5426_v32 = vadd.f32 %v6536_v46, %v6532_v8  ;;  %v1093_v19 = vmul.f32 0.044715, %v5419_v31  ;;  %v1713_v51 = vmul.f32 0.5, %v6538_v24  ;;  %v1729_v59 = vmul.f32 0.5, %v6539_v18 }
 0x21c   : > { %2560 = vmatpush1.bf16.msra.mxu1 %v6535_v7  ;;  %v1969_v37 = vadd.f32 1.0, %v6540_v35  ;;  %3234 = vtanh.f32 %v1588_v5  ;;  %v1985_v61 = vadd.f32 1.0, %v5088_v36  ;;  %v1715_v58 = vmul.f32 0.5, %v6541_v63 }
 0x21d   : > { %6537 = vst [vmem:[#allocation38_spill] sm:$0xff] %v5426_v32  ;;  %v1095_v60 = vmul.f32 0.044715, %v5426_v32  ;;  %3236 = vtanh.f32 %v1604_v20  ;;  %v1221_v27 = vmul.f32 %v1093_v19, %v5419_v31  ;;  %v1731_v12 = vmul.f32 0.5, %v6542_v42  ;;  %v6543_v20 = vld [vmem:[#allocation70_spill] sm:$0xff]  ;;  %v6544_v19 = vld [vmem:[#allocation71_spill] sm:$0xff] }
 0x21e   : > { %v5436_v53 = vmul.f32 %v1969_v37, %v1713_v51  ;;  %v5439_v54 = vpop.eup %3224  ;;  %v5442_v9 = vmul.f32 %v1985_v61, %v1729_v59  ;;  %v1971_v7 = vadd.f32 1.0, %v5052_v29  ;;  %v1987_v5 = vadd.f32 1.0, %v5108_v14  ;;  %v6545_v51 = vld [vmem:[#allocation72_spill] sm:$0xff] }
 0x21f   : > { %v1223_v1 = vmul.f32 %v1095_v60, %v5426_v32  ;;  %v1349_v36 = vmul.f32 %v1221_v27, %v5419_v31  ;;  %v5449_v46 = vadd.f32 %v6543_v20, %v6532_v8  ;;  %v5453_v24 = vadd.f32 %v6544_v19, %v6532_v8 }
 0x220   : > { %v5457_v18 = vadd.f32 %v6545_v51, %v6438_v34  ;;  %v5459_v59 = vpop.eup %3226  ;;  %v2213_v14 = vpack.c.bf16 %v5442_v9, %v5436_v53  ;;  %v5464_v35 = vmul.f32 %v1971_v7, %v1715_v58  ;;  %v5466_v37 = vmul.f32 %v1987_v5, %v1731_v12  ;;  %v6547_v53 = vld [vmem:[#allocation52_spill] sm:$0xff]  ;;  %v6549_v12 = vld [vmem:[#allocation55_spill] sm:$0xff] }
 0x221   : > { %v1351_v29 = vmul.f32 %v1223_v1, %v5426_v32  ;;  %v1477_v60 = vadd.f32 %v1349_v36, %v5419_v31  ;;  %v1094_v8 = vmul.f32 0.044715, %v5449_v46  ;;  %v1096_v61 = vmul.f32 0.044715, %v5453_v24 }
 0x222   : > { %6546 = vst [vmem:[#allocation34_spill] sm:$0xff] %v5457_v18  ;;  %v1109_v63 = vmul.f32 0.044715, %v5457_v18  ;;  %v3229_v27 = vpop.eup %3228  ;;  %v2215_v1 = vpack.c.bf16 %v5466_v37, %v5464_v35  ;;  %v5477_v58 = vadd.f32 %v6547_v53, %v6438_v34  ;;  %v5481_v9 = vadd.f32 %v6549_v12, %v6438_v34 }
 0x223   : > { %v1479_v42 = vadd.f32 %v1351_v29, %v5426_v32  ;;  %v5483_v7 = vpop.eup %3230  ;;  %3238 = vtanh.f32 %v1591_v4  ;;  %v5486_v5 = vmul.f32 %v1208_v13, %v5387_v44  ;;  %v1970_v36 = vadd.f32 1.0, %v3229_v27 }
 0x224   : > { %6548 = vst [vmem:[#allocation26_spill] sm:$0xff] %v5477_v58  ;;  %6550 = vst [vmem:[#allocation20_spill] sm:$0xff] %v5483_v7  ;;  %v1716_v20 = vmul.f32 0.5, %v4891_v50  ;;  %v3233_v19 = vpop.eup %3232  ;;  %v1732_v51 = vmul.f32 0.5, %v4981_v17  ;;  %v1237_v29 = vmul.f32 %v1109_v63, %v5457_v18  ;;  %v1111_v35 = vmul.f32 0.044715, %v5477_v58 }
 0x225   : > { %6551 = vst [vmem:[#allocation93_spill] sm:$0xff] %v5486_v5  ;;  %v1110_v37 = vmul.f32 0.044715, %v5481_v9  ;;  %v1986_v53 = vadd.f32 1.0, %v3233_v19  ;;  %v1605_v12 = vmul.f32 0.7978846, %v1477_v60  ;;  %v1222_v32 = vmul.f32 %v1094_v8, %v5449_v46 }
 0x226   : > { %v1224_v4 = vmul.f32 %v1096_v61, %v5453_v24  ;;  %v3235_v13 = vpop.eup %3234  ;;  %v2098_v27 = vmul.f32 %v1970_v36, %v5410_v52  ;;  %v1607_v38 = vmul.f32 0.7978846, %v1479_v42  ;;  %v1365_v50 = vmul.f32 %v1237_v29, %v5457_v18  ;;  %v6552_v19 = vld [vmem:[#allocation53_spill] sm:$0xff]  ;;  %v6555_v42 = vld [vmem:[#allocation80_spill] sm:$0xff] }
 0x227   : > { %v1239_v17 = vmul.f32 %v1111_v35, %v5477_v58  ;;  %v3237_v7 = vpop.eup %3236  ;;  %v2114_v63 = vmul.f32 %v1986_v53, %v1730_v62  ;;  %v1972_v31 = vadd.f32 1.0, %v3235_v13  ;;  %v1238_v47 = vmul.f32 %v1110_v37, %v5481_v9  ;;  %v6554_v52 = vld [vmem:[#allocation45_spill] sm:$0xff] }
 0x228   : > { %v5501_v60 = vadd.f32 %v6552_v19, %v6438_v34  ;;  %v1988_v8 = vadd.f32 1.0, %v3237_v7  ;;  %v1493_v61 = vadd.f32 %v1365_v50, %v5457_v18  ;;  %v1490_v36 = vadd.f32 %v6555_v42, %v6554_v52 }
 0x229   : > { %v1367_v0 = vmul.f32 %v1239_v17, %v5477_v58  ;;  %v2214_v29 = vpack.c.bf16 %v2114_v63, %v2098_v27  ;;  %v2100_v5 = vmul.f32 %v1972_v31, %v1716_v20  ;;  %3240 = vtanh.f32 %v1605_v12  ;;  %v6559_v17 = vld [vmem:[#allocation75_spill] sm:$0xff] }
 0x22a   : > { %6553 = vst [vmem:[#allocation40_spill] sm:$0xff] %v5501_v60  ;;  %v1112_v62 = vmul.f32 0.044715, %v5501_v60  ;;  %v2116_v35 = vmul.f32 %v1988_v8, %v1732_v51  ;;  %v1621_v53 = vmul.f32 0.7978846, %v1493_v61  ;;  %v1506_v34 = vadd.f32 %v5161_v49, %v5098_v56  ;;  %v6561_v61 = vld [vmem:[#allocation76_spill] sm:$0xff] }
 0x22b   : > { %v1495_v37 = vadd.f32 %v1367_v0, %v5477_v58  ;;  %2508 = vmatprep.subr.bf16.mxu0 %v2214_v29  ;;  %3242 = vtanh.f32 %v1607_v38  ;;  %v5512_v7 = vmul.f32 %v1222_v32, %v5449_v46  ;;  %v5515_v13 = vmul.f32 %v1224_v4, %v5453_v24  ;;  %v6556_v38 = vld [vmem:[#allocation47_spill] sm:$0xff]  ;;  %v6557_v32 = vld [vmem:[#allocation32_spill] sm:$0xff]  ;;  %v6564_v29 = vld [vmem:[#allocation14_spill] sm:$0xff] }
 0x22c   : > { %v1618_v27 = vmul.f32 0.7978846, %v1490_v36  ;;  %v2216_v31 = vpack.c.bf16 %v2116_v35, %v2100_v5  ;;  %2509 = vmatpush1.bf16.msra.mxu0 %v2213_v14  ;;  %v5518_v20 = vmul.f32 %v1238_v47, %v5481_v9  ;;  %v1240_v51 = vmul.f32 %v1112_v62, %v5501_v60  ;;  %v6558_v5 = vld [vmem:[#allocation21_spill] sm:$0xff] }
 0x22d   : > { %v1634_v0 = vmul.f32 0.7978846, %v1506_v34  ;;  %v5521_v12 = vpop.eup %3238  ;;  %v5524_v49 = vmul.f32 0.5, %v6554_v52  ;;  %v1492_v50 = vadd.f32 %v6557_v32, %v6556_v38  ;;  %v1508_v4 = vadd.f32 %v5164_v45, %v5102_v30  ;;  %v6563_v45 = vld [vmem:[#allocation63_spill] sm:$0xff]  ;;  %v6565_v35 = vld [vmem:[#allocation81_spill] sm:$0xff] }
 0x22e   : > { %3244 = vtanh.f32 %v1618_v27  ;;  %2561 = vmatprep.subr.bf16.mxu1 %v2216_v31  ;;  %v1623_v14 = vmul.f32 0.7978846, %v1495_v37  ;;  %v1762_v47 = vmul.f32 0.5, %v5098_v56  ;;  %v5533_v63 = vadd.f32 %v6559_v17, %v6558_v5  ;;  %v6566_v37 = vld [vmem:[#allocation44_spill] sm:$0xff] }
 0x22f   : > { %3246 = vtanh.f32 %v1621_v53  ;;  %2562 = vmatpush1.bf16.msra.mxu1 %v2215_v1  ;;  %v1620_v19 = vmul.f32 0.7978846, %v1492_v50  ;;  %v1636_v8 = vmul.f32 0.7978846, %v1508_v4  ;;  %v5537_v52 = vadd.f32 %v6561_v61, %v6558_v5 }
 0x230   : > { %6560 = vst [vmem:[#allocation25_spill] sm:$0xff] %v5533_v63  ;;  %3248 = vtanh.f32 %v1634_v0  ;;  %v1125_v42 = vmul.f32 0.044715, %v5533_v63  ;;  %v1745_v36 = vmul.f32 0.5, %v6563_v45  ;;  %v1761_v62 = vmul.f32 0.5, %v6564_v29  ;;  %v6567_v0 = vld [vmem:[#allocation17_spill] sm:$0xff] }
 0x231   : > { %6562 = vst [vmem:[#allocation61_spill] sm:$0xff] %v5537_v52  ;;  %v2001_v56 = vadd.f32 1.0, %v6565_v35  ;;  %3250 = vtanh.f32 %v1620_v19  ;;  %v1127_v53 = vmul.f32 0.044715, %v5537_v52  ;;  %v2017_v1 = vadd.f32 1.0, %v5199_v11  ;;  %v6570_v29 = vld [vmem:[#allocation84_spill] sm:$0xff] }
 0x232   : > { %v1747_v34 = vmul.f32 0.5, %v6566_v37  ;;  %3252 = vtanh.f32 %v1636_v8  ;;  %v1253_v27 = vmul.f32 %v1125_v42, %v5533_v63  ;;  %v1763_v32 = vmul.f32 0.5, %v6567_v0  ;;  %v6568_v8 = vld [vmem:[#allocation68_spill] sm:$0xff]  ;;  %v6569_v42 = vld [vmem:[#allocation74_spill] sm:$0xff] }
 0x233   : > { %v5547_v31 = vmul.f32 %v2001_v56, %v1745_v36  ;;  %v5550_v50 = vpop.eup %3240  ;;  %v1255_v4 = vmul.f32 %v1127_v53, %v5537_v52  ;;  %v5553_v17 = vmul.f32 %v2017_v1, %v1761_v62  ;;  %v2003_v19 = vadd.f32 1.0, %v5170_v6 }
 0x234   : > { %v2019_v61 = vadd.f32 1.0, %v5219_v25  ;;  %v1381_v11 = vmul.f32 %v1253_v27, %v5533_v63  ;;  %v5560_v45 = vadd.f32 %v6568_v8, %v6558_v5  ;;  %v5564_v36 = vadd.f32 %v6569_v42, %v6558_v5 }
 0x235   : > { %v5568_v35 = vadd.f32 %v6570_v29, %v6469_v2  ;;  %v5570_v62 = vpop.eup %3242  ;;  %v1383_v6 = vmul.f32 %v1255_v4, %v5537_v52  ;;  %v2229_v25 = vpack.c.bf16 %v5553_v17, %v5547_v31  ;;  %v5575_v56 = vmul.f32 %v2003_v19, %v1747_v34  ;;  %v6571_v31 = vld [vmem:[#allocation78_spill] sm:$0xff] }
 0x236   : > { %v5577_v53 = vmul.f32 %v2019_v61, %v1763_v32  ;;  %v1509_v1 = vadd.f32 %v1381_v11, %v5533_v63  ;;  %v1126_v5 = vmul.f32 0.044715, %v5560_v45  ;;  %v1128_v37 = vmul.f32 0.044715, %v5564_v36  ;;  %v6573_v32 = vld [vmem:[#allocation97_spill] sm:$0xff] }
 0x237   : > { %v1141_v27 = vmul.f32 0.044715, %v5568_v35  ;;  %v1511_v8 = vadd.f32 %v1383_v6, %v5537_v52  ;;  %v5588_v34 = vadd.f32 %v6571_v31, %v6469_v2  ;;  %v5592_v17 = vadd.f32 %v6573_v32, %v6469_v2 }
 0x238   : > { %v3245_v0 = vpop.eup %3244  ;;  %v2231_v4 = vpack.c.bf16 %v5577_v53, %v5575_v56  ;;  %3254 = vtanh.f32 %v1623_v14  ;;  %v5597_v61 = vmul.f32 %v1240_v51, %v5501_v60  ;;  %v1748_v42 = vmul.f32 0.5, %v6556_v38 }
 0x239   : > { %6572 = vst [vmem:[#allocation37_spill] sm:$0xff] %v5588_v34  ;;  %v5594_v19 = vpop.eup %3246  ;;  %v2002_v11 = vadd.f32 1.0, %v3245_v0  ;;  %v1764_v6 = vmul.f32 0.5, %v5102_v30  ;;  %v1269_v56 = vmul.f32 %v1141_v27, %v5568_v35  ;;  %v1143_v53 = vmul.f32 0.044715, %v5588_v34 }
 0x23a   : > { %6574 = vst [vmem:[#allocation23_spill] sm:$0xff] %v5594_v19  ;;  %6575 = vst [vmem:[#allocation39_spill] sm:$0xff] %v5597_v61  ;;  %v3249_v29 = vpop.eup %3248  ;;  %v1142_v31 = vmul.f32 0.044715, %v5592_v17  ;;  %v1637_v52 = vmul.f32 0.7978846, %v1509_v1  ;;  %v1254_v58 = vmul.f32 %v1126_v5, %v5560_v45  ;;  %v1256_v14 = vmul.f32 %v1128_v37, %v5564_v36 }
 0x23b   : > { %v2018_v32 = vadd.f32 1.0, %v3249_v29  ;;  %v3251_v51 = vpop.eup %3250  ;;  %v2130_v0 = vmul.f32 %v2002_v11, %v5524_v49  ;;  %v1639_v19 = vmul.f32 0.7978846, %v1511_v8  ;;  %v1397_v38 = vmul.f32 %v1269_v56, %v5568_v35  ;;  %v6576_v29 = vld [vmem:[#allocation98_spill] sm:$0xff]  ;;  %v6577_v49 = vld [vmem:[#allocation89_spill] sm:$0xff] }
 0x23c   : > { %v1271_v30 = vmul.f32 %v1143_v53, %v5588_v34  ;;  %v3253_v63 = vpop.eup %3252  ;;  %v2004_v18 = vadd.f32 1.0, %v3251_v51  ;;  %v1270_v61 = vmul.f32 %v1142_v31, %v5592_v17  ;;  %v5612_v1 = vadd.f32 %v6576_v29, %v6469_v2 }
 0x23d   : > { %v2146_v27 = vmul.f32 %v2018_v32, %v1762_v47  ;;  %v2020_v5 = vadd.f32 1.0, %v3253_v63  ;;  %v1525_v37 = vadd.f32 %v1397_v38, %v5568_v35  ;;  %v1522_v8 = vadd.f32 %v6577_v49, %v5130_v21 }
 0x23e   : > { %v1399_v60 = vmul.f32 %v1271_v30, %v5588_v34  ;;  %v2132_v56 = vmul.f32 %v2004_v18, %v1748_v42  ;;  %3256 = vtanh.f32 %v1637_v52  ;;  %v1144_v47 = vmul.f32 0.044715, %v5612_v1  ;;  %v6580_v30 = vld [vmem:[#allocation30_spill] sm:$0xff] }
 0x23f   : > { %v2230_v11 = vpack.c.bf16 %v2146_v27, %v2130_v0  ;;  %v2148_v53 = vmul.f32 %v2020_v5, %v1764_v6  ;;  %v1653_v32 = vmul.f32 0.7978846, %v1525_v37  ;;  %v1538_v2 = vadd.f32 %v5272_v10, %v5209_v15  ;;  %v6581_v27 = vld [vmem:[#allocation13_spill] sm:$0xff]  ;;  %v6583_v37 = vld [vmem:[#allocation18_spill] sm:$0xff] }
 0x240   : > { %v1527_v31 = vadd.f32 %v1399_v60, %v5588_v34  ;;  %3258 = vtanh.f32 %v1639_v19  ;;  %v5623_v63 = vmul.f32 %v1254_v58, %v5560_v45  ;;  %v5626_v51 = vmul.f32 %v1256_v14, %v5564_v36  ;;  %v6578_v58 = vld [vmem:[#allocation35_spill] sm:$0xff]  ;;  %v6596_v34 = vld [vmem:[#allocation85_spill] sm:$0xff] }
 0x241   : > { %2510 = vmatprep.subr.bf16.mxu0 %v2230_v11  ;;  %v1650_v0 = vmul.f32 0.7978846, %v1522_v8  ;;  %v2232_v18 = vpack.c.bf16 %v2148_v53, %v2132_v56  ;;  %v5629_v52 = vmul.f32 %v1270_v61, %v5592_v17  ;;  %v1272_v42 = vmul.f32 %v1144_v47, %v5612_v1  ;;  %v6579_v19 = vld [vmem:[#allocation83_spill] sm:$0xff]  ;;  %v6586_v56 = vld [vmem:[#allocation48_spill] sm:$0xff] }
 0x242   : > { %2511 = vmatpush1.bf16.msra.mxu0 %v2229_v25  ;;  %v1666_v60 = vmul.f32 0.7978846, %v1538_v2  ;;  %v5632_v6 = vpop.eup %3254  ;;  %v5635_v10 = vmul.f32 0.5, %v5130_v21  ;;  %v1524_v38 = vadd.f32 %v6579_v19, %v6578_v58  ;;  %v1540_v14 = vadd.f32 %v5275_v28, %v5213_v26  ;;  %v6585_v8 = vld [vmem:[#allocation51_spill] sm:$0xff] }
 0x243   : > { %3260 = vtanh.f32 %v1650_v0  ;;  %2563 = vmatprep.subr.bf16.mxu1 %v2232_v18  ;;  %v1655_v25 = vmul.f32 0.7978846, %v1527_v31  ;;  %v5642_v61 = vmul.f32 0.5, %v5209_v15  ;;  %v5646_v29 = vadd.f32 %v6581_v27, %v6580_v30  ;;  %v6587_v15 = vld [vmem:[#allocation82_spill] sm:$0xff]  ;;  %v6588_v31 = vld [vmem:[#allocation36_spill] sm:$0xff] }
 0x244   : > { %3262 = vtanh.f32 %v1653_v32  ;;  %2564 = vmatpush1.bf16.msra.mxu1 %v2231_v4  ;;  %v1652_v21 = vmul.f32 0.7978846, %v1524_v38  ;;  %v1668_v5 = vmul.f32 0.7978846, %v1540_v14  ;;  %v5650_v49 = vadd.f32 %v6583_v37, %v6580_v30 }
 0x245   : > { %6582 = vst [vmem:[#allocation19_spill] sm:$0xff] %v5646_v29  ;;  %3264 = vtanh.f32 %v1666_v60  ;;  %v1157_v28 = vmul.f32 0.044715, %v5646_v29  ;;  %v1777_v11 = vmul.f32 0.5, %v6585_v8  ;;  %v1793_v47 = vmul.f32 0.5, %v6586_v56  ;;  %v6589_v60 = vld [vmem:[#allocation28_spill] sm:$0xff] }
 0x246   : > { %6584 = vst [vmem:[#allocation24_spill] sm:$0xff] %v5650_v49  ;;  %v2033_v53 = vadd.f32 1.0, %v6587_v15  ;;  %3266 = vtanh.f32 %v1652_v21  ;;  %v1159_v32 = vmul.f32 0.044715, %v5650_v49  ;;  %v2049_v4 = vadd.f32 1.0, %v5317_v22 }
 0x247   : > { %v1779_v2 = vmul.f32 0.5, %v6588_v31  ;;  %3268 = vtanh.f32 %v1668_v5  ;;  %v1285_v0 = vmul.f32 %v1157_v28, %v5646_v29  ;;  %v1795_v19 = vmul.f32 0.5, %v6589_v60  ;;  %v6590_v5 = vld [vmem:[#allocation16_spill] sm:$0xff]  ;;  %v6591_v28 = vld [vmem:[#allocation41_spill] sm:$0xff] }
 0x248   : > { %v5660_v18 = vmul.f32 %v2033_v53, %v1777_v11  ;;  %v5663_v38 = vpop.eup %3256  ;;  %v1287_v14 = vmul.f32 %v1159_v32, %v5650_v49  ;;  %v5666_v27 = vmul.f32 %v2049_v4, %v1793_v47  ;;  %v2035_v21 = vadd.f32 1.0, %v5281_v16 }
 0x249   : > { %v2051_v37 = vadd.f32 1.0, %v5338_v40  ;;  %v1413_v22 = vmul.f32 %v1285_v0, %v5646_v29  ;;  %v5673_v8 = vadd.f32 %v6590_v5, %v6580_v30  ;;  %v5677_v11 = vadd.f32 %v6591_v28, %v6580_v30 }
 0x24a   : > { %v1430_v56 = vadd.f32 %v5278_v23, %v5241_v3  ;;  %v5681_v15 = vpop.eup %3258  ;;  %v1415_v47 = vmul.f32 %v1287_v14, %v5650_v49  ;;  %v2245_v16 = vpack.c.bf16 %v5666_v27, %v5660_v18  ;;  %v5686_v40 = vmul.f32 %v2035_v21, %v1779_v2 }
 0x24b   : > { %v5688_v53 = vmul.f32 %v2051_v37, %v1795_v19  ;;  %v1541_v32 = vadd.f32 %v1413_v22, %v5646_v29  ;;  %v1158_v4 = vmul.f32 0.044715, %v5673_v8  ;;  %v1160_v30 = vmul.f32 0.044715, %v5677_v11 }
 0x24c   : > { %v1446_v23 = vadd.f32 %v5398_v33, %v5328_v57  ;;  %v5696_v0 = vmul.f32 %v1272_v42, %v5612_v1  ;;  %v1543_v60 = vadd.f32 %v1415_v47, %v5650_v49  ;;  %v1558_v18 = vmul.f32 0.7978846, %v1430_v56  ;;  %v6595_v49 = vld [vmem:[#allocation92_spill] sm:$0xff] }
 0x24d   : > { %v3261_v31 = vpop.eup %3260  ;;  %v2247_v2 = vpack.c.bf16 %v5688_v53, %v5686_v40  ;;  %3270 = vtanh.f32 %v1655_v25  ;;  %v1780_v27 = vmul.f32 0.5, %v6578_v58  ;;  %v1669_v21 = vmul.f32 0.7978846, %v1541_v32  ;;  %v6593_v58 = vld [vmem:[#allocation27_spill] sm:$0xff]  ;;  %v6594_v53 = vld [vmem:[#allocation33_spill] sm:$0xff] }
 0x24e   : > { %v5701_v19 = vpop.eup %3262  ;;  %v2034_v14 = vadd.f32 1.0, %v3261_v31  ;;  %v1796_v33 = vmul.f32 0.5, %v5213_v26  ;;  %v1286_v22 = vmul.f32 %v1158_v4, %v5673_v8  ;;  %v1574_v42 = vmul.f32 0.7978846, %v1446_v23 }
 0x24f   : > { %6592 = vst [vmem:[#allocation50_spill] sm:$0xff] %v5701_v19  ;;  %v3265_v37 = vpop.eup %3264  ;;  %3272 = vtanh.f32 %v1558_v18  ;;  %v1671_v28 = vmul.f32 0.7978846, %v1543_v60  ;;  %v1288_v47 = vmul.f32 %v1160_v30, %v5677_v11  ;;  %v1686_v56 = vmul.f32 0.5, %v5241_v3  ;;  %v6597_v19 = vld [vmem:[#allocation88_spill] sm:$0xff] }
 0x250   : > { %v2050_v5 = vadd.f32 1.0, %v3265_v37  ;;  %v3267_v40 = vpop.eup %3266  ;;  %3274 = vtanh.f32 %v1669_v21  ;;  %v5709_v25 = vmul.f32 0.5, %v5328_v57  ;;  %v1432_v32 = vadd.f32 %v6594_v53, %v6593_v58 }
 0x251   : > { %v1448_v26 = vadd.f32 %v5401_v48, %v5332_v39  ;;  %v3269_v4 = vpop.eup %3268  ;;  %v2162_v23 = vmul.f32 %v2034_v14, %v5635_v10  ;;  %v2036_v60 = vadd.f32 1.0, %v3267_v40  ;;  %3276 = vtanh.f32 %v1574_v42  ;;  %v6598_v14 = vld [vmem:[#allocation56_spill] sm:$0xff] }
 0x252   : > { %v2178_v31 = vmul.f32 %v2050_v5, %v5642_v61  ;;  %v2052_v30 = vadd.f32 1.0, %v3269_v4  ;;  %v5718_v3 = vmul.f32 %v1286_v22, %v5673_v8  ;;  %v1560_v18 = vmul.f32 0.7978846, %v1432_v32  ;;  %v6599_v22 = vld [vmem:[#allocation86_spill] sm:$0xff] }
 0x253   : > { %v1576_v57 = vmul.f32 0.7978846, %v1448_v26  ;;  %v2164_v37 = vmul.f32 %v2036_v60, %v1780_v27  ;;  %v1685_v53 = vmul.f32 0.5, %v6595_v49  ;;  %v1701_v29 = vmul.f32 0.5, %v6596_v34 }
 0x254   : > { %v2246_v21 = vpack.c.bf16 %v2178_v31, %v2162_v23  ;;  %v2180_v48 = vmul.f32 %v2052_v30, %v1796_v33  ;;  %3278 = vtanh.f32 %v1560_v18  ;;  %v1941_v10 = vadd.f32 1.0, %v6597_v19 }
 0x255   : > { %v1957_v61 = vadd.f32 1.0, %v5439_v54  ;;  %3280 = vtanh.f32 %v1576_v57  ;;  %v1687_v42 = vmul.f32 0.5, %v6598_v14  ;;  %v1703_v5 = vmul.f32 0.5, %v6599_v22 }
 0x256   : > { %2512 = vmatprep.subr.bf16.mxu0 %v2246_v21  ;;  %v1943_v40 = vadd.f32 1.0, %v5407_v41  ;;  %v2248_v32 = vpack.c.bf16 %v2180_v48, %v2164_v37  ;;  %v5727_v27 = vmul.f32 %v1941_v10, %v1685_v53  ;;  %v1959_v34 = vadd.f32 1.0, %v5459_v59  ;;  %v6602_v10 = vld [vmem:[#allocation87_spill] sm:$0xff] }
 0x257   : > { %2513 = vmatpush1.bf16.msra.mxu0 %v2245_v16  ;;  %v5729_v49 = vmul.f32 %v1957_v61, %v1701_v29  ;;  %v5732_v33 = vpop.eup %3270  ;;  %3282 = vtanh.f32 %v1671_v28  ;;  %v5735_v54 = vmul.f32 %v1288_v47, %v5677_v11  ;;  %v1462_v19 = vadd.f32 %v5404_v55, %v5362_v43  ;;  %v6600_v28 = vld [vmem:[#allocation93_spill] sm:$0xff]  ;;  %v5752_v55 = vld [vmem:[%s6067_s3] sm:$0xff]  }
 0x258   : > { %v1478_v41 = vadd.f32 %v5512_v7, %v5449_v46  ;;  %2565 = vmatprep.subr.bf16.mxu1 %v2248_v32  ;;  %v5743_v16 = vmul.f32 %v1943_v40, %v1687_v42  ;;  %v5745_v59 = vmul.f32 %v1959_v34, %v1703_v5  ;;  %v1464_v4 = vadd.f32 %v6600_v28, %v5387_v44  ;;  %v6605_v5 = vld [vmem:[#allocation22_spill] sm:$0xff] }
 0x259   : > { %v3273_v26 = vpop.eup %3272  ;;  %v2201_v29 = vpack.c.bf16 %v5729_v49, %v5727_v27  ;;  %2566 = vmatpush1.bf16.msra.mxu1 %v2247_v2  ;;  %v1590_v47 = vmul.f32 0.7978846, %v1462_v19  ;;  %v1480_v31 = vadd.f32 %v5515_v13, %v5453_v24  ;;  %v1688_v30 = vmul.f32 0.5, %v6593_v58  ;;  %v6603_v58 = vld [vmem:[#allocation90_spill] sm:$0xff] }
 0x25a   : > { %2945 = vmatmul.mubr.msk.bf16.vlgmr.msra.gmra.mrb[80].mxu0 %vm2287_vm1, %v5752_v55  ;;  %v1942_v7 = vadd.f32 1.0, %v3273_v26  ;;  %v1606_v23 = vmul.f32 0.7978846, %v1478_v41  ;;  %v5758_v60 = vpop.eup %3274  ;;  %v1704_v2 = vmul.f32 0.5, %v5332_v39  ;;  %v2203_v18 = vpack.c.bf16 %v5745_v59, %v5743_v16  ;;  %v6604_v39 = vld [vmem:[#allocation20_spill] sm:$0xff]  ;;  %v6606_v40 = vld [vmem:[#allocation38_spill] sm:$0xff] }
 0x25b   : > { %v6601_v57 = vmov 0   ;;  %v1592_v21 = vmul.f32 0.7978846, %v1464_v4  ;;  %v3277_v37 = vpop.eup %3276  ;;  %3284 = vtanh.f32 %v1590_v47  ;;  %v1608_v48 = vmul.f32 0.7978846, %v1480_v31 }
 0x25c   : > { %2548 = vmatprep.mubr.bf16.mxu0 %v6601_v57  ;;  %v2070_v53 = vmul.f32 %v1942_v7, %v1686_v56  ;;  %v1717_v61 = vmul.f32 0.5, %v6602_v10  ;;  %2947 = vmatmul.mubr.msk.bf16.vlgmr.msra.gmra.mrb[80].mxu1 %vm2287_vm1, %v5752_v55  ;;  %v1958_v13 = vadd.f32 1.0, %v3277_v37  ;;  %3286 = vtanh.f32 %v1606_v23 }
 0x25d   : > { %v1733_v14 = vmul.f32 0.5, %v6603_v58  ;;  %v1973_v42 = vadd.f32 1.0, %v6604_v39  ;;  %2601 = vmatprep.mubr.bf16.mxu1 %v6601_v57  ;;  %3288 = vtanh.f32 %v1592_v21  ;;  %v1989_v22 = vadd.f32 1.0, %v5550_v50 }
 0x25e   : > { %v1719_v56 = vmul.f32 0.5, %v6605_v5  ;;  %v1735_v32 = vmul.f32 0.5, %v6606_v40  ;;  %v3279_v27 = vpop.eup %3278  ;;  %v2086_v49 = vmul.f32 %v1958_v13, %v5709_v25  ;;  %3290 = vtanh.f32 %v1608_v48  ;;  %v6608_v13 = vld [vmem:[#allocation39_spill] sm:$0xff] }
 0x25f   : > { %v5775_v34 = vmul.f32 %v1973_v42, %v1717_v61  ;;  %v1975_v19 = vadd.f32 1.0, %v5521_v12  ;;  %v3281_v41 = vpop.eup %3280  ;;  %v1944_v26 = vadd.f32 1.0, %v3279_v27  ;;  %v5778_v28 = vmul.f32 %v1989_v22, %v1733_v14  ;;  %v5791_v12 = vld [vmem:[%s6067_s3 + $0x8] sm:$0xff]   ;;  %v6607_v61 = vld [vmem:[#allocation40_spill] sm:$0xff]  ;;  %v6609_v22 = vld [vmem:[#allocation34_spill] sm:$0xff] }
 0x260   : > { %v1991_v4 = vadd.f32 1.0, %v5570_v62  ;;  %v1494_v50 = vadd.f32 %v5518_v20, %v5481_v9  ;;  %v2202_v7 = vpack.c.bf16 %v2086_v49, %v2070_v53  ;;  %v1960_v47 = vadd.f32 1.0, %v3281_v41  ;;  %v6611_v27 = vld [vmem:[#allocation23_spill] sm:$0xff] }
 0x261   : > { %v1718_v23 = vmul.f32 0.5, %v5362_v43  ;;  %v1510_v25 = vadd.f32 %v5623_v63, %v5560_v45  ;;  %v5786_v31 = vpop.eup %3282  ;;  %v2217_v20 = vpack.c.bf16 %v5778_v28, %v5775_v34  ;;  %v5797_v62 = vmul.f32 %v1975_v19, %v1719_v56  ;;  %v6610_v56 = vld [vmem:[#allocation25_spill] sm:$0xff] }
 0x262   : > { %2946 = vmatmul.mubr.msk.bf16.gmra.mrb[84].mxu0 %vm2287_vm1, %v5791_v12  ;;  %v5799_v21 = vmul.f32 %v1991_v4, %v1735_v32  ;;  %v1622_v43 = vmul.f32 0.7978846, %v1494_v50  ;;  %2612 = vmatprep.subr.bf16.mxu0 %v2202_v7  ;;  %v2072_v63 = vmul.f32 %v1944_v26, %v1688_v30  ;;  %v2088_v37 = vmul.f32 %v1960_v47, %v1704_v2  ;;  %v6613_v4 = vld [vmem:[#allocation61_spill] sm:$0xff] }
 0x263   : > { %v1734_v53 = vmul.f32 0.5, %v5449_v46  ;;  %v1638_v48 = vmul.f32 0.7978846, %v1510_v25  ;;  %2644 = vmatprep.mubr.bf16.mxu0 %v6601_v57  ;;  %2613 = vmatpush1.bf16.msra.mxu0 %v2201_v29  ;;  %v1496_v58 = vadd.f32 %v6608_v13, %v6607_v61  ;;  %v1512_v14 = vadd.f32 %v5626_v51, %v5564_v36 }
 0x264   : > { %v2219_v10 = vpack.c.bf16 %v5799_v21, %v5797_v62  ;;  %3292 = vtanh.f32 %v1622_v43  ;;  %v2204_v39 = vpack.c.bf16 %v2088_v37, %v2072_v63  ;;  %2948 = vmatmul.mubr.msk.bf16.gmra.mrb[84].mxu1 %vm2287_vm1, %v5791_v12  ;;  %v1720_v46 = vmul.f32 0.5, %v5387_v44  ;;  %v6612_v44 = vld [vmem:[#allocation26_spill] sm:$0xff] }
 0x265   : > { %v1736_v30 = vmul.f32 0.5, %v5453_v24  ;;  %3294 = vtanh.f32 %v1638_v48  ;;  %v3285_v29 = vpop.eup %3284  ;;  %v1624_v2 = vmul.f32 0.7978846, %v1496_v58  ;;  %v1640_v42 = vmul.f32 0.7978846, %v1512_v14  ;;  %2697 = vmatprep.mubr.bf16.mxu1 %v6601_v57 }
 0x266   : > { %v1749_v5 = vmul.f32 0.5, %v6609_v22  ;;  %v1765_v40 = vmul.f32 0.5, %v6610_v56  ;;  %v3287_v32 = vpop.eup %3286  ;;  %2665 = vmatprep.subr.bf16.mxu1 %v2204_v39  ;;  %v1974_v51 = vadd.f32 1.0, %v3285_v29  ;;  %v2005_v49 = vadd.f32 1.0, %v6611_v27 }
 0x267   : > { %v2021_v19 = vadd.f32 1.0, %v5663_v38  ;;  %v1751_v41 = vmul.f32 0.5, %v6612_v44  ;;  %v3289_v24 = vpop.eup %3288  ;;  %2666 = vmatpush1.bf16.msra.mxu1 %v2203_v18  ;;  %v1990_v26 = vadd.f32 1.0, %v3287_v32  ;;  %3296 = vtanh.f32 %v1624_v2  ;;  %v6614_v32 = vld [vmem:[#allocation50_spill] sm:$0xff] }
 0x268   : > { %v1767_v50 = vmul.f32 0.5, %v6613_v4  ;;  %v2007_v7 = vadd.f32 1.0, %v5632_v6  ;;  %v3291_v47 = vpop.eup %3290  ;;  %v2102_v25 = vmul.f32 %v1974_v51, %v1718_v23  ;;  %v1976_v62 = vadd.f32 1.0, %v3289_v24  ;;  %v6616_v24 = vld [vmem:[#allocation37_spill] sm:$0xff]  ;;  %v6617_v4 = vld [vmem:[#allocation24_spill] sm:$0xff] }
 0x269   : > { %3298 = vtanh.f32 %v1640_v42  ;;  %v2133_v21 = vmul.f32 %v2005_v49, %v1749_v5  ;;  %v2118_v43 = vmul.f32 %v1990_v26, %v1734_v53  ;;  %v1992_v38 = vadd.f32 1.0, %v3291_v47 }
 0x26a   : > { %v2149_v63 = vmul.f32 %v2021_v19, %v1765_v40  ;;  %v2023_v37 = vadd.f32 1.0, %v5681_v15  ;;  %v2104_v48 = vmul.f32 %v1976_v62, %v1720_v46  ;;  %v2135_v13 = vmul.f32 %v2007_v7, %v1751_v41 }
 0x26b   : > { %v1526_v16 = vadd.f32 %v5629_v52, %v5592_v17  ;;  %v1542_v59 = vadd.f32 %v5718_v3, %v5673_v8  ;;  %v2218_v18 = vpack.c.bf16 %v2118_v43, %v2102_v25  ;;  %v2120_v6 = vmul.f32 %v1992_v38, %v1736_v30 }
 0x26c   : > { %v2233_v58 = vpack.c.bf16 %v2149_v63, %v2133_v21  ;;  %v2151_v23 = vmul.f32 %v2023_v37, %v1767_v50  ;;  %v1528_v15 = vadd.f32 %v5696_v0, %v5612_v1  ;;  %v1544_v46 = vadd.f32 %v5735_v54, %v5677_v11 }
 0x26d   : > { %v1654_v14 = vmul.f32 0.7978846, %v1526_v16  ;;  %v1670_v39 = vmul.f32 0.7978846, %v1542_v59  ;;  %2614 = vmatprep.subr.bf16.mxu0 %v2218_v18  ;;  %v2220_v53 = vpack.c.bf16 %v2120_v6, %v2104_v48  ;;  %v1750_v3 = vmul.f32 0.5, %v5481_v9  ;;  %v6615_v9 = vld [vmem:[#allocation19_spill] sm:$0xff] }
 0x26e   : > { %v3293_v29 = vpop.eup %3292  ;;  %v2235_v2 = vpack.c.bf16 %v2151_v23, %v2135_v13  ;;  %2615 = vmatpush1.bf16.msra.mxu0 %v2217_v20  ;;  %v1766_v30 = vmul.f32 0.5, %v5560_v45  ;;  %v1656_v5 = vmul.f32 0.7978846, %v1528_v15  ;;  %v1672_v56 = vmul.f32 0.7978846, %v1544_v46  ;;  %v5856_v15 = vpop.permute.xlu1 %2264 }
 0x26f   : > { %v3295_v52 = vpop.eup %3294  ;;  %v2006_v42 = vadd.f32 1.0, %v3293_v29  ;;  %3300 = vtanh.f32 %v1654_v14  ;;  %2667 = vmatprep.subr.bf16.mxu1 %v2220_v53  ;;  %v1752_v54 = vmul.f32 0.5, %v6607_v61  ;;  %v1781_v40 = vmul.f32 0.5, %v5568_v35 }
 0x270   : > { %v2022_v22 = vadd.f32 1.0, %v3295_v52  ;;  %3302 = vtanh.f32 %v1670_v39  ;;  %2668 = vmatpush1.bf16.msra.mxu1 %v2219_v10  ;;  %v2037_v34 = vadd.f32 1.0, %v6614_v32  ;;  %v1797_v45 = vmul.f32 0.5, %v6615_v9 }
 0x271   : > { %v2134_v0 = vmul.f32 %v2006_v42, %v1750_v3  ;;  %v3297_v28 = vpop.eup %3296  ;;  %3304 = vtanh.f32 %v1656_v5  ;;  %v2053_v51 = vadd.f32 1.0, %v5758_v60  ;;  %v1768_v49 = vmul.f32 0.5, %v5564_v36 }
 0x272   : > { %v2150_v20 = vmul.f32 %v2022_v22, %v1766_v30  ;;  %v2008_v19 = vadd.f32 1.0, %v3297_v28  ;;  %3306 = vtanh.f32 %v1672_v56  ;;  %v2165_v10 = vmul.f32 %v2037_v34, %v1781_v40  ;;  %v5886_v28 = vpop.permute.xlu1 %2274 }
 0x273   : > { %v3299_v27 = vpop.eup %3298  ;;  %v2181_v61 = vmul.f32 %v2053_v51, %v1797_v45  ;;  %v2039_v35 = vadd.f32 1.0, %v5732_v33  ;;  %v1783_v26 = vmul.f32 0.5, %v6616_v24  ;;  %v1799_v50 = vmul.f32 0.5, %v6617_v4 }
 0x274   : > { %v2234_v44 = vpack.c.bf16 %v2150_v20, %v2134_v0  ;;  %v2024_v41 = vadd.f32 1.0, %v3299_v27  ;;  %v2055_v7 = vadd.f32 1.0, %v5786_v31  ;;  %v2136_v47 = vmul.f32 %v2008_v19, %v1752_v54 }
 0x275   : > { %v2249_v25 = vpack.c.bf16 %v2181_v61, %v2165_v10  ;;  %v2167_v36 = vmul.f32 %v2039_v35, %v1783_v26  ;;  %v1782_v33 = vmul.f32 0.5, %v5592_v17  ;;  %v1798_v48 = vmul.f32 0.5, %v5673_v8  ;;  %v5852_v17 = vpop.permute.xlu0 %2259 }
 0x276   : > { %2616 = vmatprep.subr.bf16.mxu0 %v2234_v44  ;;  %v2152_v60 = vmul.f32 %v2024_v41, %v1768_v49  ;;  %v2183_v62 = vmul.f32 %v2055_v7, %v1799_v50  ;;  %v1800_v23 = vmul.f32 0.5, %v5677_v11 }
 0x277   : > { %2617 = vmatpush1.bf16.msra.mxu0 %v2233_v58  ;;  %v1784_v58 = vmul.f32 0.5, %v5612_v1 }
 0x278   : > { %v2236_v21 = vpack.c.bf16 %v2152_v60, %v2136_v47  ;;  %v2251_v38 = vpack.c.bf16 %v2183_v62, %v2167_v36 }
 0x279   : > { %v3301_v43 = vpop.eup %3300  ;;  %v5881_v34 = vpop.permute.xlu0 %2269 }
 0x27a   : > { %v3303_v63 = vpop.eup %3302  ;;  %2669 = vmatprep.subr.bf16.mxu1 %v2236_v21  ;;  %v2038_v37 = vadd.f32 1.0, %v3301_v43 }
 0x27b   : > { %2670 = vmatpush1.bf16.msra.mxu1 %v2235_v2  ;;  %v2054_v13 = vadd.f32 1.0, %v3303_v63  ;;  %v3305_v31 = vpop.eup %3304 }
 0x27c   : > { %v3307_v16 = vpop.eup %3306  ;;  %v2166_v59 = vmul.f32 %v2038_v37, %v1782_v33  ;;  %v2040_v6 = vadd.f32 1.0, %v3305_v31 }
 0x27d   : > { %v2182_v18 = vmul.f32 %v2054_v13, %v1798_v48  ;;  %v2056_v14 = vadd.f32 1.0, %v3307_v16 }
 0x27e   : > { %v2168_v29 = vmul.f32 %v2040_v6, %v1784_v58 }
 0x27f   : > { %v2250_v39 = vpack.c.bf16 %v2182_v18, %v2166_v59  ;;  %v2184_v53 = vmul.f32 %v2056_v14, %v1800_v23 }
 0x281   : > { %2618 = vmatprep.subr.bf16.mxu0 %v2250_v39  ;;  %v2252_v2 = vpack.c.bf16 %v2184_v53, %v2168_v29 }
 0x282   : > { %2619 = vmatpush1.bf16.msra.mxu0 %v2249_v25 }
 0x283   : > { %2671 = vmatprep.subr.bf16.mxu1 %v2252_v2  ;;  %v2328_v8 = vpop.f32.mrb[64].mxu0 }
 0x284   : > { %2672 = vmatpush1.bf16.msra.mxu1 %v2251_v38  ;;  %v2329_v1 = vadd.f32 %v2328_v8, %v5852_v17  ;;  %v2330_v11 = vpop.f32.mrb[65].mxu0  ;;  %v2381_v46 = vpop.f32.mrb[64].mxu1 }
 0x285   : > { %2949 = vmatmul.mubr.msk.bf16.vlgmr.msra.gmra.mrb[88].mxu0 %vm2287_vm1, %v5752_v55  ;;  %v2331_v52 = vadd.f32 %v2330_v11, %v5852_v17  ;;  %v2332_v3 = vpop.f32.mrb[66].mxu0  ;;  %v2382_v30 = vadd.f32 %v2381_v46, %v5852_v17  ;;  %v2383_v42 = vpop.f32.mrb[65].mxu1 }
 0x286   : > { %2654 = vmatprep.mubr.bf16.mxu0 %v6601_v57  ;;  %2718 = vst [vmem:[%s5865_s7] sm:$0xff] %v2329_v1  ;;  %v2333_v22 = vadd.f32 %v2332_v3, %v5856_v15  ;;  %v2334_v5 = vpop.f32.mrb[67].mxu0  ;;  %v2385_v56 = vpop.f32.mrb[66].mxu1 }
 0x287   : > { %2951 = vmatmul.mubr.msk.bf16.vlgmr.msra.gmra.mrb[88].mxu1 %vm2287_vm1, %v5752_v55  ;;  %2719 = vst [vmem:[%s5865_s7 + $0x8] sm:$0xff] %v2331_v52  ;;  %v2384_v55 = vadd.f32 %v2383_v42, %v5852_v17  ;;  %v2335_v0 = vadd.f32 %v2334_v5, %v5856_v15  ;;  %2720 = vst [vmem:[%s5865_s7 + $0x10] sm:$0xff] %v2382_v30  ;;  %v2386_v54 = vadd.f32 %v2385_v56, %v5856_v15  ;;  %v2387_v40 = vpop.f32.mrb[67].mxu1 }
 0x288   : > { %2707 = vmatprep.mubr.bf16.mxu1 %v6601_v57  ;;  %2734 = vst [vmem:[%s5865_s7 + $0x80] sm:$0xff] %v2333_v22  ;;  %v2388_v32 = vadd.f32 %v2387_v40, %v5856_v15 }
 0x289   : > { %2721 = vst [vmem:[%s5865_s7 + $0x18] sm:$0xff] %v2384_v55  ;;  %2735 = vst [vmem:[%s5865_s7 + $0x88] sm:$0xff] %v2335_v0 }
 0x28a   : > { %2736 = vst [vmem:[%s5865_s7 + $0x90] sm:$0xff] %v2386_v54  ;;  %2737 = vst [vmem:[%s5865_s7 + $0x98] sm:$0xff] %v2388_v32 }
 0x28b   : > { %v2338_v57 = vpop.f32.mrb[68].mxu0 }
 0x28c   : > { %v2339_v20 = vadd.f32 %v2338_v57, %v5881_v34  ;;  %v2340_v9 = vpop.f32.mrb[69].mxu0  ;;  %v2391_v45 = vpop.f32.mrb[68].mxu1 }
 0x28d   : > { %2950 = vmatmul.mubr.msk.bf16.gmra.mrb[92].mxu0 %vm2287_vm1, %v5791_v12  ;;  %v2341_v51 = vadd.f32 %v2340_v9, %v5881_v34  ;;  %v2342_v27 = vpop.f32.mrb[70].mxu0  ;;  %v2392_v49 = vadd.f32 %v2391_v45, %v5881_v34  ;;  %v2393_v19 = vpop.f32.mrb[69].mxu1 }
 0x28e   : > { %2750 = vst [vmem:[%s5865_s7 + $0x100] sm:$0xff] %v2339_v20  ;;  %v2343_v10 = vadd.f32 %v2342_v27, %v5886_v28  ;;  %v2344_v44 = vpop.f32.mrb[71].mxu0  ;;  %v2394_v41 = vadd.f32 %v2393_v19, %v5881_v34  ;;  %v2395_v61 = vpop.f32.mrb[70].mxu1 }
 0x28f   : > { %2952 = vmatmul.mubr.msk.bf16.gmra.mrb[92].mxu1 %vm2287_vm1, %v5791_v12  ;;  %2751 = vst [vmem:[%s5865_s7 + $0x108] sm:$0xff] %v2341_v51  ;;  %v2345_v35 = vadd.f32 %v2344_v44, %v5886_v28  ;;  %2752 = vst [vmem:[%s5865_s7 + $0x110] sm:$0xff] %v2392_v49  ;;  %v2396_v12 = vadd.f32 %v2395_v61, %v5886_v28  ;;  %v2397_v24 = vpop.f32.mrb[71].mxu1 }
 0x290   : > { %2766 = vst [vmem:[%s5865_s7 + $0x180] sm:$0xff] %v2343_v10  ;;  %2753 = vst [vmem:[%s5865_s7 + $0x118] sm:$0xff] %v2394_v41  ;;  %v2398_v26 = vadd.f32 %v2397_v24, %v5886_v28 }
 0x291   : > { %2767 = vst [vmem:[%s5865_s7 + $0x188] sm:$0xff] %v2345_v35  ;;  %2768 = vst [vmem:[%s5865_s7 + $0x190] sm:$0xff] %v2396_v12 }
 0x292   : > { %2769 = vst [vmem:[%s5865_s7 + $0x198] sm:$0xff] %v2398_v26 }
 0x2d8   : > { %v2434_v4 = vpop.f32.mrb[72].mxu0 }
 0x2d9   : > { %v2435_v50 = vadd.f32 %v2434_v4, %v5852_v17  ;;  %v2436_v7 = vpop.f32.mrb[73].mxu0 }
 0x2da   : > { %v2437_v47 = vadd.f32 %v2436_v7, %v5852_v17  ;;  %v2438_v60 = vpop.f32.mrb[74].mxu0 }
 0x2db   : > { %2722 = vst [vmem:[%s5865_s7 + $0x20] sm:$0xff] %v2435_v50  ;;  %v2487_v25 = vpop.f32.mrb[72].mxu1  ;;  %v2439_v36 = vadd.f32 %v2438_v60, %v5856_v15  ;;  %v2440_v62 = vpop.f32.mrb[75].mxu0 }
 0x2dc   : > { %v2488_v21 = vadd.f32 %v2487_v25, %v5852_v17  ;;  %2723 = vst [vmem:[%s5865_s7 + $0x28] sm:$0xff] %v2437_v47  ;;  %v2489_v43 = vpop.f32.mrb[73].mxu1  ;;  %v2441_v38 = vadd.f32 %v2440_v62, %v5856_v15 }
 0x2dd   : > { %v2490_v63 = vadd.f32 %v2489_v43, %v5852_v17  ;;  %2738 = vst [vmem:[%s5865_s7 + $0xa0] sm:$0xff] %v2439_v36  ;;  %v2491_v37 = vpop.f32.mrb[74].mxu1 }
 0x2de   : > { %2724 = vst [vmem:[%s5865_s7 + $0x30] sm:$0xff] %v2488_v21  ;;  %v2492_v33 = vadd.f32 %v2491_v37, %v5856_v15  ;;  %2739 = vst [vmem:[%s5865_s7 + $0xa8] sm:$0xff] %v2441_v38  ;;  %v2493_v48 = vpop.f32.mrb[75].mxu1 }
 0x2df   : > { %2725 = vst [vmem:[%s5865_s7 + $0x38] sm:$0xff] %v2490_v63  ;;  %v2494_v13 = vadd.f32 %v2493_v48, %v5856_v15 }
 0x2e0   : > { %2740 = vst [vmem:[%s5865_s7 + $0xb0] sm:$0xff] %v2492_v33  ;;  %v2444_v31 = vpop.f32.mrb[76].mxu0 }
 0x2e1   : > { %2741 = vst [vmem:[%s5865_s7 + $0xb8] sm:$0xff] %v2494_v13  ;;  %v2445_v16 = vadd.f32 %v2444_v31, %v5881_v34  ;;  %v2446_v59 = vpop.f32.mrb[77].mxu0 }
 0x2e2   : > { %v2447_v18 = vadd.f32 %v2446_v59, %v5881_v34  ;;  %v2448_v6 = vpop.f32.mrb[78].mxu0 }
 0x2e3   : > { %2754 = vst [vmem:[%s5865_s7 + $0x120] sm:$0xff] %v2445_v16  ;;  %v2497_v58 = vpop.f32.mrb[76].mxu1  ;;  %v2449_v23 = vadd.f32 %v2448_v6, %v5886_v28  ;;  %v2450_v14 = vpop.f32.mrb[79].mxu0 }
 0x2e4   : > { %v2498_v39 = vadd.f32 %v2497_v58, %v5881_v34  ;;  %2755 = vst [vmem:[%s5865_s7 + $0x128] sm:$0xff] %v2447_v18  ;;  %v2499_v29 = vpop.f32.mrb[77].mxu1  ;;  %v2451_v53 = vadd.f32 %v2450_v14, %v5886_v28 }
 0x2e5   : > { %v2500_v2 = vadd.f32 %v2499_v29, %v5881_v34  ;;  %2770 = vst [vmem:[%s5865_s7 + $0x1a0] sm:$0xff] %v2449_v23  ;;  %v2501_v8 = vpop.f32.mrb[78].mxu1 }
 0x2e6   : > { %2756 = vst [vmem:[%s5865_s7 + $0x130] sm:$0xff] %v2498_v39  ;;  %v2502_v1 = vadd.f32 %v2501_v8, %v5886_v28  ;;  %2771 = vst [vmem:[%s5865_s7 + $0x1a8] sm:$0xff] %v2451_v53  ;;  %v2503_v11 = vpop.f32.mrb[79].mxu1 }
 0x2e7   : > { %2757 = vst [vmem:[%s5865_s7 + $0x138] sm:$0xff] %v2500_v2  ;;  %v2504_v46 = vadd.f32 %v2503_v11, %v5886_v28 }
 0x2e8   : > { %2772 = vst [vmem:[%s5865_s7 + $0x1b0] sm:$0xff] %v2502_v1 }
 0x2e9   : > { %2773 = vst [vmem:[%s5865_s7 + $0x1b8] sm:$0xff] %v2504_v46 }
 0x32d   : > { %v2540_v52 = vpop.f32.mrb[80].mxu0 }
 0x32e   : > { %v2541_v3 = vadd.f32 %v2540_v52, %v5852_v17  ;;  %v2542_v30 = vpop.f32.mrb[81].mxu0 }
 0x32f   : > { %v2543_v42 = vadd.f32 %v2542_v30, %v5852_v17  ;;  %v2544_v22 = vpop.f32.mrb[82].mxu0  ;;  %v2593_v5 = vpop.f32.mrb[80].mxu1 }
 0x330   : > { %2726 = vst [vmem:[%s5865_s7 + $0x40] sm:$0xff] %v2541_v3  ;;  %v2545_v55 = vadd.f32 %v2544_v22, %v5856_v15  ;;  %v2546_v56 = vpop.f32.mrb[83].mxu0  ;;  %v2594_v0 = vadd.f32 %v2593_v5, %v5852_v17  ;;  %v2595_v54 = vpop.f32.mrb[81].mxu1 }
 0x331   : > { %2727 = vst [vmem:[%s5865_s7 + $0x48] sm:$0xff] %v2543_v42  ;;  %v2547_v40 = vadd.f32 %v2546_v56, %v5856_v15  ;;  %v2596_v32 = vadd.f32 %v2595_v54, %v5852_v17  ;;  %v2597_v57 = vpop.f32.mrb[82].mxu1 }
 0x332   : > { %2742 = vst [vmem:[%s5865_s7 + $0xc0] sm:$0xff] %v2545_v55  ;;  %2728 = vst [vmem:[%s5865_s7 + $0x50] sm:$0xff] %v2594_v0  ;;  %v2598_v20 = vadd.f32 %v2597_v57, %v5856_v15  ;;  %v2599_v9 = vpop.f32.mrb[83].mxu1 }
 0x333   : > { %2743 = vst [vmem:[%s5865_s7 + $0xc8] sm:$0xff] %v2547_v40  ;;  %2729 = vst [vmem:[%s5865_s7 + $0x58] sm:$0xff] %v2596_v32  ;;  %v2600_v45 = vadd.f32 %v2599_v9, %v5856_v15 }
 0x334   : > { %2744 = vst [vmem:[%s5865_s7 + $0xd0] sm:$0xff] %v2598_v20 }
 0x335   : > { %v2550_v51 = vpop.f32.mrb[84].mxu0  ;;  %2745 = vst [vmem:[%s5865_s7 + $0xd8] sm:$0xff] %v2600_v45 }
 0x336   : > { %v2551_v27 = vadd.f32 %v2550_v51, %v5881_v34  ;;  %v2552_v49 = vpop.f32.mrb[85].mxu0 }
 0x337   : > { %v2553_v19 = vadd.f32 %v2552_v49, %v5881_v34  ;;  %v2554_v10 = vpop.f32.mrb[86].mxu0  ;;  %v2603_v44 = vpop.f32.mrb[84].mxu1 }
 0x338   : > { %2758 = vst [vmem:[%s5865_s7 + $0x140] sm:$0xff] %v2551_v27  ;;  %v2555_v41 = vadd.f32 %v2554_v10, %v5886_v28  ;;  %v2556_v61 = vpop.f32.mrb[87].mxu0  ;;  %v2604_v35 = vadd.f32 %v2603_v44, %v5881_v34  ;;  %v2605_v12 = vpop.f32.mrb[85].mxu1 }
 0x339   : > { %2759 = vst [vmem:[%s5865_s7 + $0x148] sm:$0xff] %v2553_v19  ;;  %v2557_v24 = vadd.f32 %v2556_v61, %v5886_v28  ;;  %v2606_v26 = vadd.f32 %v2605_v12, %v5881_v34  ;;  %v2607_v4 = vpop.f32.mrb[86].mxu1 }
 0x33a   : > { %2774 = vst [vmem:[%s5865_s7 + $0x1c0] sm:$0xff] %v2555_v41  ;;  %2760 = vst [vmem:[%s5865_s7 + $0x150] sm:$0xff] %v2604_v35  ;;  %v2608_v50 = vadd.f32 %v2607_v4, %v5886_v28  ;;  %v2609_v7 = vpop.f32.mrb[87].mxu1 }
 0x33b   : > { %2775 = vst [vmem:[%s5865_s7 + $0x1c8] sm:$0xff] %v2557_v24  ;;  %2761 = vst [vmem:[%s5865_s7 + $0x158] sm:$0xff] %v2606_v26  ;;  %v2610_v47 = vadd.f32 %v2609_v7, %v5886_v28 }
 0x33c   : > { %2776 = vst [vmem:[%s5865_s7 + $0x1d0] sm:$0xff] %v2608_v50 }
 0x33d   : > { %2777 = vst [vmem:[%s5865_s7 + $0x1d8] sm:$0xff] %v2610_v47 }
 0x358   : > { %v2646_v60 = vpop.f32.mrb[88].mxu0 }
 0x359   : > { %v2647_v25 = vadd.f32 %v2646_v60, %v5852_v17  ;;  %v2648_v36 = vpop.f32.mrb[89].mxu0 }
 0x35a   : > { %v2649_v62 = vadd.f32 %v2648_v36, %v5852_v17  ;;  %v2650_v21 = vpop.f32.mrb[90].mxu0  ;;  %v2699_v43 = vpop.f32.mrb[88].mxu1 }
 0x35b   : > { %2730 = vst [vmem:[%s5865_s7 + $0x60] sm:$0xff] %v2647_v25  ;;  %v2651_v38 = vadd.f32 %v2650_v21, %v5856_v15  ;;  %v2652_v63 = vpop.f32.mrb[91].mxu0  ;;  %v2700_v37 = vadd.f32 %v2699_v43, %v5852_v17  ;;  %v2701_v33 = vpop.f32.mrb[89].mxu1 }
 0x35c   : > { %2731 = vst [vmem:[%s5865_s7 + $0x68] sm:$0xff] %v2649_v62  ;;  %v2653_v48 = vadd.f32 %v2652_v63, %v5856_v15  ;;  %v2702_v13 = vadd.f32 %v2701_v33, %v5852_v17  ;;  %v2703_v31 = vpop.f32.mrb[90].mxu1 }
 0x35d   : > { %2746 = vst [vmem:[%s5865_s7 + $0xe0] sm:$0xff] %v2651_v38  ;;  %2732 = vst [vmem:[%s5865_s7 + $0x70] sm:$0xff] %v2700_v37  ;;  %v2704_v16 = vadd.f32 %v2703_v31, %v5856_v15  ;;  %v2705_v59 = vpop.f32.mrb[91].mxu1 }
 0x35e   : > { %2747 = vst [vmem:[%s5865_s7 + $0xe8] sm:$0xff] %v2653_v48  ;;  %2733 = vst [vmem:[%s5865_s7 + $0x78] sm:$0xff] %v2702_v13  ;;  %v2706_v18 = vadd.f32 %v2705_v59, %v5856_v15 }
 0x35f   : > { %2748 = vst [vmem:[%s5865_s7 + $0xf0] sm:$0xff] %v2704_v16 }
 0x360   : > { %v2656_v6 = vpop.f32.mrb[92].mxu0  ;;  %2749 = vst [vmem:[%s5865_s7 + $0xf8] sm:$0xff] %v2706_v18 }
 0x361   : > { %v2657_v17 = vadd.f32 %v2656_v6, %v5881_v34  ;;  %v2658_v58 = vpop.f32.mrb[93].mxu0 }
 0x362   : > { %v2659_v23 = vadd.f32 %v2658_v58, %v5881_v34  ;;  %v2660_v14 = vpop.f32.mrb[94].mxu0  ;;  %v2709_v39 = vpop.f32.mrb[92].mxu1 }
 0x363   : > { %2762 = vst [vmem:[%s5865_s7 + $0x160] sm:$0xff] %v2657_v17  ;;  %v2661_v29 = vadd.f32 %v2660_v14, %v5886_v28  ;;  %v2662_v15 = vpop.f32.mrb[95].mxu0  ;;  %v2710_v53 = vadd.f32 %v2709_v39, %v5881_v34  ;;  %v2711_v2 = vpop.f32.mrb[93].mxu1 }
 0x364   : > { %2763 = vst [vmem:[%s5865_s7 + $0x168] sm:$0xff] %v2659_v23  ;;  %v2663_v8 = vadd.f32 %v2662_v15, %v5886_v28  ;;  %v2712_v1 = vadd.f32 %v2711_v2, %v5881_v34  ;;  %v2713_v11 = vpop.f32.mrb[94].mxu1 }
 0x365   : > { %2778 = vst [vmem:[%s5865_s7 + $0x1e0] sm:$0xff] %v2661_v29  ;;  %2764 = vst [vmem:[%s5865_s7 + $0x170] sm:$0xff] %v2710_v53  ;;  %v2714_v46 = vadd.f32 %v2713_v11, %v5886_v28  ;;  %v2715_v52 = vpop.f32.mrb[95].mxu1 }
 0x366   : > { %2779 = vst [vmem:[%s5865_s7 + $0x1e8] sm:$0xff] %v2663_v8  ;;  %2765 = vst [vmem:[%s5865_s7 + $0x178] sm:$0xff] %v2712_v1  ;;  %v2716_v34 = vadd.f32 %v2715_v52, %v5886_v28 }
 0x367   : > { %2780 = vst [vmem:[%s5865_s7 + $0x1f0] sm:$0xff] %v2714_v46 }
 0x368   : > { %2781 = vst [vmem:[%s5865_s7 + $0x1f8] sm:$0xff] %v2716_v34 }
 0x369   : > { %3353 = shalt.err (!%p3350_p4)
}
 0x36a   : > { %s3354_s11 = scalar_lea.hbm %s6006_s13, 8192  ;;  %s3358_s18 = scalar_lea.hbm %s6069_s5, 32768 }
 0x36b   : > { %p3355_p6 = scmp.ne.s32.totalorder %s6006_s13, %s3354_s11  ;;  %p3359_p1 = scmp.lt.u32.totalorder %s6006_s13, %s6069_s5 }
 0x36c   : > { %p3360_p3 = scmp.lt.u32.totalorder %s3358_s18, %s3354_s11  ;;  %p3362_p8 = scmp.lt.u32.totalorder %s3354_s11, %s6006_s13 }
 0x36d   : > { %p3356_p7 = pnand %p3355_p6, %p6618_p9 }
 0x36e   : > { %p3361_p5 = por %p3360_p3, %p3359_p1 }
 0x36f   : > { %p3357_p10 = pneg %p3356_p7 }
 0x370   : > { %p3363_p12 = por %p3362_p8, %p3361_p5 }
 0x372   : > { %p3364_p0 = pnand %p3363_p12, %p3357_p10 }
 0x374   : > { %3367 = shalt.err (!%p3364_p0)
}
 0x375   : > { %s3446_s17 = smov 2048   ;;  %s3447_s10 = smov 4096  }
 0x376   : > { %s3448_s8 = smov 128  }
 0x377   : > { %2961 = dma.vmem_to_hbm [thread:$0]  (%p6618_p9), %s5998_s21, 8192, %s6006_s13, %s2783_s28, %s3446_s17, %s3447_s10, %s3448_s8  }
 0x378 PF: > { %s6619_s6 = sld [smem:[#allocation8_spill]]  ;;  %p2972_p11 = scmp.ge.s32.totalorder %s3438_s25, 2 }
 0x379   : > { %p6620_p13 = scmp.ne.s32.totalorder %s6205_s12, 0 }
 0x37b   : > { %p2968_p2 = pnand %p2972_p11, %p6620_p13 }
 0x37e   : > { %s2813_s30 = sand.u32 1, %s6619_s6  }
 0x37f   : > { %s2814_s15 = scalar_lea.sflag [#allocation4], %s2813_s30 }
 0x380   : > { %3405 = dma.done.wait (!%p2968_p2), %s2814_s15, 8192  }
 0x381   : > { %3407 = vsyncadd (!%p2968_p2), %s2814_s15, 4294959104  ;;  %s21_s25 = sadd.s32 1, %s3438_s25   ;;  %s6621_s9 = sld [smem:[#allocation9_spill]] }
 0x382   : > { %p18_p4 = scmp.ge.s32.totalorder %s21_s25, 6   ;;  %s6622_s18 = smov %s3414_s19 }
 0x383   : > { %s6623_s19 = smov %s3418_s20  ;;  %s6624_s20 = smov %s3557_s14 }
 0x384   : > { %s6625_s21 = smov %s3430_s23  ;;  %s6626_s22 = smov %s3434_s24 }
 0x385   : > { %s6628_s24 = smov %s6634_s29  ;;  %20 = sbr.rel (!%p18_p4) target bundleno = 7 (0x7), region = 85 }
 0x387   : > { %s6627_s23 = smov %s6621_s9 }
 0x38c   :  { %2819 = vsyncpa [#allocation3], 1 }
 0x38d   :  { %2821 = vsyncpa [#allocation3 + $0x1], 1 }
 0x38e   :  { %2822 = vsyncpa [#allocation4], 1 }
 0x38f   :  { %2824 = vsyncpa [#allocation4 + $0x1], 1 }

</bundles_post_ra>
